<compile_context>
chip_gen: v7x
topology: tpu7x:2x2x1
jax: 0.10.0
libtpu: 0.0.40
codegen_flags: <defaults>
</compile_context>

<pallas_src>
import functools
import math

import jax
import jax.numpy as jnp
from jax import lax
from jax.experimental import pallas as pl
from jax.experimental.pallas import tpu as pltpu

# Force true-f32 matmul/conv everywhere so the Pallas path and the pure-JAX
# reference agree to tight tolerances.
jax.config.update("jax_default_matmul_precision", "highest")

KH, KW = 3, 3          # conv_ks
PAD_H, PAD_W = 1, 1    # padding (with stride (2,1) keeps the output at (D, D))
NUM_FILTER = 1         # the module's own recurrence (cat along dim=2) requires 1


# ----------------------------------------------------------------------------
# Pallas kernel: the whole CnnBasedRnn stack + max pooling, state in VMEM.
# ----------------------------------------------------------------------------
def _cbr_rnn_fused_kernel(m_ref, bias_ref, x_ref, out_ref, xh_ref,
                          *, img_w, num_layer, t_chunk):
    """One grid step = one (lane tile, time chunk).

    m_ref    : VMEM f32[num_layer, 3D, 2D]  merged [Mx | Mh] per layer (resident)
    bias_ref : SMEM f32[num_layer]          conv biases
    x_ref    : VMEM f32[t_chunk, D, WB]     chunk of layer-0 inputs (lane-folded)
    out_ref  : VMEM f32[D, WB]              running max over time (resident acc)
    xh_ref   : VMEM f32[num_layer, 2D, WB]  per-layer [input_t ; h_{t-1}] state
    """
    tg = pl.program_id(1)
    d = out_ref.shape[0]
    wb = out_ref.shape[1]

    @pl.when(tg == 0)
    def _init():
        xh_ref[...] = jnp.zeros(xh_ref.shape, xh_ref.dtype)          # h_0 = 0
        out_ref[...] = jnp.full(out_ref.shape, -jnp.inf, out_ref.dtype)

    # Loop-invariant values hoisted out of the per-timestep loop: per-layer
    # weight tiles / biases and the folded-image edge masks.
    m_l = [m_ref[l] for l in range(num_layer)]
    b_l = [bias_ref[l] for l in range(num_layer)]
    lane = lax.broadcasted_iota(jnp.int32, (d, wb), 1) % img_w
    left_edge = lane == 0
    right_edge = lane == img_w - 1

    def step(tc, carry):
        cur = x_ref[tc]                                              # (D, WB)
        for l in range(num_layer):
            # Top half of the state slab <- this layer's input at time t.
            xh_ref[l, :d, :] = cur
            # Height axis of the strided 3x3 conv as one MXU matmul:
            #   y[dw*D + i, :] = sum_r M_l[dw*D+i, r] * [x_t ; h_{t-1}][r, :]
            y = jnp.dot(m_l[l], xh_ref[l],
                        preferred_element_type=jnp.float32)          # (3D, WB)
            y0 = y[0:d]            # kernel column dw=0 -> reads input col j-1
            y1 = y[d:2 * d]        # dw=1 -> col j
            y2 = y[2 * d:3 * d]    # dw=2 -> reads input col j+1
            # +/-1 width taps: XLU lane rolls, zeroed at each folded-image edge.
            y0s = jnp.where(left_edge, 0.0, pltpu.roll(y0, shift=1, axis=1))
            y2s = jnp.where(right_edge, 0.0, pltpu.roll(y2, shift=wb - 1, axis=1))
            cur = jnp.tanh(y0s + y1 + y2s + b_l[l])
            # Bottom half of the state slab <- h_t for the next timestep.
            xh_ref[l, d:, :] = cur
            # TODO(synk): inter-layer nn.Dropout(dropout_lstm) omitted (eval mode).
        # mode == 'max' pooling over the sequence, fused into the kernel.
        out_ref[...] = jnp.maximum(out_ref[...], cur)
        return carry

    lax.fori_loop(0, t_chunk, step, 0, unroll=True)


def _build_height_matrix(w, word_dim):
    """Fold the stride-2 height access + kernel rows of the 3x3 conv into one
    constant matrix.  w: (3, 3) [dh, dw].  Returns M (3D, 2D) acting on the
    vertical concat [x_t ; h_{t-1}] (rows 0..D-1 are x, D..2D-1 are h)."""
    d = word_dim
    i = jnp.arange(d)[:, None]          # output row
    r = jnp.arange(2 * d)[None, :]      # concat-input row
    mats = []
    for dw in range(KW):
        m = jnp.zeros((d, 2 * d), jnp.float32)
        for dh in range(KH):
            m = m + w[dh, dw] * (r == 2 * i + dh - PAD_H).astype(jnp.float32)
        mats.append(m)
    return jnp.concatenate(mats, axis=0)        # (3D, 2D)


def _pick_time_chunk(seq_len, max_chunk=16):
    tc = min(seq_len, max_chunk)
    while seq_len % tc:
        tc -= 1
    return tc


def _pick_lane_tile(width, img_w):
    """Tile must divide W, hold whole images, and stay lane-dense (mult of 128).
    Split into 2 tiles when possible so both v7x TensorCores get work."""
    unit = math.lcm(img_w, 128)
    if width % (2 * unit) == 0:
        return width // 2
    return width


def _cbr_rnn_fused(m_all, bias, x_seq, *, img_w, num_layer):
    """Run the whole CnnBasedRnn stack + max pooling over a sequence.

    x_seq: f32[L, D, W] with W = (#images)*D images folded along lanes;
    element [t, i, b*D + j] is image b's pixel (i, j) at timestep t.
    Returns the per-lane max over t of the last layer's h_t, shape (D, W).
    """
    L, D, W = x_seq.shape
    t_chunk = _pick_time_chunk(L)
    lane_tile = _pick_lane_tile(W, img_w)
    # Guard against silent seam corruption of the +/-1 width taps.
    assert W % lane_tile == 0, (W, lane_tile)
    assert lane_tile % img_w == 0, (lane_tile, img_w)
    assert lane_tile % 128 == 0 or lane_tile == W, (lane_tile, W)

    grid = (W // lane_tile, L // t_chunk)
    kernel = functools.partial(_cbr_rnn_fused_kernel, img_w=img_w,
                               num_layer=num_layer, t_chunk=t_chunk)

    return pl.pallas_call(
        kernel,
        out_shape=jax.ShapeDtypeStruct((D, W), jnp.float32),
        grid_spec=pltpu.PrefetchScalarGridSpec(
            num_scalar_prefetch=0,
            grid=grid,
            in_specs=[
                # Merged [Mx | Mh] per layer, resident for the whole grid.
                pl.BlockSpec((num_layer, 3 * D, 2 * D), lambda bt, tg: (0, 0, 0)),
                # Conv biases in SMEM (scalar reads).
                pl.BlockSpec(memory_space=pltpu.MemorySpace.SMEM),
                # One time-chunk of layer-0 inputs per grid step.
                pl.BlockSpec((t_chunk, D, lane_tile), lambda bt, tg: (tg, 0, bt)),
            ],
            # Pooled output: same block across the time axis -> VMEM resident.
            out_specs=pl.BlockSpec((D, lane_tile), lambda bt, tg: (0, bt)),
            # Per-layer [input ; h] state, persists across the whole sequence.
            scratch_shapes=[pltpu.VMEM((num_layer, 2 * D, lane_tile), jnp.float32)],
        ),
        compiler_params=pltpu.CompilerParams(
            dimension_semantics=("parallel", "arbitrary"),   # lanes/batch || time
            # Blocks here are tiny (<1 MiB total); 32 MiB is safe on every
            # generation (v7x scoped default).  Re-derive for large B*D / Tc.
            vmem_limit_bytes=32 * 1024 * 1024,
        ),
    )(m_all, bias, x_seq)


# ----------------------------------------------------------------------------
# Full NnqlmCnnBasedRNN forward (is_bi=False, mode='max', eval-mode dropout).
# ----------------------------------------------------------------------------
def nnqlm_forward(emb, conv_w, conv_b, lin_w, lin_b, q_tok, a_tok):
    B, L = q_tok.shape
    assert a_tok.shape == (B, L)   # the PyTorch module reuses q's seq-len for a
    D = emb.shape[1]
    num_layer = conv_w.shape[0]

    # Embedding lookup (plain gather, glue).
    q_e = emb[q_tok]                                   # (B, L, D)
    a_e = emb[a_tok]                                   # (B, L, D)

    # cbr_forward shares weights between q and a -> fold them into one
    # 2B "super batch" so a single kernel call covers both (more lanes, too).
    e = jnp.concatenate([q_e, a_e], axis=0)            # (2B, L, D)

    # DensityLayer, emitted directly in the lane-folded (L, D, 2B*D) layout.
    denom = jnp.sum(e * e, axis=-1) + 1e-4             # (2B, L)
    outer = jnp.einsum('bli,blj->libj', e, e,
                       precision=lax.Precision.HIGHEST)  # (L, D, 2B, D)
    x = outer / denom.T[:, None, :, None]
    x = x.reshape(L, D, 2 * B * D)

    # Pad the folded lane axis to a multiple of 128 with whole zero-images so
    # every store in the kernel is a full-width vst (padded lanes are dropped).
    W = 2 * B * D
    img_step = 128 // math.gcd(D, 128)
    n_img_pad = -(-(2 * B) // img_step) * img_step
    W_pad = n_img_pad * D
    if W_pad > W:
        x = jnp.pad(x, ((0, 0), (0, 0), (0, W_pad - W)))

    # One fused Pallas call for the whole CnnBasedRnn stack + max pooling.
    m_all = jnp.stack([_build_height_matrix(conv_w[l], D)
                       for l in range(num_layer)])      # (num_layer, 3D, 2D)
    pooled = _cbr_rnn_fused(m_all, conv_b, x, img_w=D, num_layer=num_layer)

    # Drop lane padding and unfold back to (2B, D*D).
    pooled = pooled[:, :W].reshape(D, 2 * B, D).transpose(1, 0, 2).reshape(2 * B, D * D)
    q_pool, a_pool = pooled[:B], pooled[B:]

    qa = jnp.concatenate([q_pool, a_pool], axis=1)     # (B, 2*D*D)
    score = qa @ lin_w.T + lin_b                       # nn.Linear(2*D*D, 2)
    # TODO(synk): Dropout(dropout_linear) omitted (eval mode).
    return jax.nn.log_softmax(score, axis=1)


# ----------------------------------------------------------------------------
# Pure-JAX reference mirroring the PyTorch forward exactly.
# ----------------------------------------------------------------------------
def _reference_forward(emb, conv_w, conv_b, lin_w, lin_b, q_tok, a_tok):
    B, L = q_tok.shape
    D = emb.shape[1]
    num_layer = conv_w.shape[0]

    def density(x):
        outer = jnp.einsum('bli,blj->blij', x, x,
                           precision=lax.Precision.HIGHEST)
        denom = jnp.sum(x * x, axis=-1)[..., None, None] + 1e-4
        return outer / denom

    def cell(w, b, x, h):                              # x, h: (B, 1, D, D)
        inp = jnp.concatenate([x, h], axis=2)          # (B, 1, 2D, D)
        y = lax.conv_general_dilated(
            inp, w.reshape(1, 1, KH, KW), window_strides=(2, 1),
            padding=((PAD_H, PAD_H), (PAD_W, PAD_W)),
            dimension_numbers=('NCHW', 'OIHW', 'NCHW'),
            precision=lax.Precision.HIGHEST)
        return jnp.tanh(y + b)

    def cbr_rnn(x):                                    # (B, L, D, D)
        pre = x
        for layer in range(num_layer):
            h = jnp.zeros((B, 1, D, D), jnp.float32)
            hs = []
            for t in range(L):
                h = cell(conv_w[layer], conv_b[layer], pre[:, t][:, None], h)
                hs.append(h[:, 0])
            pre = jnp.stack(hs, axis=1)
        return pre

    q_o = cbr_rnn(density(emb[q_tok]))
    a_o = cbr_rnn(density(emb[a_tok]))
    q_p = jnp.max(q_o.reshape(B, L, -1), axis=1)
    a_p = jnp.max(a_o.reshape(B, L, -1), axis=1)
    qa = jnp.concatenate([q_p, a_p], axis=1)
    score = qa @ lin_w.T + lin_b
    return jax.nn.log_softmax(score, axis=1)


if __name__ == "__main__":
    B, L, D = 2, 8, 16          # batch, q_len == a_len, embedding_dim (word_dim)
    V = 40                      # vocab size
    NUM_LAYER = 2

    key = jax.random.PRNGKey(0)
    k_emb, k_q, k_a, k_w, k_b, k_lw, k_lb = jax.random.split(key, 7)

    emb = jax.random.normal(k_emb, (V, D), jnp.float32)
    q_tok = jax.random.randint(k_q, (B, L), 0, V)
    a_tok = jax.random.randint(k_a, (B, L), 0, V)

    bound = 1.0 / 3.0           # PyTorch Conv2d init bound for fan_in = 9
    conv_w = jax.random.uniform(k_w, (NUM_LAYER, KH, KW), jnp.float32, -bound, bound)
    conv_b = jax.random.uniform(k_b, (NUM_LAYER,), jnp.float32, -bound, bound)
    lin_w = jax.random.uniform(k_lw, (2, 2 * D * D), jnp.float32, -0.04, 0.04)
    lin_b = jax.random.uniform(k_lb, (2,), jnp.float32, -0.04, 0.04)

    fwd = jax.jit(nnqlm_forward)
    score = fwd(emb, conv_w, conv_b, lin_w, lin_b, q_tok, a_tok)
    score = jax.block_until_ready(score)

    ref = jax.jit(_reference_forward)(emb, conv_w, conv_b, lin_w, lin_b, q_tok, a_tok)
    ref = jax.block_until_ready(ref)

    assert score.shape == (B, 2)
    assert jnp.allclose(score, ref, atol=2e-4, rtol=2e-4), (score, ref)
    print("KERNEL_OK")
</pallas_src>

<mosaic_0001>
module attributes {stable_mosaic.version = 11 : i64} {
  func.func @_cbr_rnn_fused_kernel(%arg0: i32, %arg1: i32, %arg2: memref<2x48x32xf32, #tpu.memory_space<vmem>>, %arg3: memref<2xf32, #tpu.memory_space<smem>>, %arg4: memref<8x16x128xf32, #tpu.memory_space<vmem>>, %arg5: memref<16x128xf32, #tpu.memory_space<vmem>>, %arg6: memref<2x32x128xf32, #tpu.memory_space<vmem>>) attributes {dimension_semantics = [#tpu.dimension_semantics<parallel>, #tpu.dimension_semantics<arbitrary>], iteration_bounds = array<i64: 1, 1>, scalar_prefetch = 0 : i64, scratch_operands = 1 : i64, tpu.core_type = #tpu.core_type<tc>, window_params = [{pipeline_mode = #tpu.pipeline_mode<synchronous>, transform_indices = @transform_0, window_bounds = array<i64: 2, 48, 32>}, {transform_indices = @transform_1, window_bounds = array<i64: 2>}, {transform_indices = @transform_2, window_bounds = array<i64: 8, 16, 128>}, {transform_indices = @transform_3, window_bounds = array<i64: 16, 128>}]} {
    %c0_i32 = arith.constant 0 : i32
    %0 = arith.cmpi eq, %arg1, %c0_i32 : i32
    %1 = arith.extui %0 : i1 to i32
    %c0_i32_0 = arith.constant 0 : i32
    %2 = arith.cmpi ne, %1, %c0_i32_0 : i32
    scf.if %2 {
      %cst_283 = arith.constant 0.000000e+00 : f32
      %446 = vector.broadcast %cst_283 : f32 to vector<2x32x128xf32>
      %c0_284 = arith.constant 0 : index
      %c0_285 = arith.constant 0 : index
      %c0_286 = arith.constant 0 : index
      %447 = vector.load %arg6[%c0_284, %c0_285, %c0_286] : memref<2x32x128xf32, #tpu.memory_space<vmem>>, vector<2x32x128xf32>
      tpu.vector_store %arg6[%c0_284, %c0_285, %c0_286], %446 {strides = array<i32>} : memref<2x32x128xf32, #tpu.memory_space<vmem>>, vector<2x32x128xf32>,
      %cst_287 = arith.constant 0xFF800000 : f32
      %448 = vector.broadcast %cst_287 : f32 to vector<16x128xf32>
      %c0_288 = arith.constant 0 : index
      %c0_289 = arith.constant 0 : index
      %449 = vector.load %arg5[%c0_288, %c0_289] : memref<16x128xf32, #tpu.memory_space<vmem>>, vector<16x128xf32>
      tpu.vector_store %arg5[%c0_288, %c0_289], %448 {strides = array<i32>} : memref<16x128xf32, #tpu.memory_space<vmem>>, vector<16x128xf32>,
    } else {
    }
    %c0 = arith.constant 0 : index
    %c0_1 = arith.constant 0 : index
    %c0_2 = arith.constant 0 : index
    %3 = vector.load %arg2[%c0, %c0_1, %c0_2] : memref<2x48x32xf32, #tpu.memory_space<vmem>>, vector<1x48x32xf32>
    %4 = vector.shape_cast %3 : vector<1x48x32xf32> to vector<48x32xf32>
    %c1 = arith.constant 1 : index
    %c0_3 = arith.constant 0 : index
    %c0_4 = arith.constant 0 : index
    %5 = vector.load %arg2[%c1, %c0_3, %c0_4] : memref<2x48x32xf32, #tpu.memory_space<vmem>>, vector<1x48x32xf32>
    %6 = vector.shape_cast %5 : vector<1x48x32xf32> to vector<48x32xf32>
    %c0_5 = arith.constant 0 : index
    %7 = memref.load %arg3[%c0_5] : memref<2xf32, #tpu.memory_space<smem>>
    %c1_6 = arith.constant 1 : index
    %8 = memref.load %arg3[%c1_6] : memref<2xf32, #tpu.memory_space<smem>>
    %9 = tpu.iota {dimensions = array<i32: 1>} : vector<16x128xi32>
    %c16_i32 = arith.constant 16 : i32
    %c0_i32_7 = arith.constant 0 : i32
    %10 = arith.cmpi eq, %c16_i32, %c0_i32_7 : i32
    %c1_i32 = arith.constant 1 : i32
    %11 = arith.select %10, %c1_i32, %c16_i32 : i32
    %12 = vector.broadcast %11 : i32 to vector<16x128xi32>
    %13 = arith.remsi %9, %12 : vector<16x128xi32>
    %c0_i32_8 = arith.constant 0 : i32
    %14 = vector.broadcast %c0_i32_8 : i32 to vector<16x128xi32>
    %15 = arith.cmpi ne, %13, %14 : vector<16x128xi32>
    %c0_i32_9 = arith.constant 0 : i32
    %16 = vector.broadcast %c0_i32_9 : i32 to vector<16x128xi32>
    %17 = arith.cmpi slt, %13, %16 : vector<16x128xi32>
    %c0_i32_10 = arith.constant 0 : i32
    %18 = arith.cmpi slt, %11, %c0_i32_10 : i32
    %19 = vector.broadcast %18 : i1 to vector<16x128xi1>
    %20 = vector.broadcast %19 : vector<16x128xi1> to vector<16x128xi1>
    %21 = arith.xori %17, %20 : vector<16x128xi1>
    %22 = arith.andi %21, %15 : vector<16x128xi1>
    %23 = vector.broadcast %11 : i32 to vector<16x128xi32>
    %24 = arith.addi %13, %23 : vector<16x128xi32>
    %25 = arith.select %22, %24, %13 : vector<16x128xi1>, vector<16x128xi32>
    %c0_i32_11 = arith.constant 0 : i32
    %26 = vector.broadcast %c0_i32_11 : i32 to vector<16x128xi32>
    %27 = arith.cmpi eq, %25, %26 : vector<16x128xi32>
    %c15_i32 = arith.constant 15 : i32
    %28 = vector.broadcast %c15_i32 : i32 to vector<16x128xi32>
    %29 = arith.cmpi eq, %25, %28 : vector<16x128xi32>
    %c0_i32_12 = arith.constant 0 : i32
    %30 = arith.index_cast %c0_i32_12 : i32 to index
    %c0_13 = arith.constant 0 : index
    %c0_14 = arith.constant 0 : index
    %31 = vector.load %arg4[%30, %c0_13, %c0_14] : memref<8x16x128xf32, #tpu.memory_space<vmem>>, vector<1x16x128xf32>
    %32 = vector.shape_cast %31 : vector<1x16x128xf32> to vector<16x128xf32>
    %c0_15 = arith.constant 0 : index
    %c0_16 = arith.constant 0 : index
    %c0_17 = arith.constant 0 : index
    %33 = vector.load %arg6[%c0_15, %c0_16, %c0_17] : memref<2x32x128xf32, #tpu.memory_space<vmem>>, vector<1x16x128xf32>
    %34 = vector.shape_cast %33 : vector<1x16x128xf32> to vector<16x128xf32>
    %35 = vector.shape_cast %32 : vector<16x128xf32> to vector<1x16x128xf32>
    tpu.vector_store %arg6[%c0_15, %c0_16, %c0_17], %35 {strides = array<i32>} : memref<2x32x128xf32, #tpu.memory_space<vmem>>, vector<1x16x128xf32>,
    %c0_18 = arith.constant 0 : index
    %c0_19 = arith.constant 0 : index
    %c0_20 = arith.constant 0 : index
    %36 = vector.load %arg6[%c0_18, %c0_19, %c0_20] : memref<2x32x128xf32, #tpu.memory_space<vmem>>, vector<1x32x128xf32>
    %37 = vector.shape_cast %36 : vector<1x32x128xf32> to vector<32x128xf32>
    %cst = arith.constant dense<0.000000e+00> : vector<48x128xf32>
    %38 = tpu.matmul %4, %37, %cst {dimension_numbers = #tpu.dot_dimension_numbers<[1], [0], [0], [1], [0, 0, 1, 1], [], []>, precision = #tpu.contract_precision<fp32>} : vector<48x32xf32>, vector<32x128xf32>, vector<48x128xf32> -> vector<48x128xf32>
    %39 = vector.extract_strided_slice %38 {offsets = [0, 0], sizes = [16, 128], strides = [1, 1]} : vector<48x128xf32> to vector<16x128xf32>
    %40 = vector.extract_strided_slice %38 {offsets = [16, 0], sizes = [16, 128], strides = [1, 1]} : vector<48x128xf32> to vector<16x128xf32>
    %41 = vector.extract_strided_slice %38 {offsets = [32, 0], sizes = [16, 128], strides = [1, 1]} : vector<48x128xf32> to vector<16x128xf32>
    %c1_i32_21 = arith.constant 1 : i32
    %42 = tpu.dynamic_rotate %39 by %c1_i32_21 dim 1 : vector<16x128xf32>, i32 -> vector<16x128xf32>
    %cst_22 = arith.constant 0.000000e+00 : f32
    %43 = vector.broadcast %cst_22 : f32 to vector<16x128xf32>
    %44 = arith.select %27, %43, %42 : vector<16x128xi1>, vector<16x128xf32>
    %c127_i32 = arith.constant 127 : i32
    %45 = tpu.dynamic_rotate %41 by %c127_i32 dim 1 : vector<16x128xf32>, i32 -> vector<16x128xf32>
    %cst_23 = arith.constant 0.000000e+00 : f32
    %46 = vector.broadcast %cst_23 : f32 to vector<16x128xf32>
    %47 = arith.select %29, %46, %45 : vector<16x128xi1>, vector<16x128xf32>
    %48 = arith.addf %44, %40 : vector<16x128xf32>
    %49 = arith.addf %48, %47 : vector<16x128xf32>
    %50 = vector.broadcast %7 : f32 to vector<16x128xf32>
    %51 = arith.addf %49, %50 : vector<16x128xf32>
    %52 = math.tanh %51 : vector<16x128xf32>
    %c0_24 = arith.constant 0 : index
    %c16 = arith.constant 16 : index
    %c0_25 = arith.constant 0 : index
    %53 = vector.load %arg6[%c0_24, %c16, %c0_25] : memref<2x32x128xf32, #tpu.memory_space<vmem>>, vector<1x16x128xf32>
    %54 = vector.shape_cast %53 : vector<1x16x128xf32> to vector<16x128xf32>
    %55 = vector.shape_cast %52 : vector<16x128xf32> to vector<1x16x128xf32>
    tpu.vector_store %arg6[%c0_24, %c16, %c0_25], %55 {strides = array<i32>} : memref<2x32x128xf32, #tpu.memory_space<vmem>>, vector<1x16x128xf32>,
    %c1_26 = arith.constant 1 : index
    %c0_27 = arith.constant 0 : index
    %c0_28 = arith.constant 0 : index
    %56 = vector.load %arg6[%c1_26, %c0_27, %c0_28] : memref<2x32x128xf32, #tpu.memory_space<vmem>>, vector<1x16x128xf32>
    %57 = vector.shape_cast %56 : vector<1x16x128xf32> to vector<16x128xf32>
    %58 = vector.shape_cast %52 : vector<16x128xf32> to vector<1x16x128xf32>
    tpu.vector_store %arg6[%c1_26, %c0_27, %c0_28], %58 {strides = array<i32>} : memref<2x32x128xf32, #tpu.memory_space<vmem>>, vector<1x16x128xf32>,
    %c1_29 = arith.constant 1 : index
    %c0_30 = arith.constant 0 : index
    %c0_31 = arith.constant 0 : index
    %59 = vector.load %arg6[%c1_29, %c0_30, %c0_31] : memref<2x32x128xf32, #tpu.memory_space<vmem>>, vector<1x32x128xf32>
    %60 = vector.shape_cast %59 : vector<1x32x128xf32> to vector<32x128xf32>
    %cst_32 = arith.constant dense<0.000000e+00> : vector<48x128xf32>
    %61 = tpu.matmul %6, %60, %cst_32 {dimension_numbers = #tpu.dot_dimension_numbers<[1], [0], [0], [1], [0, 0, 1, 1], [], []>, precision = #tpu.contract_precision<fp32>} : vector<48x32xf32>, vector<32x128xf32>, vector<48x128xf32> -> vector<48x128xf32>
    %62 = vector.extract_strided_slice %61 {offsets = [0, 0], sizes = [16, 128], strides = [1, 1]} : vector<48x128xf32> to vector<16x128xf32>
    %63 = vector.extract_strided_slice %61 {offsets = [16, 0], sizes = [16, 128], strides = [1, 1]} : vector<48x128xf32> to vector<16x128xf32>
    %64 = vector.extract_strided_slice %61 {offsets = [32, 0], sizes = [16, 128], strides = [1, 1]} : vector<48x128xf32> to vector<16x128xf32>
    %c1_i32_33 = arith.constant 1 : i32
    %65 = tpu.dynamic_rotate %62 by %c1_i32_33 dim 1 : vector<16x128xf32>, i32 -> vector<16x128xf32>
    %cst_34 = arith.constant 0.000000e+00 : f32
    %66 = vector.broadcast %cst_34 : f32 to vector<16x128xf32>
    %67 = arith.select %27, %66, %65 : vector<16x128xi1>, vector<16x128xf32>
    %c127_i32_35 = arith.constant 127 : i32
    %68 = tpu.dynamic_rotate %64 by %c127_i32_35 dim 1 : vector<16x128xf32>, i32 -> vector<16x128xf32>
    %cst_36 = arith.constant 0.000000e+00 : f32
    %69 = vector.broadcast %cst_36 : f32 to vector<16x128xf32>
    %70 = arith.select %29, %69, %68 : vector<16x128xi1>, vector<16x128xf32>
    %71 = arith.addf %67, %63 : vector<16x128xf32>
    %72 = arith.addf %71, %70 : vector<16x128xf32>
    %73 = vector.broadcast %8 : f32 to vector<16x128xf32>
    %74 = arith.addf %72, %73 : vector<16x128xf32>
    %75 = math.tanh %74 : vector<16x128xf32>
    %c1_37 = arith.constant 1 : index
    %c16_38 = arith.constant 16 : index
    %c0_39 = arith.constant 0 : index
    %76 = vector.load %arg6[%c1_37, %c16_38, %c0_39] : memref<2x32x128xf32, #tpu.memory_space<vmem>>, vector<1x16x128xf32>
    %77 = vector.shape_cast %76 : vector<1x16x128xf32> to vector<16x128xf32>
    %78 = vector.shape_cast %75 : vector<16x128xf32> to vector<1x16x128xf32>
    tpu.vector_store %arg6[%c1_37, %c16_38, %c0_39], %78 {strides = array<i32>} : memref<2x32x128xf32, #tpu.memory_space<vmem>>, vector<1x16x128xf32>,
    %c0_40 = arith.constant 0 : index
    %c0_41 = arith.constant 0 : index
    %79 = vector.load %arg5[%c0_40, %c0_41] : memref<16x128xf32, #tpu.memory_space<vmem>>, vector<16x128xf32>
    %80 = arith.maximumf %79, %75 : vector<16x128xf32>
    %c0_42 = arith.constant 0 : index
    %c0_43 = arith.constant 0 : index
    %81 = vector.load %arg5[%c0_42, %c0_43] : memref<16x128xf32, #tpu.memory_space<vmem>>, vector<16x128xf32>
    tpu.vector_store %arg5[%c0_42, %c0_43], %80 {strides = array<i32>} : memref<16x128xf32, #tpu.memory_space<vmem>>, vector<16x128xf32>,
    %c1_i32_44 = arith.constant 1 : i32
    %82 = arith.index_cast %c1_i32_44 : i32 to index
    %c0_45 = arith.constant 0 : index
    %c0_46 = arith.constant 0 : index
    %83 = vector.load %arg4[%82, %c0_45, %c0_46] : memref<8x16x128xf32, #tpu.memory_space<vmem>>, vector<1x16x128xf32>
    %84 = vector.shape_cast %83 : vector<1x16x128xf32> to vector<16x128xf32>
    %c0_47 = arith.constant 0 : index
    %c0_48 = arith.constant 0 : index
    %c0_49 = arith.constant 0 : index
    %85 = vector.load %arg6[%c0_47, %c0_48, %c0_49] : memref<2x32x128xf32, #tpu.memory_space<vmem>>, vector<1x16x128xf32>
    %86 = vector.shape_cast %85 : vector<1x16x128xf32> to vector<16x128xf32>
    %87 = vector.shape_cast %84 : vector<16x128xf32> to vector<1x16x128xf32>
    tpu.vector_store %arg6[%c0_47, %c0_48, %c0_49], %87 {strides = array<i32>} : memref<2x32x128xf32, #tpu.memory_space<vmem>>, vector<1x16x128xf32>,
    %c0_50 = arith.constant 0 : index
    %c0_51 = arith.constant 0 : index
    %c0_52 = arith.constant 0 : index
    %88 = vector.load %arg6[%c0_50, %c0_51, %c0_52] : memref<2x32x128xf32, #tpu.memory_space<vmem>>, vector<1x32x128xf32>
    %89 = vector.shape_cast %88 : vector<1x32x128xf32> to vector<32x128xf32>
    %cst_53 = arith.constant dense<0.000000e+00> : vector<48x128xf32>
    %90 = tpu.matmul %4, %89, %cst_53 {dimension_numbers = #tpu.dot_dimension_numbers<[1], [0], [0], [1], [0, 0, 1, 1], [], []>, precision = #tpu.contract_precision<fp32>} : vector<48x32xf32>, vector<32x128xf32>, vector<48x128xf32> -> vector<48x128xf32>
    %91 = vector.extract_strided_slice %90 {offsets = [0, 0], sizes = [16, 128], strides = [1, 1]} : vector<48x128xf32> to vector<16x128xf32>
    %92 = vector.extract_strided_slice %90 {offsets = [16, 0], sizes = [16, 128], strides = [1, 1]} : vector<48x128xf32> to vector<16x128xf32>
    %93 = vector.extract_strided_slice %90 {offsets = [32, 0], sizes = [16, 128], strides = [1, 1]} : vector<48x128xf32> to vector<16x128xf32>
    %c1_i32_54 = arith.constant 1 : i32
    %94 = tpu.dynamic_rotate %91 by %c1_i32_54 dim 1 : vector<16x128xf32>, i32 -> vector<16x128xf32>
    %cst_55 = arith.constant 0.000000e+00 : f32
    %95 = vector.broadcast %cst_55 : f32 to vector<16x128xf32>
    %96 = arith.select %27, %95, %94 : vector<16x128xi1>, vector<16x128xf32>
    %c127_i32_56 = arith.constant 127 : i32
    %97 = tpu.dynamic_rotate %93 by %c127_i32_56 dim 1 : vector<16x128xf32>, i32 -> vector<16x128xf32>
    %cst_57 = arith.constant 0.000000e+00 : f32
    %98 = vector.broadcast %cst_57 : f32 to vector<16x128xf32>
    %99 = arith.select %29, %98, %97 : vector<16x128xi1>, vector<16x128xf32>
    %100 = arith.addf %96, %92 : vector<16x128xf32>
    %101 = arith.addf %100, %99 : vector<16x128xf32>
    %102 = vector.broadcast %7 : f32 to vector<16x128xf32>
    %103 = arith.addf %101, %102 : vector<16x128xf32>
    %104 = math.tanh %103 : vector<16x128xf32>
    %c0_58 = arith.constant 0 : index
    %c16_59 = arith.constant 16 : index
    %c0_60 = arith.constant 0 : index
    %105 = vector.load %arg6[%c0_58, %c16_59, %c0_60] : memref<2x32x128xf32, #tpu.memory_space<vmem>>, vector<1x16x128xf32>
    %106 = vector.shape_cast %105 : vector<1x16x128xf32> to vector<16x128xf32>
    %107 = vector.shape_cast %104 : vector<16x128xf32> to vector<1x16x128xf32>
    tpu.vector_store %arg6[%c0_58, %c16_59, %c0_60], %107 {strides = array<i32>} : memref<2x32x128xf32, #tpu.memory_space<vmem>>, vector<1x16x128xf32>,
    %c1_61 = arith.constant 1 : index
    %c0_62 = arith.constant 0 : index
    %c0_63 = arith.constant 0 : index
    %108 = vector.load %arg6[%c1_61, %c0_62, %c0_63] : memref<2x32x128xf32, #tpu.memory_space<vmem>>, vector<1x16x128xf32>
    %109 = vector.shape_cast %108 : vector<1x16x128xf32> to vector<16x128xf32>
    %110 = vector.shape_cast %104 : vector<16x128xf32> to vector<1x16x128xf32>
    tpu.vector_store %arg6[%c1_61, %c0_62, %c0_63], %110 {strides = array<i32>} : memref<2x32x128xf32, #tpu.memory_space<vmem>>, vector<1x16x128xf32>,
    %c1_64 = arith.constant 1 : index
    %c0_65 = arith.constant 0 : index
    %c0_66 = arith.constant 0 : index
    %111 = vector.load %arg6[%c1_64, %c0_65, %c0_66] : memref<2x32x128xf32, #tpu.memory_space<vmem>>, vector<1x32x128xf32>
    %112 = vector.shape_cast %111 : vector<1x32x128xf32> to vector<32x128xf32>
    %cst_67 = arith.constant dense<0.000000e+00> : vector<48x128xf32>
    %113 = tpu.matmul %6, %112, %cst_67 {dimension_numbers = #tpu.dot_dimension_numbers<[1], [0], [0], [1], [0, 0, 1, 1], [], []>, precision = #tpu.contract_precision<fp32>} : vector<48x32xf32>, vector<32x128xf32>, vector<48x128xf32> -> vector<48x128xf32>
    %114 = vector.extract_strided_slice %113 {offsets = [0, 0], sizes = [16, 128], strides = [1, 1]} : vector<48x128xf32> to vector<16x128xf32>
    %115 = vector.extract_strided_slice %113 {offsets = [16, 0], sizes = [16, 128], strides = [1, 1]} : vector<48x128xf32> to vector<16x128xf32>
    %116 = vector.extract_strided_slice %113 {offsets = [32, 0], sizes = [16, 128], strides = [1, 1]} : vector<48x128xf32> to vector<16x128xf32>
    %c1_i32_68 = arith.constant 1 : i32
    %117 = tpu.dynamic_rotate %114 by %c1_i32_68 dim 1 : vector<16x128xf32>, i32 -> vector<16x128xf32>
    %cst_69 = arith.constant 0.000000e+00 : f32
    %118 = vector.broadcast %cst_69 : f32 to vector<16x128xf32>
    %119 = arith.select %27, %118, %117 : vector<16x128xi1>, vector<16x128xf32>
    %c127_i32_70 = arith.constant 127 : i32
    %120 = tpu.dynamic_rotate %116 by %c127_i32_70 dim 1 : vector<16x128xf32>, i32 -> vector<16x128xf32>
    %cst_71 = arith.constant 0.000000e+00 : f32
    %121 = vector.broadcast %cst_71 : f32 to vector<16x128xf32>
    %122 = arith.select %29, %121, %120 : vector<16x128xi1>, vector<16x128xf32>
    %123 = arith.addf %119, %115 : vector<16x128xf32>
    %124 = arith.addf %123, %122 : vector<16x128xf32>
    %125 = vector.broadcast %8 : f32 to vector<16x128xf32>
    %126 = arith.addf %124, %125 : vector<16x128xf32>
    %127 = math.tanh %126 : vector<16x128xf32>
    %c1_72 = arith.constant 1 : index
    %c16_73 = arith.constant 16 : index
    %c0_74 = arith.constant 0 : index
    %128 = vector.load %arg6[%c1_72, %c16_73, %c0_74] : memref<2x32x128xf32, #tpu.memory_space<vmem>>, vector<1x16x128xf32>
    %129 = vector.shape_cast %128 : vector<1x16x128xf32> to vector<16x128xf32>
    %130 = vector.shape_cast %127 : vector<16x128xf32> to vector<1x16x128xf32>
    tpu.vector_store %arg6[%c1_72, %c16_73, %c0_74], %130 {strides = array<i32>} : memref<2x32x128xf32, #tpu.memory_space<vmem>>, vector<1x16x128xf32>,
    %c0_75 = arith.constant 0 : index
    %c0_76 = arith.constant 0 : index
    %131 = vector.load %arg5[%c0_75, %c0_76] : memref<16x128xf32, #tpu.memory_space<vmem>>, vector<16x128xf32>
    %132 = arith.maximumf %131, %127 : vector<16x128xf32>
    %c0_77 = arith.constant 0 : index
    %c0_78 = arith.constant 0 : index
    %133 = vector.load %arg5[%c0_77, %c0_78] : memref<16x128xf32, #tpu.memory_space<vmem>>, vector<16x128xf32>
    tpu.vector_store %arg5[%c0_77, %c0_78], %132 {strides = array<i32>} : memref<16x128xf32, #tpu.memory_space<vmem>>, vector<16x128xf32>,
    %c2_i32 = arith.constant 2 : i32
    %134 = arith.index_cast %c2_i32 : i32 to index
    %c0_79 = arith.constant 0 : index
    %c0_80 = arith.constant 0 : index
    %135 = vector.load %arg4[%134, %c0_79, %c0_80] : memref<8x16x128xf32, #tpu.memory_space<vmem>>, vector<1x16x128xf32>
    %136 = vector.shape_cast %135 : vector<1x16x128xf32> to vector<16x128xf32>
    %c0_81 = arith.constant 0 : index
    %c0_82 = arith.constant 0 : index
    %c0_83 = arith.constant 0 : index
    %137 = vector.load %arg6[%c0_81, %c0_82, %c0_83] : memref<2x32x128xf32, #tpu.memory_space<vmem>>, vector<1x16x128xf32>
    %138 = vector.shape_cast %137 : vector<1x16x128xf32> to vector<16x128xf32>
    %139 = vector.shape_cast %136 : vector<16x128xf32> to vector<1x16x128xf32>
    tpu.vector_store %arg6[%c0_81, %c0_82, %c0_83], %139 {strides = array<i32>} : memref<2x32x128xf32, #tpu.memory_space<vmem>>, vector<1x16x128xf32>,
    %c0_84 = arith.constant 0 : index
    %c0_85 = arith.constant 0 : index
    %c0_86 = arith.constant 0 : index
    %140 = vector.load %arg6[%c0_84, %c0_85, %c0_86] : memref<2x32x128xf32, #tpu.memory_space<vmem>>, vector<1x32x128xf32>
    %141 = vector.shape_cast %140 : vector<1x32x128xf32> to vector<32x128xf32>
    %cst_87 = arith.constant dense<0.000000e+00> : vector<48x128xf32>
    %142 = tpu.matmul %4, %141, %cst_87 {dimension_numbers = #tpu.dot_dimension_numbers<[1], [0], [0], [1], [0, 0, 1, 1], [], []>, precision = #tpu.contract_precision<fp32>} : vector<48x32xf32>, vector<32x128xf32>, vector<48x128xf32> -> vector<48x128xf32>
    %143 = vector.extract_strided_slice %142 {offsets = [0, 0], sizes = [16, 128], strides = [1, 1]} : vector<48x128xf32> to vector<16x128xf32>
    %144 = vector.extract_strided_slice %142 {offsets = [16, 0], sizes = [16, 128], strides = [1, 1]} : vector<48x128xf32> to vector<16x128xf32>
    %145 = vector.extract_strided_slice %142 {offsets = [32, 0], sizes = [16, 128], strides = [1, 1]} : vector<48x128xf32> to vector<16x128xf32>
    %c1_i32_88 = arith.constant 1 : i32
    %146 = tpu.dynamic_rotate %143 by %c1_i32_88 dim 1 : vector<16x128xf32>, i32 -> vector<16x128xf32>
    %cst_89 = arith.constant 0.000000e+00 : f32
    %147 = vector.broadcast %cst_89 : f32 to vector<16x128xf32>
    %148 = arith.select %27, %147, %146 : vector<16x128xi1>, vector<16x128xf32>
    %c127_i32_90 = arith.constant 127 : i32
    %149 = tpu.dynamic_rotate %145 by %c127_i32_90 dim 1 : vector<16x128xf32>, i32 -> vector<16x128xf32>
    %cst_91 = arith.constant 0.000000e+00 : f32
    %150 = vector.broadcast %cst_91 : f32 to vector<16x128xf32>
    %151 = arith.select %29, %150, %149 : vector<16x128xi1>, vector<16x128xf32>
    %152 = arith.addf %148, %144 : vector<16x128xf32>
    %153 = arith.addf %152, %151 : vector<16x128xf32>
    %154 = vector.broadcast %7 : f32 to vector<16x128xf32>
    %155 = arith.addf %153, %154 : vector<16x128xf32>
    %156 = math.tanh %155 : vector<16x128xf32>
    %c0_92 = arith.constant 0 : index
    %c16_93 = arith.constant 16 : index
    %c0_94 = arith.constant 0 : index
    %157 = vector.load %arg6[%c0_92, %c16_93, %c0_94] : memref<2x32x128xf32, #tpu.memory_space<vmem>>, vector<1x16x128xf32>
    %158 = vector.shape_cast %157 : vector<1x16x128xf32> to vector<16x128xf32>
    %159 = vector.shape_cast %156 : vector<16x128xf32> to vector<1x16x128xf32>
    tpu.vector_store %arg6[%c0_92, %c16_93, %c0_94], %159 {strides = array<i32>} : memref<2x32x128xf32, #tpu.memory_space<vmem>>, vector<1x16x128xf32>,
    %c1_95 = arith.constant 1 : index
    %c0_96 = arith.constant 0 : index
    %c0_97 = arith.constant 0 : index
    %160 = vector.load %arg6[%c1_95, %c0_96, %c0_97] : memref<2x32x128xf32, #tpu.memory_space<vmem>>, vector<1x16x128xf32>
    %161 = vector.shape_cast %160 : vector<1x16x128xf32> to vector<16x128xf32>
    %162 = vector.shape_cast %156 : vector<16x128xf32> to vector<1x16x128xf32>
    tpu.vector_store %arg6[%c1_95, %c0_96, %c0_97], %162 {strides = array<i32>} : memref<2x32x128xf32, #tpu.memory_space<vmem>>, vector<1x16x128xf32>,
    %c1_98 = arith.constant 1 : index
    %c0_99 = arith.constant 0 : index
    %c0_100 = arith.constant 0 : index
    %163 = vector.load %arg6[%c1_98, %c0_99, %c0_100] : memref<2x32x128xf32, #tpu.memory_space<vmem>>, vector<1x32x128xf32>
    %164 = vector.shape_cast %163 : vector<1x32x128xf32> to vector<32x128xf32>
    %cst_101 = arith.constant dense<0.000000e+00> : vector<48x128xf32>
    %165 = tpu.matmul %6, %164, %cst_101 {dimension_numbers = #tpu.dot_dimension_numbers<[1], [0], [0], [1], [0, 0, 1, 1], [], []>, precision = #tpu.contract_precision<fp32>} : vector<48x32xf32>, vector<32x128xf32>, vector<48x128xf32> -> vector<48x128xf32>
    %166 = vector.extract_strided_slice %165 {offsets = [0, 0], sizes = [16, 128], strides = [1, 1]} : vector<48x128xf32> to vector<16x128xf32>
    %167 = vector.extract_strided_slice %165 {offsets = [16, 0], sizes = [16, 128], strides = [1, 1]} : vector<48x128xf32> to vector<16x128xf32>
    %168 = vector.extract_strided_slice %165 {offsets = [32, 0], sizes = [16, 128], strides = [1, 1]} : vector<48x128xf32> to vector<16x128xf32>
    %c1_i32_102 = arith.constant 1 : i32
    %169 = tpu.dynamic_rotate %166 by %c1_i32_102 dim 1 : vector<16x128xf32>, i32 -> vector<16x128xf32>
    %cst_103 = arith.constant 0.000000e+00 : f32
    %170 = vector.broadcast %cst_103 : f32 to vector<16x128xf32>
    %171 = arith.select %27, %170, %169 : vector<16x128xi1>, vector<16x128xf32>
    %c127_i32_104 = arith.constant 127 : i32
    %172 = tpu.dynamic_rotate %168 by %c127_i32_104 dim 1 : vector<16x128xf32>, i32 -> vector<16x128xf32>
    %cst_105 = arith.constant 0.000000e+00 : f32
    %173 = vector.broadcast %cst_105 : f32 to vector<16x128xf32>
    %174 = arith.select %29, %173, %172 : vector<16x128xi1>, vector<16x128xf32>
    %175 = arith.addf %171, %167 : vector<16x128xf32>
    %176 = arith.addf %175, %174 : vector<16x128xf32>
    %177 = vector.broadcast %8 : f32 to vector<16x128xf32>
    %178 = arith.addf %176, %177 : vector<16x128xf32>
    %179 = math.tanh %178 : vector<16x128xf32>
    %c1_106 = arith.constant 1 : index
    %c16_107 = arith.constant 16 : index
    %c0_108 = arith.constant 0 : index
    %180 = vector.load %arg6[%c1_106, %c16_107, %c0_108] : memref<2x32x128xf32, #tpu.memory_space<vmem>>, vector<1x16x128xf32>
    %181 = vector.shape_cast %180 : vector<1x16x128xf32> to vector<16x128xf32>
    %182 = vector.shape_cast %179 : vector<16x128xf32> to vector<1x16x128xf32>
    tpu.vector_store %arg6[%c1_106, %c16_107, %c0_108], %182 {strides = array<i32>} : memref<2x32x128xf32, #tpu.memory_space<vmem>>, vector<1x16x128xf32>,
    %c0_109 = arith.constant 0 : index
    %c0_110 = arith.constant 0 : index
    %183 = vector.load %arg5[%c0_109, %c0_110] : memref<16x128xf32, #tpu.memory_space<vmem>>, vector<16x128xf32>
    %184 = arith.maximumf %183, %179 : vector<16x128xf32>
    %c0_111 = arith.constant 0 : index
    %c0_112 = arith.constant 0 : index
    %185 = vector.load %arg5[%c0_111, %c0_112] : memref<16x128xf32, #tpu.memory_space<vmem>>, vector<16x128xf32>
    tpu.vector_store %arg5[%c0_111, %c0_112], %184 {strides = array<i32>} : memref<16x128xf32, #tpu.memory_space<vmem>>, vector<16x128xf32>,
    %c3_i32 = arith.constant 3 : i32
    %186 = arith.index_cast %c3_i32 : i32 to index
    %c0_113 = arith.constant 0 : index
    %c0_114 = arith.constant 0 : index
    %187 = vector.load %arg4[%186, %c0_113, %c0_114] : memref<8x16x128xf32, #tpu.memory_space<vmem>>, vector<1x16x128xf32>
    %188 = vector.shape_cast %187 : vector<1x16x128xf32> to vector<16x128xf32>
    %c0_115 = arith.constant 0 : index
    %c0_116 = arith.constant 0 : index
    %c0_117 = arith.constant 0 : index
    %189 = vector.load %arg6[%c0_115, %c0_116, %c0_117] : memref<2x32x128xf32, #tpu.memory_space<vmem>>, vector<1x16x128xf32>
    %190 = vector.shape_cast %189 : vector<1x16x128xf32> to vector<16x128xf32>
    %191 = vector.shape_cast %188 : vector<16x128xf32> to vector<1x16x128xf32>
    tpu.vector_store %arg6[%c0_115, %c0_116, %c0_117], %191 {strides = array<i32>} : memref<2x32x128xf32, #tpu.memory_space<vmem>>, vector<1x16x128xf32>,
    %c0_118 = arith.constant 0 : index
    %c0_119 = arith.constant 0 : index
    %c0_120 = arith.constant 0 : index
    %192 = vector.load %arg6[%c0_118, %c0_119, %c0_120] : memref<2x32x128xf32, #tpu.memory_space<vmem>>, vector<1x32x128xf32>
    %193 = vector.shape_cast %192 : vector<1x32x128xf32> to vector<32x128xf32>
    %cst_121 = arith.constant dense<0.000000e+00> : vector<48x128xf32>
    %194 = tpu.matmul %4, %193, %cst_121 {dimension_numbers = #tpu.dot_dimension_numbers<[1], [0], [0], [1], [0, 0, 1, 1], [], []>, precision = #tpu.contract_precision<fp32>} : vector<48x32xf32>, vector<32x128xf32>, vector<48x128xf32> -> vector<48x128xf32>
    %195 = vector.extract_strided_slice %194 {offsets = [0, 0], sizes = [16, 128], strides = [1, 1]} : vector<48x128xf32> to vector<16x128xf32>
    %196 = vector.extract_strided_slice %194 {offsets = [16, 0], sizes = [16, 128], strides = [1, 1]} : vector<48x128xf32> to vector<16x128xf32>
    %197 = vector.extract_strided_slice %194 {offsets = [32, 0], sizes = [16, 128], strides = [1, 1]} : vector<48x128xf32> to vector<16x128xf32>
    %c1_i32_122 = arith.constant 1 : i32
    %198 = tpu.dynamic_rotate %195 by %c1_i32_122 dim 1 : vector<16x128xf32>, i32 -> vector<16x128xf32>
    %cst_123 = arith.constant 0.000000e+00 : f32
    %199 = vector.broadcast %cst_123 : f32 to vector<16x128xf32>
    %200 = arith.select %27, %199, %198 : vector<16x128xi1>, vector<16x128xf32>
    %c127_i32_124 = arith.constant 127 : i32
    %201 = tpu.dynamic_rotate %197 by %c127_i32_124 dim 1 : vector<16x128xf32>, i32 -> vector<16x128xf32>
    %cst_125 = arith.constant 0.000000e+00 : f32
    %202 = vector.broadcast %cst_125 : f32 to vector<16x128xf32>
    %203 = arith.select %29, %202, %201 : vector<16x128xi1>, vector<16x128xf32>
    %204 = arith.addf %200, %196 : vector<16x128xf32>
    %205 = arith.addf %204, %203 : vector<16x128xf32>
    %206 = vector.broadcast %7 : f32 to vector<16x128xf32>
    %207 = arith.addf %205, %206 : vector<16x128xf32>
    %208 = math.tanh %207 : vector<16x128xf32>
    %c0_126 = arith.constant 0 : index
    %c16_127 = arith.constant 16 : index
    %c0_128 = arith.constant 0 : index
    %209 = vector.load %arg6[%c0_126, %c16_127, %c0_128] : memref<2x32x128xf32, #tpu.memory_space<vmem>>, vector<1x16x128xf32>
    %210 = vector.shape_cast %209 : vector<1x16x128xf32> to vector<16x128xf32>
    %211 = vector.shape_cast %208 : vector<16x128xf32> to vector<1x16x128xf32>
    tpu.vector_store %arg6[%c0_126, %c16_127, %c0_128], %211 {strides = array<i32>} : memref<2x32x128xf32, #tpu.memory_space<vmem>>, vector<1x16x128xf32>,
    %c1_129 = arith.constant 1 : index
    %c0_130 = arith.constant 0 : index
    %c0_131 = arith.constant 0 : index
    %212 = vector.load %arg6[%c1_129, %c0_130, %c0_131] : memref<2x32x128xf32, #tpu.memory_space<vmem>>, vector<1x16x128xf32>
    %213 = vector.shape_cast %212 : vector<1x16x128xf32> to vector<16x128xf32>
    %214 = vector.shape_cast %208 : vector<16x128xf32> to vector<1x16x128xf32>
    tpu.vector_store %arg6[%c1_129, %c0_130, %c0_131], %214 {strides = array<i32>} : memref<2x32x128xf32, #tpu.memory_space<vmem>>, vector<1x16x128xf32>,
    %c1_132 = arith.constant 1 : index
    %c0_133 = arith.constant 0 : index
    %c0_134 = arith.constant 0 : index
    %215 = vector.load %arg6[%c1_132, %c0_133, %c0_134] : memref<2x32x128xf32, #tpu.memory_space<vmem>>, vector<1x32x128xf32>
    %216 = vector.shape_cast %215 : vector<1x32x128xf32> to vector<32x128xf32>
    %cst_135 = arith.constant dense<0.000000e+00> : vector<48x128xf32>
    %217 = tpu.matmul %6, %216, %cst_135 {dimension_numbers = #tpu.dot_dimension_numbers<[1], [0], [0], [1], [0, 0, 1, 1], [], []>, precision = #tpu.contract_precision<fp32>} : vector<48x32xf32>, vector<32x128xf32>, vector<48x128xf32> -> vector<48x128xf32>
    %218 = vector.extract_strided_slice %217 {offsets = [0, 0], sizes = [16, 128], strides = [1, 1]} : vector<48x128xf32> to vector<16x128xf32>
    %219 = vector.extract_strided_slice %217 {offsets = [16, 0], sizes = [16, 128], strides = [1, 1]} : vector<48x128xf32> to vector<16x128xf32>
    %220 = vector.extract_strided_slice %217 {offsets = [32, 0], sizes = [16, 128], strides = [1, 1]} : vector<48x128xf32> to vector<16x128xf32>
    %c1_i32_136 = arith.constant 1 : i32
    %221 = tpu.dynamic_rotate %218 by %c1_i32_136 dim 1 : vector<16x128xf32>, i32 -> vector<16x128xf32>
    %cst_137 = arith.constant 0.000000e+00 : f32
    %222 = vector.broadcast %cst_137 : f32 to vector<16x128xf32>
    %223 = arith.select %27, %222, %221 : vector<16x128xi1>, vector<16x128xf32>
    %c127_i32_138 = arith.constant 127 : i32
    %224 = tpu.dynamic_rotate %220 by %c127_i32_138 dim 1 : vector<16x128xf32>, i32 -> vector<16x128xf32>
    %cst_139 = arith.constant 0.000000e+00 : f32
    %225 = vector.broadcast %cst_139 : f32 to vector<16x128xf32>
    %226 = arith.select %29, %225, %224 : vector<16x128xi1>, vector<16x128xf32>
    %227 = arith.addf %223, %219 : vector<16x128xf32>
    %228 = arith.addf %227, %226 : vector<16x128xf32>
    %229 = vector.broadcast %8 : f32 to vector<16x128xf32>
    %230 = arith.addf %228, %229 : vector<16x128xf32>
    %231 = math.tanh %230 : vector<16x128xf32>
    %c1_140 = arith.constant 1 : index
    %c16_141 = arith.constant 16 : index
    %c0_142 = arith.constant 0 : index
    %232 = vector.load %arg6[%c1_140, %c16_141, %c0_142] : memref<2x32x128xf32, #tpu.memory_space<vmem>>, vector<1x16x128xf32>
    %233 = vector.shape_cast %232 : vector<1x16x128xf32> to vector<16x128xf32>
    %234 = vector.shape_cast %231 : vector<16x128xf32> to vector<1x16x128xf32>
    tpu.vector_store %arg6[%c1_140, %c16_141, %c0_142], %234 {strides = array<i32>} : memref<2x32x128xf32, #tpu.memory_space<vmem>>, vector<1x16x128xf32>,
    %c0_143 = arith.constant 0 : index
    %c0_144 = arith.constant 0 : index
    %235 = vector.load %arg5[%c0_143, %c0_144] : memref<16x128xf32, #tpu.memory_space<vmem>>, vector<16x128xf32>
    %236 = arith.maximumf %235, %231 : vector<16x128xf32>
    %c0_145 = arith.constant 0 : index
    %c0_146 = arith.constant 0 : index
    %237 = vector.load %arg5[%c0_145, %c0_146] : memref<16x128xf32, #tpu.memory_space<vmem>>, vector<16x128xf32>
    tpu.vector_store %arg5[%c0_145, %c0_146], %236 {strides = array<i32>} : memref<16x128xf32, #tpu.memory_space<vmem>>, vector<16x128xf32>,
    %c4_i32 = arith.constant 4 : i32
    %238 = arith.index_cast %c4_i32 : i32 to index
    %c0_147 = arith.constant 0 : index
    %c0_148 = arith.constant 0 : index
    %239 = vector.load %arg4[%238, %c0_147, %c0_148] : memref<8x16x128xf32, #tpu.memory_space<vmem>>, vector<1x16x128xf32>
    %240 = vector.shape_cast %239 : vector<1x16x128xf32> to vector<16x128xf32>
    %c0_149 = arith.constant 0 : index
    %c0_150 = arith.constant 0 : index
    %c0_151 = arith.constant 0 : index
    %241 = vector.load %arg6[%c0_149, %c0_150, %c0_151] : memref<2x32x128xf32, #tpu.memory_space<vmem>>, vector<1x16x128xf32>
    %242 = vector.shape_cast %241 : vector<1x16x128xf32> to vector<16x128xf32>
    %243 = vector.shape_cast %240 : vector<16x128xf32> to vector<1x16x128xf32>
    tpu.vector_store %arg6[%c0_149, %c0_150, %c0_151], %243 {strides = array<i32>} : memref<2x32x128xf32, #tpu.memory_space<vmem>>, vector<1x16x128xf32>,
    %c0_152 = arith.constant 0 : index
    %c0_153 = arith.constant 0 : index
    %c0_154 = arith.constant 0 : index
    %244 = vector.load %arg6[%c0_152, %c0_153, %c0_154] : memref<2x32x128xf32, #tpu.memory_space<vmem>>, vector<1x32x128xf32>
    %245 = vector.shape_cast %244 : vector<1x32x128xf32> to vector<32x128xf32>
    %cst_155 = arith.constant dense<0.000000e+00> : vector<48x128xf32>
    %246 = tpu.matmul %4, %245, %cst_155 {dimension_numbers = #tpu.dot_dimension_numbers<[1], [0], [0], [1], [0, 0, 1, 1], [], []>, precision = #tpu.contract_precision<fp32>} : vector<48x32xf32>, vector<32x128xf32>, vector<48x128xf32> -> vector<48x128xf32>
    %247 = vector.extract_strided_slice %246 {offsets = [0, 0], sizes = [16, 128], strides = [1, 1]} : vector<48x128xf32> to vector<16x128xf32>
    %248 = vector.extract_strided_slice %246 {offsets = [16, 0], sizes = [16, 128], strides = [1, 1]} : vector<48x128xf32> to vector<16x128xf32>
    %249 = vector.extract_strided_slice %246 {offsets = [32, 0], sizes = [16, 128], strides = [1, 1]} : vector<48x128xf32> to vector<16x128xf32>
    %c1_i32_156 = arith.constant 1 : i32
    %250 = tpu.dynamic_rotate %247 by %c1_i32_156 dim 1 : vector<16x128xf32>, i32 -> vector<16x128xf32>
    %cst_157 = arith.constant 0.000000e+00 : f32
    %251 = vector.broadcast %cst_157 : f32 to vector<16x128xf32>
    %252 = arith.select %27, %251, %250 : vector<16x128xi1>, vector<16x128xf32>
    %c127_i32_158 = arith.constant 127 : i32
    %253 = tpu.dynamic_rotate %249 by %c127_i32_158 dim 1 : vector<16x128xf32>, i32 -> vector<16x128xf32>
    %cst_159 = arith.constant 0.000000e+00 : f32
    %254 = vector.broadcast %cst_159 : f32 to vector<16x128xf32>
    %255 = arith.select %29, %254, %253 : vector<16x128xi1>, vector<16x128xf32>
    %256 = arith.addf %252, %248 : vector<16x128xf32>
    %257 = arith.addf %256, %255 : vector<16x128xf32>
    %258 = vector.broadcast %7 : f32 to vector<16x128xf32>
    %259 = arith.addf %257, %258 : vector<16x128xf32>
    %260 = math.tanh %259 : vector<16x128xf32>
    %c0_160 = arith.constant 0 : index
    %c16_161 = arith.constant 16 : index
    %c0_162 = arith.constant 0 : index
    %261 = vector.load %arg6[%c0_160, %c16_161, %c0_162] : memref<2x32x128xf32, #tpu.memory_space<vmem>>, vector<1x16x128xf32>
    %262 = vector.shape_cast %261 : vector<1x16x128xf32> to vector<16x128xf32>
    %263 = vector.shape_cast %260 : vector<16x128xf32> to vector<1x16x128xf32>
    tpu.vector_store %arg6[%c0_160, %c16_161, %c0_162], %263 {strides = array<i32>} : memref<2x32x128xf32, #tpu.memory_space<vmem>>, vector<1x16x128xf32>,
    %c1_163 = arith.constant 1 : index
    %c0_164 = arith.constant 0 : index
    %c0_165 = arith.constant 0 : index
    %264 = vector.load %arg6[%c1_163, %c0_164, %c0_165] : memref<2x32x128xf32, #tpu.memory_space<vmem>>, vector<1x16x128xf32>
    %265 = vector.shape_cast %264 : vector<1x16x128xf32> to vector<16x128xf32>
    %266 = vector.shape_cast %260 : vector<16x128xf32> to vector<1x16x128xf32>
    tpu.vector_store %arg6[%c1_163, %c0_164, %c0_165], %266 {strides = array<i32>} : memref<2x32x128xf32, #tpu.memory_space<vmem>>, vector<1x16x128xf32>,
    %c1_166 = arith.constant 1 : index
    %c0_167 = arith.constant 0 : index
    %c0_168 = arith.constant 0 : index
    %267 = vector.load %arg6[%c1_166, %c0_167, %c0_168] : memref<2x32x128xf32, #tpu.memory_space<vmem>>, vector<1x32x128xf32>
    %268 = vector.shape_cast %267 : vector<1x32x128xf32> to vector<32x128xf32>
    %cst_169 = arith.constant dense<0.000000e+00> : vector<48x128xf32>
    %269 = tpu.matmul %6, %268, %cst_169 {dimension_numbers = #tpu.dot_dimension_numbers<[1], [0], [0], [1], [0, 0, 1, 1], [], []>, precision = #tpu.contract_precision<fp32>} : vector<48x32xf32>, vector<32x128xf32>, vector<48x128xf32> -> vector<48x128xf32>
    %270 = vector.extract_strided_slice %269 {offsets = [0, 0], sizes = [16, 128], strides = [1, 1]} : vector<48x128xf32> to vector<16x128xf32>
    %271 = vector.extract_strided_slice %269 {offsets = [16, 0], sizes = [16, 128], strides = [1, 1]} : vector<48x128xf32> to vector<16x128xf32>
    %272 = vector.extract_strided_slice %269 {offsets = [32, 0], sizes = [16, 128], strides = [1, 1]} : vector<48x128xf32> to vector<16x128xf32>
    %c1_i32_170 = arith.constant 1 : i32
    %273 = tpu.dynamic_rotate %270 by %c1_i32_170 dim 1 : vector<16x128xf32>, i32 -> vector<16x128xf32>
    %cst_171 = arith.constant 0.000000e+00 : f32
    %274 = vector.broadcast %cst_171 : f32 to vector<16x128xf32>
    %275 = arith.select %27, %274, %273 : vector<16x128xi1>, vector<16x128xf32>
    %c127_i32_172 = arith.constant 127 : i32
    %276 = tpu.dynamic_rotate %272 by %c127_i32_172 dim 1 : vector<16x128xf32>, i32 -> vector<16x128xf32>
    %cst_173 = arith.constant 0.000000e+00 : f32
    %277 = vector.broadcast %cst_173 : f32 to vector<16x128xf32>
    %278 = arith.select %29, %277, %276 : vector<16x128xi1>, vector<16x128xf32>
    %279 = arith.addf %275, %271 : vector<16x128xf32>
    %280 = arith.addf %279, %278 : vector<16x128xf32>
    %281 = vector.broadcast %8 : f32 to vector<16x128xf32>
    %282 = arith.addf %280, %281 : vector<16x128xf32>
    %283 = math.tanh %282 : vector<16x128xf32>
    %c1_174 = arith.constant 1 : index
    %c16_175 = arith.constant 16 : index
    %c0_176 = arith.constant 0 : index
    %284 = vector.load %arg6[%c1_174, %c16_175, %c0_176] : memref<2x32x128xf32, #tpu.memory_space<vmem>>, vector<1x16x128xf32>
    %285 = vector.shape_cast %284 : vector<1x16x128xf32> to vector<16x128xf32>
    %286 = vector.shape_cast %283 : vector<16x128xf32> to vector<1x16x128xf32>
    tpu.vector_store %arg6[%c1_174, %c16_175, %c0_176], %286 {strides = array<i32>} : memref<2x32x128xf32, #tpu.memory_space<vmem>>, vector<1x16x128xf32>,
    %c0_177 = arith.constant 0 : index
    %c0_178 = arith.constant 0 : index
    %287 = vector.load %arg5[%c0_177, %c0_178] : memref<16x128xf32, #tpu.memory_space<vmem>>, vector<16x128xf32>
    %288 = arith.maximumf %287, %283 : vector<16x128xf32>
    %c0_179 = arith.constant 0 : index
    %c0_180 = arith.constant 0 : index
    %289 = vector.load %arg5[%c0_179, %c0_180] : memref<16x128xf32, #tpu.memory_space<vmem>>, vector<16x128xf32>
    tpu.vector_store %arg5[%c0_179, %c0_180], %288 {strides = array<i32>} : memref<16x128xf32, #tpu.memory_space<vmem>>, vector<16x128xf32>,
    %c5_i32 = arith.constant 5 : i32
    %290 = arith.index_cast %c5_i32 : i32 to index
    %c0_181 = arith.constant 0 : index
    %c0_182 = arith.constant 0 : index
    %291 = vector.load %arg4[%290, %c0_181, %c0_182] : memref<8x16x128xf32, #tpu.memory_space<vmem>>, vector<1x16x128xf32>
    %292 = vector.shape_cast %291 : vector<1x16x128xf32> to vector<16x128xf32>
    %c0_183 = arith.constant 0 : index
    %c0_184 = arith.constant 0 : index
    %c0_185 = arith.constant 0 : index
    %293 = vector.load %arg6[%c0_183, %c0_184, %c0_185] : memref<2x32x128xf32, #tpu.memory_space<vmem>>, vector<1x16x128xf32>
    %294 = vector.shape_cast %293 : vector<1x16x128xf32> to vector<16x128xf32>
    %295 = vector.shape_cast %292 : vector<16x128xf32> to vector<1x16x128xf32>
    tpu.vector_store %arg6[%c0_183, %c0_184, %c0_185], %295 {strides = array<i32>} : memref<2x32x128xf32, #tpu.memory_space<vmem>>, vector<1x16x128xf32>,
    %c0_186 = arith.constant 0 : index
    %c0_187 = arith.constant 0 : index
    %c0_188 = arith.constant 0 : index
    %296 = vector.load %arg6[%c0_186, %c0_187, %c0_188] : memref<2x32x128xf32, #tpu.memory_space<vmem>>, vector<1x32x128xf32>
    %297 = vector.shape_cast %296 : vector<1x32x128xf32> to vector<32x128xf32>
    %cst_189 = arith.constant dense<0.000000e+00> : vector<48x128xf32>
    %298 = tpu.matmul %4, %297, %cst_189 {dimension_numbers = #tpu.dot_dimension_numbers<[1], [0], [0], [1], [0, 0, 1, 1], [], []>, precision = #tpu.contract_precision<fp32>} : vector<48x32xf32>, vector<32x128xf32>, vector<48x128xf32> -> vector<48x128xf32>
    %299 = vector.extract_strided_slice %298 {offsets = [0, 0], sizes = [16, 128], strides = [1, 1]} : vector<48x128xf32> to vector<16x128xf32>
    %300 = vector.extract_strided_slice %298 {offsets = [16, 0], sizes = [16, 128], strides = [1, 1]} : vector<48x128xf32> to vector<16x128xf32>
    %301 = vector.extract_strided_slice %298 {offsets = [32, 0], sizes = [16, 128], strides = [1, 1]} : vector<48x128xf32> to vector<16x128xf32>
    %c1_i32_190 = arith.constant 1 : i32
    %302 = tpu.dynamic_rotate %299 by %c1_i32_190 dim 1 : vector<16x128xf32>, i32 -> vector<16x128xf32>
    %cst_191 = arith.constant 0.000000e+00 : f32
    %303 = vector.broadcast %cst_191 : f32 to vector<16x128xf32>
    %304 = arith.select %27, %303, %302 : vector<16x128xi1>, vector<16x128xf32>
    %c127_i32_192 = arith.constant 127 : i32
    %305 = tpu.dynamic_rotate %301 by %c127_i32_192 dim 1 : vector<16x128xf32>, i32 -> vector<16x128xf32>
    %cst_193 = arith.constant 0.000000e+00 : f32
    %306 = vector.broadcast %cst_193 : f32 to vector<16x128xf32>
    %307 = arith.select %29, %306, %305 : vector<16x128xi1>, vector<16x128xf32>
    %308 = arith.addf %304, %300 : vector<16x128xf32>
    %309 = arith.addf %308, %307 : vector<16x128xf32>
    %310 = vector.broadcast %7 : f32 to vector<16x128xf32>
    %311 = arith.addf %309, %310 : vector<16x128xf32>
    %312 = math.tanh %311 : vector<16x128xf32>
    %c0_194 = arith.constant 0 : index
    %c16_195 = arith.constant 16 : index
    %c0_196 = arith.constant 0 : index
    %313 = vector.load %arg6[%c0_194, %c16_195, %c0_196] : memref<2x32x128xf32, #tpu.memory_space<vmem>>, vector<1x16x128xf32>
    %314 = vector.shape_cast %313 : vector<1x16x128xf32> to vector<16x128xf32>
    %315 = vector.shape_cast %312 : vector<16x128xf32> to vector<1x16x128xf32>
    tpu.vector_store %arg6[%c0_194, %c16_195, %c0_196], %315 {strides = array<i32>} : memref<2x32x128xf32, #tpu.memory_space<vmem>>, vector<1x16x128xf32>,
    %c1_197 = arith.constant 1 : index
    %c0_198 = arith.constant 0 : index
    %c0_199 = arith.constant 0 : index
    %316 = vector.load %arg6[%c1_197, %c0_198, %c0_199] : memref<2x32x128xf32, #tpu.memory_space<vmem>>, vector<1x16x128xf32>
    %317 = vector.shape_cast %316 : vector<1x16x128xf32> to vector<16x128xf32>
    %318 = vector.shape_cast %312 : vector<16x128xf32> to vector<1x16x128xf32>
    tpu.vector_store %arg6[%c1_197, %c0_198, %c0_199], %318 {strides = array<i32>} : memref<2x32x128xf32, #tpu.memory_space<vmem>>, vector<1x16x128xf32>,
    %c1_200 = arith.constant 1 : index
    %c0_201 = arith.constant 0 : index
    %c0_202 = arith.constant 0 : index
    %319 = vector.load %arg6[%c1_200, %c0_201, %c0_202] : memref<2x32x128xf32, #tpu.memory_space<vmem>>, vector<1x32x128xf32>
    %320 = vector.shape_cast %319 : vector<1x32x128xf32> to vector<32x128xf32>
    %cst_203 = arith.constant dense<0.000000e+00> : vector<48x128xf32>
    %321 = tpu.matmul %6, %320, %cst_203 {dimension_numbers = #tpu.dot_dimension_numbers<[1], [0], [0], [1], [0, 0, 1, 1], [], []>, precision = #tpu.contract_precision<fp32>} : vector<48x32xf32>, vector<32x128xf32>, vector<48x128xf32> -> vector<48x128xf32>
    %322 = vector.extract_strided_slice %321 {offsets = [0, 0], sizes = [16, 128], strides = [1, 1]} : vector<48x128xf32> to vector<16x128xf32>
    %323 = vector.extract_strided_slice %321 {offsets = [16, 0], sizes = [16, 128], strides = [1, 1]} : vector<48x128xf32> to vector<16x128xf32>
    %324 = vector.extract_strided_slice %321 {offsets = [32, 0], sizes = [16, 128], strides = [1, 1]} : vector<48x128xf32> to vector<16x128xf32>
    %c1_i32_204 = arith.constant 1 : i32
    %325 = tpu.dynamic_rotate %322 by %c1_i32_204 dim 1 : vector<16x128xf32>, i32 -> vector<16x128xf32>
    %cst_205 = arith.constant 0.000000e+00 : f32
    %326 = vector.broadcast %cst_205 : f32 to vector<16x128xf32>
    %327 = arith.select %27, %326, %325 : vector<16x128xi1>, vector<16x128xf32>
    %c127_i32_206 = arith.constant 127 : i32
    %328 = tpu.dynamic_rotate %324 by %c127_i32_206 dim 1 : vector<16x128xf32>, i32 -> vector<16x128xf32>
    %cst_207 = arith.constant 0.000000e+00 : f32
    %329 = vector.broadcast %cst_207 : f32 to vector<16x128xf32>
    %330 = arith.select %29, %329, %328 : vector<16x128xi1>, vector<16x128xf32>
    %331 = arith.addf %327, %323 : vector<16x128xf32>
    %332 = arith.addf %331, %330 : vector<16x128xf32>
    %333 = vector.broadcast %8 : f32 to vector<16x128xf32>
    %334 = arith.addf %332, %333 : vector<16x128xf32>
    %335 = math.tanh %334 : vector<16x128xf32>
    %c1_208 = arith.constant 1 : index
    %c16_209 = arith.constant 16 : index
    %c0_210 = arith.constant 0 : index
    %336 = vector.load %arg6[%c1_208, %c16_209, %c0_210] : memref<2x32x128xf32, #tpu.memory_space<vmem>>, vector<1x16x128xf32>
    %337 = vector.shape_cast %336 : vector<1x16x128xf32> to vector<16x128xf32>
    %338 = vector.shape_cast %335 : vector<16x128xf32> to vector<1x16x128xf32>
    tpu.vector_store %arg6[%c1_208, %c16_209, %c0_210], %338 {strides = array<i32>} : memref<2x32x128xf32, #tpu.memory_space<vmem>>, vector<1x16x128xf32>,
    %c0_211 = arith.constant 0 : index
    %c0_212 = arith.constant 0 : index
    %339 = vector.load %arg5[%c0_211, %c0_212] : memref<16x128xf32, #tpu.memory_space<vmem>>, vector<16x128xf32>
    %340 = arith.maximumf %339, %335 : vector<16x128xf32>
    %c0_213 = arith.constant 0 : index
    %c0_214 = arith.constant 0 : index
    %341 = vector.load %arg5[%c0_213, %c0_214] : memref<16x128xf32, #tpu.memory_space<vmem>>, vector<16x128xf32>
    tpu.vector_store %arg5[%c0_213, %c0_214], %340 {strides = array<i32>} : memref<16x128xf32, #tpu.memory_space<vmem>>, vector<16x128xf32>,
    %c6_i32 = arith.constant 6 : i32
    %342 = arith.index_cast %c6_i32 : i32 to index
    %c0_215 = arith.constant 0 : index
    %c0_216 = arith.constant 0 : index
    %343 = vector.load %arg4[%342, %c0_215, %c0_216] : memref<8x16x128xf32, #tpu.memory_space<vmem>>, vector<1x16x128xf32>
    %344 = vector.shape_cast %343 : vector<1x16x128xf32> to vector<16x128xf32>
    %c0_217 = arith.constant 0 : index
    %c0_218 = arith.constant 0 : index
    %c0_219 = arith.constant 0 : index
    %345 = vector.load %arg6[%c0_217, %c0_218, %c0_219] : memref<2x32x128xf32, #tpu.memory_space<vmem>>, vector<1x16x128xf32>
    %346 = vector.shape_cast %345 : vector<1x16x128xf32> to vector<16x128xf32>
    %347 = vector.shape_cast %344 : vector<16x128xf32> to vector<1x16x128xf32>
    tpu.vector_store %arg6[%c0_217, %c0_218, %c0_219], %347 {strides = array<i32>} : memref<2x32x128xf32, #tpu.memory_space<vmem>>, vector<1x16x128xf32>,
    %c0_220 = arith.constant 0 : index
    %c0_221 = arith.constant 0 : index
    %c0_222 = arith.constant 0 : index
    %348 = vector.load %arg6[%c0_220, %c0_221, %c0_222] : memref<2x32x128xf32, #tpu.memory_space<vmem>>, vector<1x32x128xf32>
    %349 = vector.shape_cast %348 : vector<1x32x128xf32> to vector<32x128xf32>
    %cst_223 = arith.constant dense<0.000000e+00> : vector<48x128xf32>
    %350 = tpu.matmul %4, %349, %cst_223 {dimension_numbers = #tpu.dot_dimension_numbers<[1], [0], [0], [1], [0, 0, 1, 1], [], []>, precision = #tpu.contract_precision<fp32>} : vector<48x32xf32>, vector<32x128xf32>, vector<48x128xf32> -> vector<48x128xf32>
    %351 = vector.extract_strided_slice %350 {offsets = [0, 0], sizes = [16, 128], strides = [1, 1]} : vector<48x128xf32> to vector<16x128xf32>
    %352 = vector.extract_strided_slice %350 {offsets = [16, 0], sizes = [16, 128], strides = [1, 1]} : vector<48x128xf32> to vector<16x128xf32>
    %353 = vector.extract_strided_slice %350 {offsets = [32, 0], sizes = [16, 128], strides = [1, 1]} : vector<48x128xf32> to vector<16x128xf32>
    %c1_i32_224 = arith.constant 1 : i32
    %354 = tpu.dynamic_rotate %351 by %c1_i32_224 dim 1 : vector<16x128xf32>, i32 -> vector<16x128xf32>
    %cst_225 = arith.constant 0.000000e+00 : f32
    %355 = vector.broadcast %cst_225 : f32 to vector<16x128xf32>
    %356 = arith.select %27, %355, %354 : vector<16x128xi1>, vector<16x128xf32>
    %c127_i32_226 = arith.constant 127 : i32
    %357 = tpu.dynamic_rotate %353 by %c127_i32_226 dim 1 : vector<16x128xf32>, i32 -> vector<16x128xf32>
    %cst_227 = arith.constant 0.000000e+00 : f32
    %358 = vector.broadcast %cst_227 : f32 to vector<16x128xf32>
    %359 = arith.select %29, %358, %357 : vector<16x128xi1>, vector<16x128xf32>
    %360 = arith.addf %356, %352 : vector<16x128xf32>
    %361 = arith.addf %360, %359 : vector<16x128xf32>
    %362 = vector.broadcast %7 : f32 to vector<16x128xf32>
    %363 = arith.addf %361, %362 : vector<16x128xf32>
    %364 = math.tanh %363 : vector<16x128xf32>
    %c0_228 = arith.constant 0 : index
    %c16_229 = arith.constant 16 : index
    %c0_230 = arith.constant 0 : index
    %365 = vector.load %arg6[%c0_228, %c16_229, %c0_230] : memref<2x32x128xf32, #tpu.memory_space<vmem>>, vector<1x16x128xf32>
    %366 = vector.shape_cast %365 : vector<1x16x128xf32> to vector<16x128xf32>
    %367 = vector.shape_cast %364 : vector<16x128xf32> to vector<1x16x128xf32>
    tpu.vector_store %arg6[%c0_228, %c16_229, %c0_230], %367 {strides = array<i32>} : memref<2x32x128xf32, #tpu.memory_space<vmem>>, vector<1x16x128xf32>,
    %c1_231 = arith.constant 1 : index
    %c0_232 = arith.constant 0 : index
    %c0_233 = arith.constant 0 : index
    %368 = vector.load %arg6[%c1_231, %c0_232, %c0_233] : memref<2x32x128xf32, #tpu.memory_space<vmem>>, vector<1x16x128xf32>
    %369 = vector.shape_cast %368 : vector<1x16x128xf32> to vector<16x128xf32>
    %370 = vector.shape_cast %364 : vector<16x128xf32> to vector<1x16x128xf32>
    tpu.vector_store %arg6[%c1_231, %c0_232, %c0_233], %370 {strides = array<i32>} : memref<2x32x128xf32, #tpu.memory_space<vmem>>, vector<1x16x128xf32>,
    %c1_234 = arith.constant 1 : index
    %c0_235 = arith.constant 0 : index
    %c0_236 = arith.constant 0 : index
    %371 = vector.load %arg6[%c1_234, %c0_235, %c0_236] : memref<2x32x128xf32, #tpu.memory_space<vmem>>, vector<1x32x128xf32>
    %372 = vector.shape_cast %371 : vector<1x32x128xf32> to vector<32x128xf32>
    %cst_237 = arith.constant dense<0.000000e+00> : vector<48x128xf32>
    %373 = tpu.matmul %6, %372, %cst_237 {dimension_numbers = #tpu.dot_dimension_numbers<[1], [0], [0], [1], [0, 0, 1, 1], [], []>, precision = #tpu.contract_precision<fp32>} : vector<48x32xf32>, vector<32x128xf32>, vector<48x128xf32> -> vector<48x128xf32>
    %374 = vector.extract_strided_slice %373 {offsets = [0, 0], sizes = [16, 128], strides = [1, 1]} : vector<48x128xf32> to vector<16x128xf32>
    %375 = vector.extract_strided_slice %373 {offsets = [16, 0], sizes = [16, 128], strides = [1, 1]} : vector<48x128xf32> to vector<16x128xf32>
    %376 = vector.extract_strided_slice %373 {offsets = [32, 0], sizes = [16, 128], strides = [1, 1]} : vector<48x128xf32> to vector<16x128xf32>
    %c1_i32_238 = arith.constant 1 : i32
    %377 = tpu.dynamic_rotate %374 by %c1_i32_238 dim 1 : vector<16x128xf32>, i32 -> vector<16x128xf32>
    %cst_239 = arith.constant 0.000000e+00 : f32
    %378 = vector.broadcast %cst_239 : f32 to vector<16x128xf32>
    %379 = arith.select %27, %378, %377 : vector<16x128xi1>, vector<16x128xf32>
    %c127_i32_240 = arith.constant 127 : i32
    %380 = tpu.dynamic_rotate %376 by %c127_i32_240 dim 1 : vector<16x128xf32>, i32 -> vector<16x128xf32>
    %cst_241 = arith.constant 0.000000e+00 : f32
    %381 = vector.broadcast %cst_241 : f32 to vector<16x128xf32>
    %382 = arith.select %29, %381, %380 : vector<16x128xi1>, vector<16x128xf32>
    %383 = arith.addf %379, %375 : vector<16x128xf32>
    %384 = arith.addf %383, %382 : vector<16x128xf32>
    %385 = vector.broadcast %8 : f32 to vector<16x128xf32>
    %386 = arith.addf %384, %385 : vector<16x128xf32>
    %387 = math.tanh %386 : vector<16x128xf32>
    %c1_242 = arith.constant 1 : index
    %c16_243 = arith.constant 16 : index
    %c0_244 = arith.constant 0 : index
    %388 = vector.load %arg6[%c1_242, %c16_243, %c0_244] : memref<2x32x128xf32, #tpu.memory_space<vmem>>, vector<1x16x128xf32>
    %389 = vector.shape_cast %388 : vector<1x16x128xf32> to vector<16x128xf32>
    %390 = vector.shape_cast %387 : vector<16x128xf32> to vector<1x16x128xf32>
    tpu.vector_store %arg6[%c1_242, %c16_243, %c0_244], %390 {strides = array<i32>} : memref<2x32x128xf32, #tpu.memory_space<vmem>>, vector<1x16x128xf32>,
    %c0_245 = arith.constant 0 : index
    %c0_246 = arith.constant 0 : index
    %391 = vector.load %arg5[%c0_245, %c0_246] : memref<16x128xf32, #tpu.memory_space<vmem>>, vector<16x128xf32>
    %392 = arith.maximumf %391, %387 : vector<16x128xf32>
    %c0_247 = arith.constant 0 : index
    %c0_248 = arith.constant 0 : index
    %393 = vector.load %arg5[%c0_247, %c0_248] : memref<16x128xf32, #tpu.memory_space<vmem>>, vector<16x128xf32>
    tpu.vector_store %arg5[%c0_247, %c0_248], %392 {strides = array<i32>} : memref<16x128xf32, #tpu.memory_space<vmem>>, vector<16x128xf32>,
    %c7_i32 = arith.constant 7 : i32
    %394 = arith.index_cast %c7_i32 : i32 to index
    %c0_249 = arith.constant 0 : index
    %c0_250 = arith.constant 0 : index
    %395 = vector.load %arg4[%394, %c0_249, %c0_250] : memref<8x16x128xf32, #tpu.memory_space<vmem>>, vector<1x16x128xf32>
    %396 = vector.shape_cast %395 : vector<1x16x128xf32> to vector<16x128xf32>
    %c0_251 = arith.constant 0 : index
    %c0_252 = arith.constant 0 : index
    %c0_253 = arith.constant 0 : index
    %397 = vector.load %arg6[%c0_251, %c0_252, %c0_253] : memref<2x32x128xf32, #tpu.memory_space<vmem>>, vector<1x16x128xf32>
    %398 = vector.shape_cast %397 : vector<1x16x128xf32> to vector<16x128xf32>
    %399 = vector.shape_cast %396 : vector<16x128xf32> to vector<1x16x128xf32>
    tpu.vector_store %arg6[%c0_251, %c0_252, %c0_253], %399 {strides = array<i32>} : memref<2x32x128xf32, #tpu.memory_space<vmem>>, vector<1x16x128xf32>,
    %c0_254 = arith.constant 0 : index
    %c0_255 = arith.constant 0 : index
    %c0_256 = arith.constant 0 : index
    %400 = vector.load %arg6[%c0_254, %c0_255, %c0_256] : memref<2x32x128xf32, #tpu.memory_space<vmem>>, vector<1x32x128xf32>
    %401 = vector.shape_cast %400 : vector<1x32x128xf32> to vector<32x128xf32>
    %cst_257 = arith.constant dense<0.000000e+00> : vector<48x128xf32>
    %402 = tpu.matmul %4, %401, %cst_257 {dimension_numbers = #tpu.dot_dimension_numbers<[1], [0], [0], [1], [0, 0, 1, 1], [], []>, precision = #tpu.contract_precision<fp32>} : vector<48x32xf32>, vector<32x128xf32>, vector<48x128xf32> -> vector<48x128xf32>
    %403 = vector.extract_strided_slice %402 {offsets = [0, 0], sizes = [16, 128], strides = [1, 1]} : vector<48x128xf32> to vector<16x128xf32>
    %404 = vector.extract_strided_slice %402 {offsets = [16, 0], sizes = [16, 128], strides = [1, 1]} : vector<48x128xf32> to vector<16x128xf32>
    %405 = vector.extract_strided_slice %402 {offsets = [32, 0], sizes = [16, 128], strides = [1, 1]} : vector<48x128xf32> to vector<16x128xf32>
    %c1_i32_258 = arith.constant 1 : i32
    %406 = tpu.dynamic_rotate %403 by %c1_i32_258 dim 1 : vector<16x128xf32>, i32 -> vector<16x128xf32>
    %cst_259 = arith.constant 0.000000e+00 : f32
    %407 = vector.broadcast %cst_259 : f32 to vector<16x128xf32>
    %408 = arith.select %27, %407, %406 : vector<16x128xi1>, vector<16x128xf32>
    %c127_i32_260 = arith.constant 127 : i32
    %409 = tpu.dynamic_rotate %405 by %c127_i32_260 dim 1 : vector<16x128xf32>, i32 -> vector<16x128xf32>
    %cst_261 = arith.constant 0.000000e+00 : f32
    %410 = vector.broadcast %cst_261 : f32 to vector<16x128xf32>
    %411 = arith.select %29, %410, %409 : vector<16x128xi1>, vector<16x128xf32>
    %412 = arith.addf %408, %404 : vector<16x128xf32>
    %413 = arith.addf %412, %411 : vector<16x128xf32>
    %414 = vector.broadcast %7 : f32 to vector<16x128xf32>
    %415 = arith.addf %413, %414 : vector<16x128xf32>
    %416 = math.tanh %415 : vector<16x128xf32>
    %c0_262 = arith.constant 0 : index
    %c16_263 = arith.constant 16 : index
    %c0_264 = arith.constant 0 : index
    %417 = vector.load %arg6[%c0_262, %c16_263, %c0_264] : memref<2x32x128xf32, #tpu.memory_space<vmem>>, vector<1x16x128xf32>
    %418 = vector.shape_cast %417 : vector<1x16x128xf32> to vector<16x128xf32>
    %419 = vector.shape_cast %416 : vector<16x128xf32> to vector<1x16x128xf32>
    tpu.vector_store %arg6[%c0_262, %c16_263, %c0_264], %419 {strides = array<i32>} : memref<2x32x128xf32, #tpu.memory_space<vmem>>, vector<1x16x128xf32>,
    %c1_265 = arith.constant 1 : index
    %c0_266 = arith.constant 0 : index
    %c0_267 = arith.constant 0 : index
    %420 = vector.load %arg6[%c1_265, %c0_266, %c0_267] : memref<2x32x128xf32, #tpu.memory_space<vmem>>, vector<1x16x128xf32>
    %421 = vector.shape_cast %420 : vector<1x16x128xf32> to vector<16x128xf32>
    %422 = vector.shape_cast %416 : vector<16x128xf32> to vector<1x16x128xf32>
    tpu.vector_store %arg6[%c1_265, %c0_266, %c0_267], %422 {strides = array<i32>} : memref<2x32x128xf32, #tpu.memory_space<vmem>>, vector<1x16x128xf32>,
    %c1_268 = arith.constant 1 : index
    %c0_269 = arith.constant 0 : index
    %c0_270 = arith.constant 0 : index
    %423 = vector.load %arg6[%c1_268, %c0_269, %c0_270] : memref<2x32x128xf32, #tpu.memory_space<vmem>>, vector<1x32x128xf32>
    %424 = vector.shape_cast %423 : vector<1x32x128xf32> to vector<32x128xf32>
    %cst_271 = arith.constant dense<0.000000e+00> : vector<48x128xf32>
    %425 = tpu.matmul %6, %424, %cst_271 {dimension_numbers = #tpu.dot_dimension_numbers<[1], [0], [0], [1], [0, 0, 1, 1], [], []>, precision = #tpu.contract_precision<fp32>} : vector<48x32xf32>, vector<32x128xf32>, vector<48x128xf32> -> vector<48x128xf32>
    %426 = vector.extract_strided_slice %425 {offsets = [0, 0], sizes = [16, 128], strides = [1, 1]} : vector<48x128xf32> to vector<16x128xf32>
    %427 = vector.extract_strided_slice %425 {offsets = [16, 0], sizes = [16, 128], strides = [1, 1]} : vector<48x128xf32> to vector<16x128xf32>
    %428 = vector.extract_strided_slice %425 {offsets = [32, 0], sizes = [16, 128], strides = [1, 1]} : vector<48x128xf32> to vector<16x128xf32>
    %c1_i32_272 = arith.constant 1 : i32
    %429 = tpu.dynamic_rotate %426 by %c1_i32_272 dim 1 : vector<16x128xf32>, i32 -> vector<16x128xf32>
    %cst_273 = arith.constant 0.000000e+00 : f32
    %430 = vector.broadcast %cst_273 : f32 to vector<16x128xf32>
    %431 = arith.select %27, %430, %429 : vector<16x128xi1>, vector<16x128xf32>
    %c127_i32_274 = arith.constant 127 : i32
    %432 = tpu.dynamic_rotate %428 by %c127_i32_274 dim 1 : vector<16x128xf32>, i32 -> vector<16x128xf32>
    %cst_275 = arith.constant 0.000000e+00 : f32
    %433 = vector.broadcast %cst_275 : f32 to vector<16x128xf32>
    %434 = arith.select %29, %433, %432 : vector<16x128xi1>, vector<16x128xf32>
    %435 = arith.addf %431, %427 : vector<16x128xf32>
    %436 = arith.addf %435, %434 : vector<16x128xf32>
    %437 = vector.broadcast %8 : f32 to vector<16x128xf32>
    %438 = arith.addf %436, %437 : vector<16x128xf32>
    %439 = math.tanh %438 : vector<16x128xf32>
    %c1_276 = arith.constant 1 : index
    %c16_277 = arith.constant 16 : index
    %c0_278 = arith.constant 0 : index
    %440 = vector.load %arg6[%c1_276, %c16_277, %c0_278] : memref<2x32x128xf32, #tpu.memory_space<vmem>>, vector<1x16x128xf32>
    %441 = vector.shape_cast %440 : vector<1x16x128xf32> to vector<16x128xf32>
    %442 = vector.shape_cast %439 : vector<16x128xf32> to vector<1x16x128xf32>
    tpu.vector_store %arg6[%c1_276, %c16_277, %c0_278], %442 {strides = array<i32>} : memref<2x32x128xf32, #tpu.memory_space<vmem>>, vector<1x16x128xf32>,
    %c0_279 = arith.constant 0 : index
    %c0_280 = arith.constant 0 : index
    %443 = vector.load %arg5[%c0_279, %c0_280] : memref<16x128xf32, #tpu.memory_space<vmem>>, vector<16x128xf32>
    %444 = arith.maximumf %443, %439 : vector<16x128xf32>
    %c0_281 = arith.constant 0 : index
    %c0_282 = arith.constant 0 : index
    %445 = vector.load %arg5[%c0_281, %c0_282] : memref<16x128xf32, #tpu.memory_space<vmem>>, vector<16x128xf32>
    tpu.vector_store %arg5[%c0_281, %c0_282], %444 {strides = array<i32>} : memref<16x128xf32, #tpu.memory_space<vmem>>, vector<16x128xf32>,
    %c8_i32 = arith.constant 8 : i32
    return
  }
  func.func @transform_0(%arg0: i32, %arg1: i32) -> (i32, i32, i32) {
    %c0_i32 = arith.constant 0 : i32
    %c0_i32_0 = arith.constant 0 : i32
    %c0_i32_1 = arith.constant 0 : i32
    %c0_i32_2 = arith.constant 0 : i32
    return %c0_i32, %c0_i32_0, %c0_i32_1 : i32, i32, i32
  }
  func.func @transform_1(%arg0: i32, %arg1: i32) -> i32 {
    %c0_i32 = arith.constant 0 : i32
    %c0_i32_0 = arith.constant 0 : i32
    return %c0_i32 : i32
  }
  func.func @transform_2(%arg0: i32, %arg1: i32) -> (i32, i32, i32) {
    %c0_i32 = arith.constant 0 : i32
    %c0_i32_0 = arith.constant 0 : i32
    return %arg1, %c0_i32, %arg0 : i32, i32, i32
  }
  func.func @transform_3(%arg0: i32, %arg1: i32) -> (i32, i32) {
    %c0_i32 = arith.constant 0 : i32
    %c0_i32_0 = arith.constant 0 : i32
    return %c0_i32, %arg0 : i32, i32
  }
}

</mosaic_0001>

<bundles_post_ra>
// kernel: nnqlm_forward.1
= control target key start
LH: loop header
LB: loop body
LE: loop exit
PB: predicated region body
PF: predicated region fallthrough
CT: control target
= control target key end

     0   :  { %8 = vsyncpa [#allocation4], 0  ;;  %s17195_s0 = inlined_call_operand.vmem [shape: f32[2,48,32], index: 0, kind: input, shape index: {}]   ;;  %s17196_s1 = inlined_call_operand.vmem [shape: f32[2], index: 1, kind: input, shape index: {}]   ;;  %s17197_s2 = inlined_call_operand.vmem [shape: f32[8,16,128], index: 2, kind: input, shape index: {}]   ;;  %s17198_s3 = inlined_call_operand.vmem [shape: f32[16,128], index: 3, kind: output, shape index: {}]  }
   0x1   :  { %s17_s14 = sshll.u32 %s17196_s1, 4  ;;  %s18_s14 = int_to_ptr.vmem [resolvable:$true] %s17_s14 }
   0x2   :  { %s15645_s15 = scalar_lea.vmem %s18_s14, 16  ;;  %p15650_p1 = scmp.lt.s32.totalorder %s18_s14, %s18_s14 }
   0x3   :  { %p15646_p0 = scmp.ne.s32.totalorder %s18_s14, %s15645_s15  ;;  %p15651_p2 = scmp.lt.s32.totalorder %s15645_s15, %s15645_s15 }
   0x5   :  { %p15652_p3 = por %p15651_p2, %p15650_p1 }
   0x7   :  { %p15653_p4 = pnand %p15652_p3, %p15646_p0 }
   0x9   :  { %15656 = shalt.err (!%p15653_p4)
}
   0xa   :  { %s15659_s16 = smov [#allocation3]  }
   0xb   :  { %20 = dma.vmem_to_smem %s18_s14, 16, %s15659_s16, [#allocation4]  }
   0xc   :  { %15657 = dma.done.wait [#allocation4], 16  }
   0xd   :  { %15658 = vsyncadd [#allocation4], 4294967280 }
   0xe   :  { %26 = sfence }
   0xf   :  { %v72_v0 = vld [vmem:[%s17197_s2] sm:$0xff]  ;;  %v73_v1 = vld [vmem:[%s17197_s2 + $0x8] sm:$0xff]  ;;  %vm80_vm0 = vcmask 261120   ;;  %v43_v7 = vld [vmem:[%s17195_s0 + $0x10] sm:$0xff]  ;;  %s15660_s5 = smov 1   ;;  %s15661_s6 = smov 127  }
  0x10   :  { %v41_v2 = vld [vmem:[%s17195_s0] sm:$0xff]  ;;  %v100_v3 = vand.u32 4294901760, %v72_v0  ;;  %v103_v4 = vand.u32 4294901760, %v73_v1  ;;  %v42_v6 = vld [vmem:[%s17195_s0 + $0x8] sm:$0xff]  ;;  %v44_v8 = vld [vmem:[%s17195_s0 + $0x18] sm:$0xff]  ;;  %v88_v11 = vsel %vm80_vm0, %v43_v7, 0 }
  0x11   :  { %v82_v5 = vsel %vm80_vm0, %v41_v2, 0  ;;  %v85_v10 = vsel %vm80_vm0, %v42_v6, 0  ;;  %v91_v12 = vsel %vm80_vm0, %v44_v8, 0  ;;  %v45_v13 = vld [vmem:[%s17195_s0 + $0x20] sm:$0xff]  ;;  %v15716_v16 = vand.u32 4294901760, %v88_v11  ;;  %v46_v18 = vld [vmem:[%s17195_s0 + $0x28] sm:$0xff] }
  0x12   :  { %v15704_v9 = vand.u32 4294901760, %v82_v5  ;;  %v15712_v14 = vpack.c.bf16 %v103_v4, %v100_v3  ;;  %v15714_v15 = vand.u32 4294901760, %v85_v10  ;;  %v15718_v17 = vand.u32 4294901760, %v91_v12  ;;  %v11836_v2 = vld [vmem:[%s17195_s0 + $0x30] sm:$0xff]  ;;  %s54_s13 = sld [smem:[#allocation3]]  ;;  %s11842_s26 = sld [smem:[#allocation3 + $0x1]] }
  0x13   :  { %v230_v20 = vsub.f32 %v72_v0, %v100_v3  ;;  %v237_v21 = vsub.f32 %v73_v1, %v103_v4  ;;  %v94_v22 = vsel %vm80_vm0, %v45_v13, 0  ;;  %v15732_v24 = vsub.f32 %v88_v11, %v15716_v16  ;;  %v11843_v0 = vld [vmem:[%s17197_s2 + $0x10] sm:$0xff]  ;;  %v11844_v1 = vld [vmem:[%s17197_s2 + $0x18] sm:$0xff] }
  0x14   :  { %v15724_v19 = vsub.f32 %v82_v5, %v15704_v9  ;;  %14378 = vmatprep.subr.bf16.mxu0 %v15712_v14  ;;  %v15729_v23 = vsub.f32 %v85_v10, %v15714_v15  ;;  %v15735_v25 = vsub.f32 %v91_v12, %v15718_v17  ;;  %v15737_v26 = vand.u32 4294901760, %v94_v22 }
  0x15   :  { %14380 = vmatpush3.bf16.msra.mxu0 %v15712_v14  ;;  %v231_v28 = vand.u32 4294901760, %v230_v20  ;;  %v238_v29 = vand.u32 4294901760, %v237_v21  ;;  %v97_v30 = vsel %vm80_vm0, %v46_v18, 0  ;;  %v15748_v32 = vand.u32 4294901760, %v15732_v24 }
  0x16   :  { %v15741_v27 = vand.u32 4294901760, %v15724_v19  ;;  %v15745_v31 = vand.u32 4294901760, %v15729_v23  ;;  %v15751_v33 = vand.u32 4294901760, %v15735_v25  ;;  %v15754_v34 = vsub.f32 %v94_v22, %v15737_v26 }
  0x17   :  { %17241 = vst [vmem:[#allocation8_spill] sm:$0xff] %v15748_v32  ;;  %v232_v36 = vsub.f32 %v230_v20, %v231_v28  ;;  %v239_v37 = vsub.f32 %v237_v21, %v238_v29  ;;  %v15758_v38 = vand.u32 4294901760, %v97_v30  ;;  %v191_v40 = vsub.f32 %v15732_v24, %v15748_v32 }
  0x18   :  { %17239 = vst [vmem:[#allocation6_spill] sm:$0xff] %v15741_v27  ;;  %17240 = vst [vmem:[#allocation7_spill] sm:$0xff] %v15745_v31  ;;  %v171_v35 = vsub.f32 %v15724_v19, %v15741_v27  ;;  %v181_v39 = vsub.f32 %v15729_v23, %v15745_v31  ;;  %v201_v41 = vsub.f32 %v15735_v25, %v15751_v33  ;;  %v15767_v42 = vand.u32 4294901760, %v15754_v34 }
  0x19   :  { %17242 = vst [vmem:[#allocation9_spill] sm:$0xff] %v15751_v33  ;;  %v233_v44 = vand.u32 4294901760, %v232_v36  ;;  %v240_v45 = vand.u32 4294901760, %v239_v37  ;;  %v15772_v46 = vsub.f32 %v97_v30, %v15758_v38  ;;  %v15776_v48 = vand.u32 4294901760, %v191_v40 }
  0x1a   :  { %17243 = vst [vmem:[#allocation10_spill] sm:$0xff] %v15767_v42  ;;  %v15769_v43 = vand.u32 4294901760, %v171_v35  ;;  %v15774_v47 = vand.u32 4294901760, %v181_v39  ;;  %v211_v49 = vsub.f32 %v15754_v34, %v15767_v42  ;;  %v14385_v52 = vpack.c.bf16 %v237_v21, %v230_v20 }
  0x1b   :  { %v14381_v50 = vpack.c.bf16 %v240_v45, %v233_v44  ;;  %v15782_v51 = vand.u32 4294901760, %v15772_v46  ;;  %v15785_v53 = vand.u32 4294901760, %v201_v41  ;;  %v14393_v57 = vpack.c.bf16 %v238_v29, %v231_v28 }
  0x1c   :  { %17244 = vst [vmem:[#allocation11_spill] sm:$0xff] %v15769_v43  ;;  %12797 = vmatprep.mubr.f32.mxu0 %v15769_v43  ;;  %v15788_v54 = vand.u32 4294901760, %v211_v49  ;;  %v1586_v3 = vand.u32 4294901760, %v11843_v0  ;;  %v1589_v4 = vand.u32 4294901760, %v11844_v1  ;;  %v830_v5 = vsel %vm80_vm0, %v11836_v2, 0 }
  0x1d   :  { %17245 = vst [vmem:[#allocation12_spill] sm:$0xff] %v15782_v51  ;;  %12798 = vmatmul.mubr.f32.vlgmr.msra.gmra.mrb[0].mxu0 %v15774_v47  ;;  %14382 = vmatprep.subr.bf16.mxu0 %v14381_v50  ;;  %v221_v55 = vsub.f32 %v15772_v46, %v15782_v51  ;;  %v15846_v6 = vand.u32 4294901760, %v830_v5  ;;  %v56_v37 = vlaneseq }
  0x1e   :  { %12800 = vmatprep.mubr.f32.mxu0 %v15776_v48  ;;  %14384 = vmatpush3.bf16.msra.mxu0 %v14381_v50  ;;  %v15848_v7 = vpack.c.bf16 %v1589_v4, %v1586_v3  ;;  %v1716_v8 = vsub.f32 %v11843_v0, %v1586_v3  ;;  %v1723_v10 = vsub.f32 %v11844_v1, %v1589_v4  ;;  %v17250_v50 = vmov 0 }
  0x1f   :  { %14386 = vmatprep.subr.bf16.mxu0 %v14385_v52  ;;  %v15793_v56 = vand.u32 4294901760, %v221_v55  ;;  %v15851_v11 = vsub.f32 %v830_v5, %v15846_v6  ;;  %v57_v39 = vand.u32 127, %v56_v37 }
  0x20   :  { %v1717_v12 = vand.u32 4294901760, %v1716_v8  ;;  %v1724_v13 = vand.u32 4294901760, %v1723_v10  ;;  %v15865_v35 = vpack.c.bf16 %v1723_v10, %v1716_v8 }
  0x21   :  { %12801 = vmatmul.mubr.f32.gmra.mrb[2].mxu0 %v15785_v53  ;;  %v62_v40 = vand.u32 15, %v57_v39 }
  0x22   :  { %12803 = vmatprep.mubr.f32.mxu0 %v15788_v54  ;;  %v1718_v18 = vsub.f32 %v1716_v8, %v1717_v12  ;;  %v1725_v20 = vsub.f32 %v1723_v10, %v1724_v13  ;;  %v15867_v36 = vpack.c.bf16 %v1724_v13, %v1717_v12  ;;  %v11839_v8 = vld [vmem:[%s17195_s0 + $0x48] sm:$0xff] }
  0x23   :  { %vm15869_vm1 = vcmp.eq.s32.totalorder %v62_v40, 0  ;;  %vm15875_vm2 = vcmp.eq.s32.totalorder %v62_v40, 15  ;;  %v839_v13 = vsel %vm80_vm0, %v11839_v8, 0 }
  0x24   :  { %v1719_v22 = vand.u32 4294901760, %v1718_v18  ;;  %v1726_v28 = vand.u32 4294901760, %v1725_v20  ;;  %v17251_v50 = vsel %vm15875_vm2, 4294967295, %v17250_v50  ;;  %v11840_v20 = vld [vmem:[%s17195_s0 + $0x50] sm:$0xff] }
  0x25   :  { %12804 = vmatmul.mubr.f32.gmra.mrb[4].mxu0 %v15793_v56  ;;  %17252 = vst [vmem:[#allocation15_spill] sm:$0xff] %v17251_v50  ;;  %v842_v37 = vsel %vm80_vm0, %v11840_v20, 0 }
  0x26   :  { %12810 = vmatprep.mubr.f32.mxu0 %v15704_v9  ;;  %v15862_v30 = vpack.c.bf16 %v1726_v28, %v1719_v22  ;;  %v15914_v28 = vand.u32 4294901760, %v839_v13 }
  0x29   :  { %12811 = vmatmul.mubr.f32.vlgmr.msra.gmra.mrb[0].mxu0 %v15714_v15 }
  0x2a   :  { %12813 = vmatprep.mubr.f32.mxu0 %v15716_v16  ;;  %14388 = vmatpush3.bf16.msra.mxu0 %v14385_v52 }
  0x2b   :  { %14390 = vmatprep.subr.bf16.mxu0 %v15712_v14 }
  0x2d   :  { %12814 = vmatmul.mubr.f32.gmra.mrb[2].mxu0 %v15718_v17 }
  0x2e   :  { %12816 = vmatprep.mubr.f32.mxu0 %v15737_v26 }
  0x31   :  { %12817 = vmatmul.mubr.f32.gmra.mrb[4].mxu0 %v15758_v38 }
  0x32   :  { %12823 = vmatprep.mubr.f32.mxu0 %v15724_v19 }
  0x35   :  { %12824 = vmatmul.mubr.f32.vlgmr.msra.gmra.mrb[0].mxu0 %v15729_v23 }
  0x36   :  { %12826 = vmatprep.mubr.f32.mxu0 %v15732_v24  ;;  %14392 = vmatpush3.bf16.msra.mxu0 %v15712_v14 }
  0x37   :  { %14394 = vmatprep.subr.bf16.mxu0 %v14393_v57 }
  0x39   :  { %12827 = vmatmul.mubr.f32.gmra.mrb[2].mxu0 %v15735_v25 }
  0x3a   :  { %12829 = vmatprep.mubr.f32.mxu0 %v15754_v34 }
  0x3d   :  { %12830 = vmatmul.mubr.f32.gmra.mrb[4].mxu0 %v15772_v46 }
  0x3e   :  { %12836 = vmatprep.mubr.f32.mxu0 %v15741_v27 }
  0x41   :  { %12837 = vmatmul.mubr.f32.vlgmr.msra.gmra.mrb[0].mxu0 %v15745_v31 }
  0x42   :  { %12839 = vmatprep.mubr.f32.mxu0 %v15748_v32  ;;  %14396 = vmatpush3.bf16.msra.mxu0 %v14393_v57 }
  0x43   :  { %14398 = vmatprep.subr.bf16.mxu0 %v15712_v14 }
  0x45   :  { %12840 = vmatmul.mubr.f32.gmra.mrb[2].mxu0 %v15751_v33 }
  0x46   :  { %12842 = vmatprep.mubr.f32.mxu0 %v15767_v42 }
  0x49   :  { %12843 = vmatmul.mubr.f32.gmra.mrb[4].mxu0 %v15782_v51 }
  0x4a   :  { %12849 = vmatprep.mubr.f32.mxu0 %v15704_v9 }
  0x4d   :  { %12850 = vmatmul.mubr.f32.vlgmr.msra.gmra.mrb[0].mxu0 %v15714_v15 }
  0x4e   :  { %12852 = vmatprep.mubr.f32.mxu0 %v15716_v16  ;;  %14400 = vmatpush3.bf16.msra.mxu0 %v15712_v14  ;;  %v15856_v14 = vand.u32 4294901760, %v15851_v11 }
  0x4f   :  { %14426 = vmatprep.subr.bf16.mxu0 %v15848_v7 }
  0x50   :  { %17246 = vst [vmem:[#allocation13_spill] sm:$0xff] %v15856_v14  ;;  %v919_v21 = vsub.f32 %v15851_v11, %v15856_v14 }
  0x51   :  { %12853 = vmatmul.mubr.f32.gmra.mrb[2].mxu0 %v15718_v17 }
  0x52   :  { %12855 = vmatprep.mubr.f32.mxu0 %v15737_v26  ;;  %v15860_v29 = vand.u32 4294901760, %v919_v21  ;;  %v11841_v21 = vld [vmem:[%s17195_s0 + $0x58] sm:$0xff] }
  0x53   :  { %v845_v40 = vsel %vm80_vm0, %v11841_v21, 0 }
  0x54   :  { %17247 = vst [vmem:[#allocation14_spill] sm:$0xff] %v15860_v29  ;;  %12875 = vmatprep.mubr.f32.mxu1 %v15860_v29 }
  0x55   :  { %12856 = vmatmul.mubr.f32.gmra.mrb[4].mxu0 %v15758_v38 }
  0x56   :  { %12862 = vmatprep.mubr.f32.mxu0 %v15704_v9 }
  0x59   :  { %12863 = vmatmul.mubr.f32.vlgmr.msra.gmra.mrb[0].mxu0 %v15714_v15 }
  0x5a   :  { %12865 = vmatprep.mubr.f32.mxu0 %v15716_v16  ;;  %14428 = vmatpush3.bf16.msra.mxu0 %v15848_v7 }
  0x5d   :  { %12866 = vmatmul.mubr.f32.gmra.mrb[2].mxu0 %v15718_v17 }
  0x5e   :  { %12868 = vmatprep.mubr.f32.mxu0 %v15737_v26 }
  0x61   :  { %12869 = vmatmul.mubr.f32.gmra.mrb[4].mxu0 %v15758_v38 }
  0x62   :  { %12957 = vmatprep.mubr.f32.mxu0 %v15769_v43 }
 0x12c   :  { %v12864_v58 = vpop.f32.mrb[0].mxu0 }
 0x12d   :  { %v765_v59 = vpop.f32.mrb[1].mxu0 }
 0x12e   :  { %799 = vrot.lane.b32.xlu0 %v765_v59, %s15660_s5 }
 0x130   :  { %v12867_v60 = vpop.f32.mrb[2].mxu0 }
 0x131   :  { %v777_v61 = vpop.f32.mrb[3].mxu0 }
 0x132   :  { %801 = vrot.lane.b32.xlu0 %v12864_v58, %s15660_s5  ;;  %v15881_v58 = vstv %s54_s13 }
 0x133   :  { %17253 = vst [vmem:[#allocation16_spill] sm:$0xff] %v15881_v58 }
 0x134   :  { %v12870_v62 = vpop.f32.mrb[4].mxu0 }
 0x135   :  { %v789_v63 = vpop.f32.mrb[5].mxu0 }
 0x136   :  { %805 = vrot.lane.b32.xlu1 %v789_v63, %s15661_s6  ;;  %v11837_v63 = vld [vmem:[%s17195_s0 + $0x38] sm:$0xff] }
 0x137   :  { %v833_v4 = vsel %vm80_vm0, %v11837_v63, 0 }
 0x138   :  { %v15900_v12 = vand.u32 4294901760, %v833_v4 }
 0x13a   :  { %807 = vrot.lane.b32.xlu1 %v12870_v62, %s15661_s6  ;;  %v15912_v22 = vsub.f32 %v833_v4, %v15900_v12 }
 0x1a0   :  { %v800_v41 = vpop.permute.xlu0 %799 }
 0x1a1   :  { %v803_v45 = vsel %vm15869_vm1, 0.0, %v800_v41 }
 0x1a2   :  { %v811_v52 = vadd.f32 %v803_v45, %v777_v61  ;;  %v11838_v61 = vld [vmem:[%s17195_s0 + $0x40] sm:$0xff]  ;;  %v15922_v45 = vand.u32 4294901760, %v15912_v22 }
 0x1a4   :  { %v802_v49 = vpop.permute.xlu0 %801  ;;  %17254 = vst [vmem:[#allocation17_spill] sm:$0xff] %v15922_v45 }
 0x1a5   :  { %v804_v57 = vsel %vm15869_vm1, 0.0, %v802_v49  ;;  %v15925_v49 = vsub.f32 %v839_v13, %v15914_v28 }
 0x1a6   :  { %v812_v0 = vadd.f32 %v12867_v60, %v804_v57  ;;  %v836_v60 = vsel %vm80_vm0, %v11838_v61, 0  ;;  %v15929_v57 = vand.u32 4294901760, %v845_v40 }
 0x1a7   :  { %v15903_v18 = vand.u32 4294901760, %v836_v60 }
 0x1a8   :  { %v806_v55 = vpop.permute.xlu1 %805  ;;  %v15943_v4 = vsub.f32 %v845_v40, %v15929_v57 }
 0x1a9   :  { %v809_v59 = vsel %vm15875_vm2, 0.0, %v806_v55  ;;  %v15918_v39 = vsub.f32 %v836_v60, %v15903_v18 }
 0x1aa   :  { %v813_v62 = vadd.f32 %v811_v52, %v809_v59  ;;  %v15927_v52 = vand.u32 4294901760, %v842_v37  ;;  %17257 = vst [vmem:[#allocation20_spill] sm:$0xff] %v15943_v4 }
 0x1ab   :  { %v15932_v59 = vand.u32 4294901760, %v15918_v39 }
 0x1ac   :  { %v816_v1 = vadd.f32 %v15881_v58, %v813_v62  ;;  %v808_v2 = vpop.permute.xlu1 %807 }
 0x1ad   :  { %v810_v3 = vsel %vm15875_vm2, 0.0, %v808_v2  ;;  %17255 = vst [vmem:[#allocation18_spill] sm:$0xff] %v15932_v59  ;;  %v15940_v2 = vsub.f32 %v842_v37, %v15927_v52 }
 0x1ae   :  { %15581 = vtanh.f32 %v816_v1  ;;  %v814_v5 = vadd.f32 %v812_v0, %v810_v3  ;;  %v929_v0 = vsub.f32 %v15912_v22, %v15922_v45  ;;  %v15937_v1 = vand.u32 4294901760, %v15925_v49 }
 0x1af   :  { %v15954_v20 = vand.u32 4294901760, %v15940_v2 }
 0x1b0   :  { %v817_v10 = vadd.f32 %v15881_v58, %v814_v5  ;;  %17256 = vst [vmem:[#allocation19_spill] sm:$0xff] %v15937_v1  ;;  %v939_v5 = vsub.f32 %v15918_v39, %v15932_v59  ;;  %v949_v13 = vsub.f32 %v15925_v49, %v15937_v1 }
 0x1b1   :  { %17258 = vst [vmem:[#allocation21_spill] sm:$0xff] %v15954_v20 }
 0x1b2   :  { %15583 = vtanh.f32 %v817_v10  ;;  %v15949_v10 = vand.u32 4294901760, %v929_v0 }
 0x1b8   :  { %v15582_v41 = vpop.eup %15581 }
 0x1b9   :  { %v848_v55 = vand.u32 4294901760, %v15582_v41 }
 0x1bb   :  { %v978_v62 = vsub.f32 %v15582_v41, %v848_v55  ;;  %v15959_v41 = vand.u32 4294901760, %v15943_v4 }
 0x1bc   :  { %v15584_v63 = vpop.eup %15583 }
 0x1bd   :  { %v851_v61 = vand.u32 4294901760, %v15584_v63  ;;  %v979_v3 = vand.u32 4294901760, %v978_v62  ;;  %17259 = vst [vmem:[#allocation22_spill] sm:$0xff] %v15959_v41 }
 0x1bf   :  { %v15947_v8 = vpack.c.bf16 %v851_v61, %v848_v55  ;;  %v985_v60 = vsub.f32 %v15584_v63, %v851_v61  ;;  %v980_v21 = vsub.f32 %v978_v62, %v979_v3  ;;  %v15963_v55 = vand.u32 4294901760, %v939_v5 }
 0x1c0   :  { %v959_v61 = vsub.f32 %v15940_v2, %v15954_v20  ;;  %v969_v5 = vsub.f32 %v15943_v4, %v15959_v41 }
 0x1c1   :  { %14402 = vmatprep.subr.bf16.mxu1 %v15947_v8  ;;  %14430 = vmatprep.subr.bf16.mxu0 %v15947_v8  ;;  %v986_v37 = vand.u32 4294901760, %v985_v60  ;;  %v14409_v40 = vpack.c.bf16 %v985_v60, %v978_v62  ;;  %v15972_v62 = vand.u32 4294901760, %v949_v13  ;;  %v981_v58 = vand.u32 4294901760, %v980_v21 }
 0x1c2   :  { %14404 = vmatpush3.bf16.msra.mxu1 %v15947_v8  ;;  %14432 = vmatpush3.bf16.msra.mxu0 %v15947_v8 }
 0x1c3   :  { %14434 = vmatprep.subr.bf16.mxu0 %v15862_v30  ;;  %v987_v63 = vsub.f32 %v985_v60, %v986_v37  ;;  %v15966_v0 = vpack.c.bf16 %v986_v37, %v979_v3  ;;  %v15979_v60 = vand.u32 4294901760, %v959_v61  ;;  %v15982_v37 = vand.u32 4294901760, %v969_v5  ;;  %v11845_v61 = vld [vmem:[%s17197_s2 + $0x20] sm:$0xff]  ;;  %v11846_v5 = vld [vmem:[%s17197_s2 + $0x28] sm:$0xff] }
 0x1c5   :  { %12876 = vmatmul.mubr.f32.vlgmr.msra.gmra.mrb[0].mxu1 %v15949_v10  ;;  %12958 = vmatmul.mubr.f32.vlgmr.msra.gmra.mrb[6].mxu0 %v15774_v47  ;;  %v988_v50 = vand.u32 4294901760, %v987_v63 }
 0x1c6   :  { %14436 = vmatpush3.bf16.msra.mxu0 %v15862_v30  ;;  %12878 = vmatprep.mubr.f32.mxu1 %v15963_v55 }
 0x1c7   :  { %12960 = vmatprep.mubr.f32.mxu0 %v15776_v48  ;;  %v14405_v3 = vpack.c.bf16 %v988_v50, %v981_v58 }
 0x1c9   :  { %12879 = vmatmul.mubr.f32.gmra.mrb[2].mxu1 %v15972_v62  ;;  %14406 = vmatprep.subr.bf16.mxu1 %v14405_v3 }
 0x1ca   :  { %12961 = vmatmul.mubr.f32.gmra.mrb[8].mxu0 %v15785_v53  ;;  %14438 = vmatprep.subr.bf16.mxu0 %v14405_v3 }
 0x1cb   :  { %14408 = vmatpush3.bf16.msra.mxu1 %v14405_v3  ;;  %14440 = vmatpush3.bf16.msra.mxu0 %v14405_v3  ;;  %v3051_v3 = vand.u32 4294901760, %v11845_v61 }
 0x1cc   :  { %14410 = vmatprep.subr.bf16.mxu1 %v14409_v40  ;;  %12881 = vmatprep.mubr.f32.mxu1 %v15979_v60 }
 0x1cd   :  { %12963 = vmatprep.mubr.f32.mxu0 %v15788_v54  ;;  %12882 = vmatmul.mubr.f32.gmra.mrb[4].mxu1 %v15982_v37 }
 0x1ce   :  { %12964 = vmatmul.mubr.f32.gmra.mrb[10].mxu0 %v15793_v56  ;;  %12888 = vmatprep.mubr.f32.mxu1 %v15846_v6 }
 0x1cf   :  { %12974 = vmatprep.mubr.f32.mxu0 %v15704_v9  ;;  %14442 = vmatprep.subr.bf16.mxu0 %v15865_v35 }
 0x1d1   :  { %12889 = vmatmul.mubr.f32.vlgmr.msra.gmra.mrb[0].mxu1 %v15900_v12 }
 0x1d2   :  { %14412 = vmatpush3.bf16.msra.mxu1 %v14409_v40  ;;  %12975 = vmatmul.mubr.f32.vlgmr.msra.gmra.mrb[6].mxu0 %v15714_v15 }
 0x1d3   :  { %14444 = vmatpush3.bf16.msra.mxu0 %v15865_v35  ;;  %14414 = vmatprep.subr.bf16.mxu1 %v15947_v8 }
 0x1d4   :  { %14446 = vmatprep.subr.bf16.mxu0 %v14409_v40  ;;  %12891 = vmatprep.mubr.f32.mxu1 %v15903_v18 }
 0x1d5   :  { %12977 = vmatprep.mubr.f32.mxu0 %v15716_v16  ;;  %12892 = vmatmul.mubr.f32.gmra.mrb[2].mxu1 %v15914_v28 }
 0x1d6   :  { %12978 = vmatmul.mubr.f32.gmra.mrb[8].mxu0 %v15718_v17  ;;  %12894 = vmatprep.mubr.f32.mxu1 %v15927_v52 }
 0x1d7   :  { %14448 = vmatpush3.bf16.msra.mxu0 %v14409_v40  ;;  %12980 = vmatprep.mubr.f32.mxu0 %v15737_v26 }
 0x1d8   :  { %14450 = vmatprep.subr.bf16.mxu0 %v15848_v7 }
 0x1d9   :  { %12895 = vmatmul.mubr.f32.gmra.mrb[4].mxu1 %v15929_v57 }
 0x1da   :  { %12981 = vmatmul.mubr.f32.gmra.mrb[10].mxu0 %v15758_v38  ;;  %12901 = vmatprep.mubr.f32.mxu1 %v15851_v11 }
 0x1db   :  { %12991 = vmatprep.mubr.f32.mxu0 %v15724_v19 }
 0x1dd   :  { %12902 = vmatmul.mubr.f32.vlgmr.msra.gmra.mrb[0].mxu1 %v15912_v22 }
 0x1de   :  { %14416 = vmatpush3.bf16.msra.mxu1 %v15947_v8  ;;  %12992 = vmatmul.mubr.f32.vlgmr.msra.gmra.mrb[6].mxu0 %v15729_v23 }
 0x1df   :  { %14452 = vmatpush3.bf16.msra.mxu0 %v15848_v7  ;;  %14418 = vmatprep.subr.bf16.mxu1 %v15966_v0 }
 0x1e0   :  { %14454 = vmatprep.subr.bf16.mxu0 %v15947_v8  ;;  %12904 = vmatprep.mubr.f32.mxu1 %v15918_v39 }
 0x1e1   :  { %12994 = vmatprep.mubr.f32.mxu0 %v15732_v24  ;;  %12905 = vmatmul.mubr.f32.gmra.mrb[2].mxu1 %v15925_v49 }
 0x1e2   :  { %12995 = vmatmul.mubr.f32.gmra.mrb[8].mxu0 %v15735_v25  ;;  %12907 = vmatprep.mubr.f32.mxu1 %v15940_v2 }
 0x1e3   :  { %14456 = vmatpush3.bf16.msra.mxu0 %v15947_v8  ;;  %12997 = vmatprep.mubr.f32.mxu0 %v15754_v34 }
 0x1e4   :  { %14458 = vmatprep.subr.bf16.mxu0 %v15867_v36 }
 0x1e5   :  { %12908 = vmatmul.mubr.f32.gmra.mrb[4].mxu1 %v15943_v4 }
 0x1e6   :  { %12998 = vmatmul.mubr.f32.gmra.mrb[10].mxu0 %v15772_v46  ;;  %12914 = vmatprep.mubr.f32.mxu1 %v15856_v14 }
 0x1e7   :  { %13008 = vmatprep.mubr.f32.mxu0 %v15741_v27 }
 0x1e9   :  { %12915 = vmatmul.mubr.f32.vlgmr.msra.gmra.mrb[0].mxu1 %v15922_v45 }
 0x1ea   :  { %14420 = vmatpush3.bf16.msra.mxu1 %v15966_v0  ;;  %13009 = vmatmul.mubr.f32.vlgmr.msra.gmra.mrb[6].mxu0 %v15745_v31 }
 0x1eb   :  { %14460 = vmatpush3.bf16.msra.mxu0 %v15867_v36  ;;  %14422 = vmatprep.subr.bf16.mxu1 %v15947_v8 }
 0x1ec   :  { %14462 = vmatprep.subr.bf16.mxu0 %v15966_v0  ;;  %12917 = vmatprep.mubr.f32.mxu1 %v15932_v59 }
 0x1ed   :  { %13011 = vmatprep.mubr.f32.mxu0 %v15748_v32  ;;  %12918 = vmatmul.mubr.f32.gmra.mrb[2].mxu1 %v15937_v1 }
 0x1ee   :  { %13012 = vmatmul.mubr.f32.gmra.mrb[8].mxu0 %v15751_v33  ;;  %12920 = vmatprep.mubr.f32.mxu1 %v15954_v20 }
 0x1ef   :  { %14464 = vmatpush3.bf16.msra.mxu0 %v15966_v0  ;;  %13014 = vmatprep.mubr.f32.mxu0 %v15767_v42 }
 0x1f0   :  { %14466 = vmatprep.subr.bf16.mxu0 %v15848_v7 }
 0x1f1   :  { %12921 = vmatmul.mubr.f32.gmra.mrb[4].mxu1 %v15959_v41 }
 0x1f2   :  { %13015 = vmatmul.mubr.f32.gmra.mrb[10].mxu0 %v15782_v51  ;;  %12927 = vmatprep.mubr.f32.mxu1 %v15846_v6 }
 0x1f3   :  { %13025 = vmatprep.mubr.f32.mxu0 %v15704_v9 }
 0x1f5   :  { %12928 = vmatmul.mubr.f32.vlgmr.msra.gmra.mrb[0].mxu1 %v15900_v12 }
 0x1f6   :  { %14424 = vmatpush3.bf16.msra.mxu1 %v15947_v8  ;;  %13026 = vmatmul.mubr.f32.vlgmr.msra.gmra.mrb[6].mxu0 %v15714_v15 }
 0x1f7   :  { %14468 = vmatpush3.bf16.msra.mxu0 %v15848_v7  ;;  %12930 = vmatprep.mubr.f32.mxu1 %v15903_v18 }
 0x1f8   :  { %14470 = vmatprep.subr.bf16.mxu0 %v15947_v8  ;;  %13028 = vmatprep.mubr.f32.mxu0 %v15716_v16 }
 0x1f9   :  { %12931 = vmatmul.mubr.f32.gmra.mrb[2].mxu1 %v15914_v28 }
 0x1fa   :  { %13029 = vmatmul.mubr.f32.gmra.mrb[8].mxu0 %v15718_v17  ;;  %12933 = vmatprep.mubr.f32.mxu1 %v15927_v52 }
 0x1fb   :  { %14472 = vmatpush3.bf16.msra.mxu0 %v15947_v8  ;;  %13031 = vmatprep.mubr.f32.mxu0 %v15737_v26 }
 0x1fd   :  { %12934 = vmatmul.mubr.f32.gmra.mrb[4].mxu1 %v15929_v57 }
 0x1fe   :  { %13032 = vmatmul.mubr.f32.gmra.mrb[10].mxu0 %v15758_v38  ;;  %12940 = vmatprep.mubr.f32.mxu1 %v15846_v6 }
 0x1ff   :  { %13042 = vmatprep.mubr.f32.mxu0 %v15704_v9 }
 0x201   :  { %12941 = vmatmul.mubr.f32.vlgmr.msra.gmra.mrb[0].mxu1 %v15900_v12 }
 0x202   :  { %13043 = vmatmul.mubr.f32.vlgmr.msra.gmra.mrb[6].mxu0 %v15714_v15  ;;  %12943 = vmatprep.mubr.f32.mxu1 %v15903_v18 }
 0x203   :  { %13045 = vmatprep.mubr.f32.mxu0 %v15716_v16 }
 0x205   :  { %12944 = vmatmul.mubr.f32.gmra.mrb[2].mxu1 %v15914_v28 }
 0x206   :  { %13046 = vmatmul.mubr.f32.gmra.mrb[8].mxu0 %v15718_v17  ;;  %12946 = vmatprep.mubr.f32.mxu1 %v15927_v52 }
 0x207   :  { %13048 = vmatprep.mubr.f32.mxu0 %v15737_v26 }
 0x209   :  { %12947 = vmatmul.mubr.f32.gmra.mrb[4].mxu1 %v15929_v57 }
 0x20a   :  { %13049 = vmatmul.mubr.f32.gmra.mrb[10].mxu0 %v15758_v38  ;;  %13059 = vmatprep.mubr.f32.mxu1 %v15860_v29 }
 0x20b   :  { %13161 = vmatprep.mubr.f32.mxu0 %v15769_v43 }
 0x2d4   :  { %v12942_v7 = vpop.f32.mrb[0].mxu1 }
 0x2d5   :  { %v13044_v30 = vpop.f32.mrb[6].mxu0  ;;  %v1513_v35 = vpop.f32.mrb[1].mxu1 }
 0x2d6   :  { %2287 = vrot.lane.b32.xlu1 %v13044_v30, %s15660_s5  ;;  %v2251_v36 = vpop.f32.mrb[7].mxu0 }
 0x2d7   :  { %2285 = vrot.lane.b32.xlu0 %v2251_v36, %s15660_s5 }
 0x2d8   :  { %v12945_v50 = vpop.f32.mrb[2].mxu1 }
 0x2d9   :  { %v13047_v58 = vpop.f32.mrb[8].mxu0  ;;  %v1525_v8 = vpop.f32.mrb[3].mxu1 }
 0x2da   :  { %v2263_v13 = vpop.f32.mrb[9].mxu0  ;;  %1549 = vrot.lane.b32.xlu1 %v12942_v7, %s15660_s5  ;;  %v3054_v7 = vand.u32 4294901760, %v11846_v5 }
 0x2db   :  { %1547 = vrot.lane.b32.xlu0 %v1513_v35, %s15660_s5  ;;  %v3181_v35 = vsub.f32 %v11845_v61, %v3051_v3 }
 0x2dc   :  { %v12948_v21 = vpop.f32.mrb[4].mxu1  ;;  %v16083_v30 = vpack.c.bf16 %v3054_v7, %v3051_v3  ;;  %v3188_v36 = vsub.f32 %v11846_v5, %v3054_v7 }
 0x2dd   :  { %v13050_v40 = vpop.f32.mrb[10].mxu0  ;;  %v1537_v63 = vpop.f32.mrb[5].mxu1 }
 0x2de   :  { %v2275_v0 = vpop.f32.mrb[11].mxu0  ;;  %2293 = vrot.lane.b32.xlu1 %v13050_v40, %s15661_s6  ;;  %14522 = vmatprep.subr.bf16.mxu0 %v16083_v30  ;;  %v3182_v40 = vand.u32 4294901760, %v3181_v35  ;;  %v3189_v29 = vand.u32 4294901760, %v3188_v36  ;;  %v16091_v1 = vpack.c.bf16 %v3188_v36, %v3181_v35 }
 0x2df   :  { %2291 = vrot.lane.b32.xlu0 %v2275_v0, %s15661_s6  ;;  %14524 = vmatpush3.bf16.msra.mxu0 %v16083_v30 }
 0x2e0   :  { %v3183_v43 = vsub.f32 %v3181_v35, %v3182_v40  ;;  %v3190_v41 = vsub.f32 %v3188_v36, %v3189_v29  ;;  %v16093_v61 = vpack.c.bf16 %v3189_v29, %v3182_v40 }
 0x2e2   :  { %1555 = vrot.lane.b32.xlu1 %v12948_v21, %s15661_s6  ;;  %v3184_v20 = vand.u32 4294901760, %v3183_v43  ;;  %v3191_v0 = vand.u32 4294901760, %v3190_v41 }
 0x2e3   :  { %1553 = vrot.lane.b32.xlu0 %v1537_v63, %s15661_s6 }
 0x2e4   :  { %v16089_v51 = vpack.c.bf16 %v3191_v0, %v3184_v20 }
 0x348   :  { %v2288_v5 = vpop.permute.xlu1 %2287 }
 0x349   :  { %v2286_v21 = vpop.permute.xlu0 %2285  ;;  %v2290_v63 = vsel %vm15869_vm1, 0.0, %v2288_v5 }
 0x34a   :  { %v2289_v42 = vsel %vm15869_vm1, 0.0, %v2286_v21  ;;  %v2298_v59 = vadd.f32 %v13047_v58, %v2290_v63  ;;  %v17261_v21 = vld [vmem:[#allocation16_spill] sm:$0xff] }
 0x34b   :  { %v2297_v41 = vadd.f32 %v2289_v42, %v2263_v13 }
 0x34c   :  { %v1550_v3 = vpop.permute.xlu1 %1549 }
 0x34d   :  { %v1548_v7 = vpop.permute.xlu0 %1547  ;;  %v1552_v20 = vsel %vm15869_vm1, 0.0, %v1550_v3  ;;  %v16109_v3 = vstv %s11842_s26 }
 0x34e   :  { %v1551_v40 = vsel %vm15869_vm1, 0.0, %v1548_v7  ;;  %v1560_v45 = vadd.f32 %v12945_v50, %v1552_v20  ;;  %17262 = vst [vmem:[#allocation15_spill] sm:$0xff] %v16109_v3 }
 0x34f   :  { %v1559_v42 = vadd.f32 %v1551_v40, %v1525_v8 }
 0x350   :  { %v2294_v43 = vpop.permute.xlu1 %2293 }
 0x351   :  { %v2296_v29 = vsel %vm15875_vm2, 0.0, %v2294_v43  ;;  %v2292_v36 = vpop.permute.xlu0 %2291 }
 0x352   :  { %v2300_v0 = vadd.f32 %v2298_v59, %v2296_v29  ;;  %v2295_v5 = vsel %vm15875_vm2, 0.0, %v2292_v36 }
 0x353   :  { %v2299_v33 = vadd.f32 %v2297_v41, %v2295_v5 }
 0x354   :  { %v2302_v58 = vadd.f32 %v2300_v0, %v17261_v21  ;;  %v1556_v63 = vpop.permute.xlu1 %1555 }
 0x355   :  { %v2301_v13 = vadd.f32 %v2299_v33, %v17261_v21  ;;  %v1558_v43 = vsel %vm15875_vm2, 0.0, %v1556_v63  ;;  %v1554_v32 = vpop.permute.xlu0 %1553 }
 0x356   :  { %15585 = vtanh.f32 %v2302_v58  ;;  %v1562_v7 = vadd.f32 %v1560_v45, %v1558_v43  ;;  %v1557_v59 = vsel %vm15875_vm2, 0.0, %v1554_v32 }
 0x357   :  { %15587 = vtanh.f32 %v2301_v13  ;;  %v1561_v41 = vadd.f32 %v1559_v42, %v1557_v59 }
 0x358   :  { %v1565_v50 = vadd.f32 %v16109_v3, %v1562_v7 }
 0x359   :  { %v1564_v20 = vadd.f32 %v16109_v3, %v1561_v41 }
 0x35a   :  { %15589 = vtanh.f32 %v1565_v50 }
 0x35b   :  { %15591 = vtanh.f32 %v1564_v20 }
 0x360   :  { %v15586_v33 = vpop.eup %15585 }
 0x361   :  { %v15588_v8 = vpop.eup %15587  ;;  %v2317_v29 = vand.u32 4294901760, %v15586_v33 }
 0x362   :  { %v2314_v36 = vand.u32 4294901760, %v15588_v8 }
 0x363   :  { %v2451_v40 = vsub.f32 %v15586_v33, %v2317_v29 }
 0x364   :  { %v16117_v0 = vpop.eup %15589  ;;  %v16119_v5 = vpack.c.bf16 %v2317_v29, %v2314_v36  ;;  %v2444_v45 = vsub.f32 %v15588_v8, %v2314_v36 }
 0x365   :  { %v16121_v58 = vpop.eup %15591  ;;  %v2323_v32 = vand.u32 4294901760, %v16117_v0  ;;  %v2452_v63 = vand.u32 4294901760, %v2451_v40 }
 0x366   :  { %17263 = vst [vmem:[#allocation16_spill] sm:$0xff] %v16121_v58  ;;  %14474 = vmatprep.subr.bf16.mxu1 %v16119_v5  ;;  %14526 = vmatprep.subr.bf16.mxu0 %v16119_v5  ;;  %v2320_v42 = vand.u32 4294901760, %v16121_v58  ;;  %v2445_v13 = vand.u32 4294901760, %v2444_v45  ;;  %v14489_v43 = vpack.c.bf16 %v2451_v40, %v2444_v45 }
 0x367   :  { %14476 = vmatpush3.bf16.msra.mxu1 %v16119_v5  ;;  %14528 = vmatpush3.bf16.msra.mxu0 %v16119_v5  ;;  %v2453_v7 = vsub.f32 %v2451_v40, %v2452_v63  ;;  %v2465_v59 = vsub.f32 %v16117_v0, %v2323_v32 }
 0x368   :  { %v16130_v41 = vpack.c.bf16 %v2323_v32, %v2320_v42  ;;  %14530 = vmatprep.subr.bf16.mxu0 %v16089_v51  ;;  %v2446_v50 = vsub.f32 %v2444_v45, %v2445_v13  ;;  %v2458_v20 = vsub.f32 %v16121_v58, %v2320_v42  ;;  %v16134_v33 = vpack.c.bf16 %v2452_v63, %v2445_v13 }
 0x369   :  { %v2454_v8 = vand.u32 4294901760, %v2453_v7  ;;  %v2466_v29 = vand.u32 4294901760, %v2465_v59 }
 0x36a   :  { %14478 = vmatprep.subr.bf16.mxu1 %v16130_v41  ;;  %13162 = vmatmul.mubr.f32.vlgmr.msra.gmra.mrb[12].mxu0 %v15774_v47  ;;  %v2447_v36 = vand.u32 4294901760, %v2446_v50  ;;  %v2459_v3 = vand.u32 4294901760, %v2458_v20  ;;  %v14493_v40 = vpack.c.bf16 %v2465_v59, %v2458_v20 }
 0x36b   :  { %14480 = vmatpush3.bf16.msra.mxu1 %v16130_v41  ;;  %14532 = vmatpush3.bf16.msra.mxu0 %v16089_v51  ;;  %v2467_v32 = vsub.f32 %v2465_v59, %v2466_v29  ;;  %v17264_v51 = vld [vmem:[#allocation8_spill] sm:$0xff]  ;;  %v17268_v59 = vld [vmem:[#allocation10_spill] sm:$0xff] }
 0x36c   :  { %13164 = vmatprep.mubr.f32.mxu0 %v15776_v48  ;;  %v14481_v45 = vpack.c.bf16 %v2454_v8, %v2447_v36  ;;  %v2460_v42 = vsub.f32 %v2458_v20, %v2459_v3  ;;  %v16141_v63 = vpack.c.bf16 %v2466_v29, %v2459_v3  ;;  %v17266_v3 = vld [vmem:[#allocation9_spill] sm:$0xff]  ;;  %v17269_v20 = vld [vmem:[#allocation19_spill] sm:$0xff] }
 0x36d   :  { %v2468_v13 = vand.u32 4294901760, %v2467_v32  ;;  %v17271_v8 = vld [vmem:[#allocation21_spill] sm:$0xff] }
 0x36e   :  { %13060 = vmatmul.mubr.f32.vlgmr.msra.gmra.mrb[6].mxu1 %v15949_v10  ;;  %14482 = vmatprep.subr.bf16.mxu1 %v14481_v45  ;;  %v2461_v7 = vand.u32 4294901760, %v2460_v42 }
 0x36f   :  { %13165 = vmatmul.mubr.f32.gmra.mrb[14].mxu0 %v15785_v53  ;;  %14534 = vmatprep.subr.bf16.mxu0 %v14481_v45 }
 0x370   :  { %14484 = vmatpush3.bf16.msra.mxu1 %v14481_v45  ;;  %14536 = vmatpush3.bf16.msra.mxu0 %v14481_v45  ;;  %v14485_v50 = vpack.c.bf16 %v2468_v13, %v2461_v7 }
 0x371   :  { %13062 = vmatprep.mubr.f32.mxu1 %v15963_v55  ;;  %13167 = vmatprep.mubr.f32.mxu0 %v15788_v54 }
 0x372   :  { %13063 = vmatmul.mubr.f32.gmra.mrb[8].mxu1 %v15972_v62  ;;  %14486 = vmatprep.subr.bf16.mxu1 %v14485_v50 }
 0x373   :  { %13168 = vmatmul.mubr.f32.gmra.mrb[16].mxu0 %v15793_v56  ;;  %13065 = vmatprep.mubr.f32.mxu1 %v15979_v60 }
 0x374   :  { %14488 = vmatpush3.bf16.msra.mxu1 %v14485_v50  ;;  %13178 = vmatprep.mubr.f32.mxu0 %v15704_v9  ;;  %v11847_v50 = vld [vmem:[%s17197_s2 + $0x30] sm:$0xff] }
 0x375   :  { %14490 = vmatprep.subr.bf16.mxu1 %v14489_v43  ;;  %14538 = vmatprep.subr.bf16.mxu0 %v16091_v1 }
 0x376   :  { %13066 = vmatmul.mubr.f32.gmra.mrb[10].mxu1 %v15982_v37 }
 0x377   :  { %13179 = vmatmul.mubr.f32.vlgmr.msra.gmra.mrb[12].mxu0 %v15714_v15  ;;  %13076 = vmatprep.mubr.f32.mxu1 %v15846_v6 }
 0x378   :  { %14540 = vmatpush3.bf16.msra.mxu0 %v16091_v1  ;;  %13181 = vmatprep.mubr.f32.mxu0 %v15716_v16  ;;  %v17265_v1 = vld [vmem:[#allocation17_spill] sm:$0xff] }
 0x379   :  { %14542 = vmatprep.subr.bf16.mxu0 %v14489_v43 }
 0x37a   :  { %13077 = vmatmul.mubr.f32.vlgmr.msra.gmra.mrb[6].mxu1 %v15900_v12 }
 0x37b   :  { %14492 = vmatpush3.bf16.msra.mxu1 %v14489_v43  ;;  %13182 = vmatmul.mubr.f32.gmra.mrb[14].mxu0 %v15718_v17 }
 0x37c   :  { %14544 = vmatpush3.bf16.msra.mxu0 %v14489_v43  ;;  %14494 = vmatprep.subr.bf16.mxu1 %v14493_v40  ;;  %v17267_v43 = vld [vmem:[#allocation18_spill] sm:$0xff] }
 0x37d   :  { %13079 = vmatprep.mubr.f32.mxu1 %v15903_v18  ;;  %13184 = vmatprep.mubr.f32.mxu0 %v15737_v26 }
 0x37e   :  { %13080 = vmatmul.mubr.f32.gmra.mrb[8].mxu1 %v15914_v28  ;;  %14546 = vmatprep.subr.bf16.mxu0 %v16083_v30 }
 0x37f   :  { %14496 = vmatpush3.bf16.msra.mxu1 %v14493_v40  ;;  %13185 = vmatmul.mubr.f32.gmra.mrb[16].mxu0 %v15758_v38 }
 0x380   :  { %14498 = vmatprep.subr.bf16.mxu1 %v16119_v5  ;;  %13082 = vmatprep.mubr.f32.mxu1 %v15927_v52 }
 0x381   :  { %13195 = vmatprep.mubr.f32.mxu0 %v15724_v19 }
 0x382   :  { %13083 = vmatmul.mubr.f32.gmra.mrb[10].mxu1 %v15929_v57 }
 0x383   :  { %13196 = vmatmul.mubr.f32.vlgmr.msra.gmra.mrb[12].mxu0 %v15729_v23  ;;  %13093 = vmatprep.mubr.f32.mxu1 %v15851_v11 }
 0x384   :  { %14548 = vmatpush3.bf16.msra.mxu0 %v16083_v30  ;;  %13198 = vmatprep.mubr.f32.mxu0 %v15732_v24 }
 0x385   :  { %14550 = vmatprep.subr.bf16.mxu0 %v16119_v5 }
 0x386   :  { %13094 = vmatmul.mubr.f32.vlgmr.msra.gmra.mrb[6].mxu1 %v15912_v22 }
 0x387   :  { %14500 = vmatpush3.bf16.msra.mxu1 %v16119_v5  ;;  %13199 = vmatmul.mubr.f32.gmra.mrb[14].mxu0 %v15735_v25 }
 0x388   :  { %14552 = vmatpush3.bf16.msra.mxu0 %v16119_v5  ;;  %14502 = vmatprep.subr.bf16.mxu1 %v16130_v41 }
 0x389   :  { %13096 = vmatprep.mubr.f32.mxu1 %v15918_v39  ;;  %13201 = vmatprep.mubr.f32.mxu0 %v15754_v34 }
 0x38a   :  { %13097 = vmatmul.mubr.f32.gmra.mrb[8].mxu1 %v15925_v49  ;;  %14554 = vmatprep.subr.bf16.mxu0 %v16093_v61 }
 0x38b   :  { %14504 = vmatpush3.bf16.msra.mxu1 %v16130_v41  ;;  %13202 = vmatmul.mubr.f32.gmra.mrb[16].mxu0 %v15772_v46 }
 0x38c   :  { %14506 = vmatprep.subr.bf16.mxu1 %v16134_v33  ;;  %13099 = vmatprep.mubr.f32.mxu1 %v15940_v2 }
 0x38d   :  { %13212 = vmatprep.mubr.f32.mxu0 %v15741_v27 }
 0x38e   :  { %13100 = vmatmul.mubr.f32.gmra.mrb[10].mxu1 %v15943_v4 }
 0x38f   :  { %13213 = vmatmul.mubr.f32.vlgmr.msra.gmra.mrb[12].mxu0 %v15745_v31  ;;  %13110 = vmatprep.mubr.f32.mxu1 %v15856_v14 }
 0x390   :  { %14556 = vmatpush3.bf16.msra.mxu0 %v16093_v61  ;;  %13215 = vmatprep.mubr.f32.mxu0 %v17264_v51  ;;  %v17270_v61 = vld [vmem:[#allocation12_spill] sm:$0xff] }
 0x391   :  { %14558 = vmatprep.subr.bf16.mxu0 %v16134_v33 }
 0x392   :  { %13111 = vmatmul.mubr.f32.vlgmr.msra.gmra.mrb[6].mxu1 %v17265_v1 }
 0x393   :  { %14508 = vmatpush3.bf16.msra.mxu1 %v16134_v33  ;;  %13216 = vmatmul.mubr.f32.gmra.mrb[14].mxu0 %v17266_v3 }
 0x394   :  { %14560 = vmatpush3.bf16.msra.mxu0 %v16134_v33  ;;  %14510 = vmatprep.subr.bf16.mxu1 %v16141_v63  ;;  %v17272_v33 = vld [vmem:[#allocation22_spill] sm:$0xff] }
 0x395   :  { %13113 = vmatprep.mubr.f32.mxu1 %v17267_v43  ;;  %13218 = vmatprep.mubr.f32.mxu0 %v17268_v59 }
 0x396   :  { %13114 = vmatmul.mubr.f32.gmra.mrb[8].mxu1 %v17269_v20  ;;  %14562 = vmatprep.subr.bf16.mxu0 %v16083_v30 }
 0x397   :  { %14512 = vmatpush3.bf16.msra.mxu1 %v16141_v63  ;;  %13219 = vmatmul.mubr.f32.gmra.mrb[16].mxu0 %v17270_v61 }
 0x398   :  { %14514 = vmatprep.subr.bf16.mxu1 %v16119_v5  ;;  %13116 = vmatprep.mubr.f32.mxu1 %v17271_v8 }
 0x399   :  { %13229 = vmatprep.mubr.f32.mxu0 %v15704_v9 }
 0x39a   :  { %13117 = vmatmul.mubr.f32.gmra.mrb[10].mxu1 %v17272_v33 }
 0x39b   :  { %13230 = vmatmul.mubr.f32.vlgmr.msra.gmra.mrb[12].mxu0 %v15714_v15  ;;  %13127 = vmatprep.mubr.f32.mxu1 %v15846_v6 }
 0x39c   :  { %14564 = vmatpush3.bf16.msra.mxu0 %v16083_v30  ;;  %13232 = vmatprep.mubr.f32.mxu0 %v15716_v16  ;;  %v17273_v30 = vld [vmem:[#allocation11_spill] sm:$0xff] }
 0x39d   :  { %14566 = vmatprep.subr.bf16.mxu0 %v16119_v5 }
 0x39e   :  { %13128 = vmatmul.mubr.f32.vlgmr.msra.gmra.mrb[6].mxu1 %v15900_v12 }
 0x39f   :  { %14516 = vmatpush3.bf16.msra.mxu1 %v16119_v5  ;;  %13233 = vmatmul.mubr.f32.gmra.mrb[14].mxu0 %v15718_v17 }
 0x3a0   :  { %14568 = vmatpush3.bf16.msra.mxu0 %v16119_v5  ;;  %14518 = vmatprep.subr.bf16.mxu1 %v16130_v41  ;;  %v17274_v5 = vld [vmem:[#allocation14_spill] sm:$0xff] }
 0x3a1   :  { %13130 = vmatprep.mubr.f32.mxu1 %v15903_v18  ;;  %13235 = vmatprep.mubr.f32.mxu0 %v15737_v26 }
 0x3a2   :  { %13131 = vmatmul.mubr.f32.gmra.mrb[8].mxu1 %v15914_v28 }
 0x3a3   :  { %14520 = vmatpush3.bf16.msra.mxu1 %v16130_v41  ;;  %13236 = vmatmul.mubr.f32.gmra.mrb[16].mxu0 %v15758_v38 }
 0x3a4   :  { %13133 = vmatprep.mubr.f32.mxu1 %v15927_v52  ;;  %13246 = vmatprep.mubr.f32.mxu0 %v15704_v9 }
 0x3a6   :  { %13134 = vmatmul.mubr.f32.gmra.mrb[10].mxu1 %v15929_v57 }
 0x3a7   :  { %13247 = vmatmul.mubr.f32.vlgmr.msra.gmra.mrb[12].mxu0 %v15714_v15  ;;  %13144 = vmatprep.mubr.f32.mxu1 %v15846_v6 }
 0x3a8   :  { %13249 = vmatprep.mubr.f32.mxu0 %v15716_v16 }
 0x3aa   :  { %13145 = vmatmul.mubr.f32.vlgmr.msra.gmra.mrb[6].mxu1 %v15900_v12 }
 0x3ab   :  { %13250 = vmatmul.mubr.f32.gmra.mrb[14].mxu0 %v15718_v17  ;;  %13147 = vmatprep.mubr.f32.mxu1 %v15903_v18 }
 0x3ac   :  { %13252 = vmatprep.mubr.f32.mxu0 %v15737_v26 }
 0x3ae   :  { %13148 = vmatmul.mubr.f32.gmra.mrb[8].mxu1 %v15914_v28 }
 0x3af   :  { %13253 = vmatmul.mubr.f32.gmra.mrb[16].mxu0 %v15758_v38  ;;  %13150 = vmatprep.mubr.f32.mxu1 %v15927_v52 }
 0x3b0   :  { %13365 = vmatprep.mubr.f32.mxu0 %v17273_v30 }
 0x3b2   :  { %13151 = vmatmul.mubr.f32.gmra.mrb[10].mxu1 %v15929_v57 }
 0x3b3   :  { %13263 = vmatprep.mubr.f32.mxu1 %v17274_v5 }
 0x47a   :  { %v13248_v41 = vpop.f32.mrb[12].mxu0 }
 0x47b   :  { %v3716_v29 = vpop.f32.mrb[13].mxu0  ;;  %3752 = vrot.lane.b32.xlu1 %v13248_v41, %s15660_s5  ;;  %v11848_v41 = vld [vmem:[%s17197_s2 + $0x38] sm:$0xff] }
 0x47c   :  { %3750 = vrot.lane.b32.xlu0 %v3716_v29, %s15660_s5  ;;  %v4516_v29 = vand.u32 4294901760, %v11847_v50 }
 0x47d   :  { %v13146_v36 = vpop.f32.mrb[6].mxu1 }
 0x47e   :  { %v13251_v40 = vpop.f32.mrb[14].mxu0  ;;  %v2979_v32 = vpop.f32.mrb[7].mxu1  ;;  %v4646_v33 = vsub.f32 %v11847_v50, %v4516_v29 }
 0x47f   :  { %v3728_v45 = vpop.f32.mrb[15].mxu0  ;;  %3015 = vrot.lane.b32.xlu1 %v13146_v36, %s15660_s5  ;;  %v4519_v36 = vand.u32 4294901760, %v11848_v41 }
 0x480   :  { %3013 = vrot.lane.b32.xlu0 %v2979_v32, %s15660_s5 }
 0x481   :  { %v13149_v42 = vpop.f32.mrb[8].mxu1  ;;  %v16251_v30 = vpack.c.bf16 %v4519_v36, %v4516_v29  ;;  %v4653_v8 = vsub.f32 %v11848_v41, %v4519_v36 }
 0x482   :  { %v13254_v63 = vpop.f32.mrb[16].mxu0  ;;  %v2991_v13 = vpop.f32.mrb[9].mxu1 }
 0x483   :  { %v3740_v7 = vpop.f32.mrb[17].mxu0  ;;  %3758 = vrot.lane.b32.xlu1 %v13254_v63, %s15661_s6  ;;  %14618 = vmatprep.subr.bf16.mxu0 %v16251_v30  ;;  %v4647_v63 = vand.u32 4294901760, %v4646_v33  ;;  %v4654_v61 = vand.u32 4294901760, %v4653_v8  ;;  %v16259_v1 = vpack.c.bf16 %v4653_v8, %v4646_v33 }
 0x484   :  { %3756 = vrot.lane.b32.xlu0 %v3740_v7, %s15661_s6  ;;  %14620 = vmatpush3.bf16.msra.mxu0 %v16251_v30 }
 0x485   :  { %v13152_v5 = vpop.f32.mrb[10].mxu1  ;;  %v4648_v20 = vsub.f32 %v4646_v33, %v4647_v63  ;;  %v4655_v7 = vsub.f32 %v4653_v8, %v4654_v61  ;;  %v16261_v50 = vpack.c.bf16 %v4654_v61, %v4647_v63 }
 0x486   :  { %v3003_v32 = vpop.f32.mrb[11].mxu1 }
 0x487   :  { %3021 = vrot.lane.b32.xlu1 %v13152_v5, %s15661_s6  ;;  %v4649_v59 = vand.u32 4294901760, %v4648_v20  ;;  %v4656_v43 = vand.u32 4294901760, %v4655_v7 }
 0x488   :  { %3019 = vrot.lane.b32.xlu0 %v3003_v32, %s15661_s6 }
 0x489   :  { %v16257_v3 = vpack.c.bf16 %v4656_v43, %v4649_v59 }
 0x4ed   :  { %v3753_v41 = vpop.permute.xlu1 %3752 }
 0x4ee   :  { %v3751_v5 = vpop.permute.xlu0 %3750  ;;  %v3755_v36 = vsel %vm15869_vm1, 0.0, %v3753_v41 }
 0x4ef   :  { %v3754_v51 = vsel %vm15869_vm1, 0.0, %v3751_v5  ;;  %v3763_v14 = vadd.f32 %v13251_v40, %v3755_v36 }
 0x4f0   :  { %v3762_v20 = vadd.f32 %v3754_v51, %v3728_v45 }
 0x4f1   :  { %v3016_v29 = vpop.permute.xlu1 %3015 }
 0x4f2   :  { %v3014_v32 = vpop.permute.xlu0 %3013  ;;  %v3018_v43 = vsel %vm15869_vm1, 0.0, %v3016_v29 }
 0x4f3   :  { %v3017_v8 = vsel %vm15869_vm1, 0.0, %v3014_v32  ;;  %v3026_v41 = vadd.f32 %v13149_v42, %v3018_v43 }
 0x4f4   :  { %v3025_v51 = vadd.f32 %v3017_v8, %v2991_v13 }
 0x4f5   :  { %v3759_v31 = vpop.permute.xlu1 %3758 }
 0x4f6   :  { %v3761_v59 = vsel %vm15875_vm2, 0.0, %v3759_v31  ;;  %v3757_v61 = vpop.permute.xlu0 %3756 }
 0x4f7   :  { %v3765_v33 = vadd.f32 %v3763_v14, %v3761_v59  ;;  %v3760_v63 = vsel %vm15875_vm2, 0.0, %v3757_v61  ;;  %v17275_v59 = vld [vmem:[#allocation15_spill] sm:$0xff] }
 0x4f8   :  { %v3764_v7 = vadd.f32 %v3762_v20, %v3760_v63 }
 0x4f9   :  { %v3767_v40 = vadd.f32 %v3765_v33, %v17261_v21  ;;  %v3022_v5 = vpop.permute.xlu1 %3021 }
 0x4fa   :  { %v3766_v45 = vadd.f32 %v3764_v7, %v17261_v21  ;;  %v3024_v29 = vsel %vm15875_vm2, 0.0, %v3022_v5  ;;  %v3020_v31 = vpop.permute.xlu0 %3019 }
 0x4fb   :  { %15593 = vtanh.f32 %v3767_v40  ;;  %v3028_v36 = vadd.f32 %v3026_v41, %v3024_v29  ;;  %v3023_v14 = vsel %vm15875_vm2, 0.0, %v3020_v31 }
 0x4fc   :  { %15595 = vtanh.f32 %v3766_v45  ;;  %v3027_v32 = vadd.f32 %v3025_v51, %v3023_v14 }
 0x4fd   :  { %v3030_v20 = vadd.f32 %v3028_v36, %v17275_v59 }
 0x4fe   :  { %v3029_v42 = vadd.f32 %v3027_v32, %v17275_v59 }
 0x4ff   :  { %15597 = vtanh.f32 %v3030_v20 }
 0x500   :  { %15599 = vtanh.f32 %v3029_v42 }
 0x505   :  { %v15594_v13 = vpop.eup %15593 }
 0x506   :  { %v15596_v43 = vpop.eup %15595  ;;  %v3782_v61 = vand.u32 4294901760, %v15594_v13 }
 0x507   :  { %v3779_v8 = vand.u32 4294901760, %v15596_v43 }
 0x508   :  { %v3916_v33 = vsub.f32 %v15594_v13, %v3782_v61 }
 0x509   :  { %v16283_v63 = vpop.eup %15597  ;;  %v16285_v7 = vpack.c.bf16 %v3782_v61, %v3779_v8  ;;  %v3909_v41 = vsub.f32 %v15596_v43, %v3779_v8 }
 0x50a   :  { %v16287_v40 = vpop.eup %15599  ;;  %v3788_v51 = vand.u32 4294901760, %v16283_v63  ;;  %v3917_v45 = vand.u32 4294901760, %v3916_v33 }
 0x50b   :  { %14570 = vmatprep.subr.bf16.mxu1 %v16285_v7  ;;  %14622 = vmatprep.subr.bf16.mxu0 %v16285_v7  ;;  %v3785_v31 = vand.u32 4294901760, %v16287_v40  ;;  %v3910_v36 = vand.u32 4294901760, %v3909_v41  ;;  %v14585_v14 = vpack.c.bf16 %v3916_v33, %v3909_v41 }
 0x50c   :  { %14572 = vmatpush3.bf16.msra.mxu1 %v16285_v7  ;;  %14624 = vmatpush3.bf16.msra.mxu0 %v16285_v7  ;;  %v3918_v32 = vsub.f32 %v3916_v33, %v3917_v45  ;;  %v3930_v20 = vsub.f32 %v16283_v63, %v3788_v51 }
 0x50d   :  { %v16300_v42 = vpack.c.bf16 %v3788_v51, %v3785_v31  ;;  %14626 = vmatprep.subr.bf16.mxu0 %v16257_v3  ;;  %v3911_v13 = vsub.f32 %v3909_v41, %v3910_v36  ;;  %v3923_v43 = vsub.f32 %v16287_v40, %v3785_v31  ;;  %v16304_v61 = vpack.c.bf16 %v3917_v45, %v3910_v36 }
 0x50e   :  { %v3919_v8 = vand.u32 4294901760, %v3918_v32  ;;  %v3931_v29 = vand.u32 4294901760, %v3930_v20 }
 0x50f   :  { %14574 = vmatprep.subr.bf16.mxu1 %v16300_v42  ;;  %13366 = vmatmul.mubr.f32.vlgmr.msra.gmra.mrb[18].mxu0 %v15774_v47  ;;  %v3912_v5 = vand.u32 4294901760, %v3911_v13  ;;  %v3924_v58 = vand.u32 4294901760, %v3923_v43  ;;  %v14589_v33 = vpack.c.bf16 %v3930_v20, %v3923_v43 }
 0x510   :  { %14576 = vmatpush3.bf16.msra.mxu1 %v16300_v42  ;;  %14628 = vmatpush3.bf16.msra.mxu0 %v16257_v3  ;;  %v3932_v51 = vsub.f32 %v3930_v20, %v3931_v29  ;;  %v17278_v3 = vld [vmem:[#allocation8_spill] sm:$0xff]  ;;  %v17282_v20 = vld [vmem:[#allocation10_spill] sm:$0xff] }
 0x511   :  { %13368 = vmatprep.mubr.f32.mxu0 %v15776_v48  ;;  %v14577_v41 = vpack.c.bf16 %v3919_v8, %v3912_v5  ;;  %v3925_v31 = vsub.f32 %v3923_v43, %v3924_v58  ;;  %v16311_v45 = vpack.c.bf16 %v3931_v29, %v3924_v58  ;;  %v17276_v58 = vld [vmem:[#allocation7_spill] sm:$0xff]  ;;  %v17279_v5 = vld [vmem:[#allocation17_spill] sm:$0xff] }
 0x512   :  { %v3933_v36 = vand.u32 4294901760, %v3932_v51  ;;  %v17280_v29 = vld [vmem:[#allocation9_spill] sm:$0xff]  ;;  %v17283_v43 = vld [vmem:[#allocation19_spill] sm:$0xff] }
 0x513   :  { %13264 = vmatmul.mubr.f32.vlgmr.msra.gmra.mrb[12].mxu1 %v15949_v10  ;;  %14578 = vmatprep.subr.bf16.mxu1 %v14577_v41  ;;  %v3926_v32 = vand.u32 4294901760, %v3925_v31  ;;  %v17285_v8 = vld [vmem:[#allocation21_spill] sm:$0xff] }
 0x514   :  { %13369 = vmatmul.mubr.f32.gmra.mrb[20].mxu0 %v15785_v53  ;;  %14630 = vmatprep.subr.bf16.mxu0 %v14577_v41 }
 0x515   :  { %14580 = vmatpush3.bf16.msra.mxu1 %v14577_v41  ;;  %14632 = vmatpush3.bf16.msra.mxu0 %v14577_v41  ;;  %v14581_v13 = vpack.c.bf16 %v3933_v36, %v3926_v32 }
 0x516   :  { %13266 = vmatprep.mubr.f32.mxu1 %v15963_v55  ;;  %13371 = vmatprep.mubr.f32.mxu0 %v15788_v54 }
 0x517   :  { %13267 = vmatmul.mubr.f32.gmra.mrb[14].mxu1 %v15972_v62  ;;  %14582 = vmatprep.subr.bf16.mxu1 %v14581_v13 }
 0x518   :  { %13372 = vmatmul.mubr.f32.gmra.mrb[22].mxu0 %v15793_v56  ;;  %13269 = vmatprep.mubr.f32.mxu1 %v15979_v60 }
 0x519   :  { %14584 = vmatpush3.bf16.msra.mxu1 %v14581_v13  ;;  %13382 = vmatprep.mubr.f32.mxu0 %v15704_v9 }
 0x51a   :  { %14586 = vmatprep.subr.bf16.mxu1 %v14585_v14  ;;  %14634 = vmatprep.subr.bf16.mxu0 %v16259_v1 }
 0x51b   :  { %13270 = vmatmul.mubr.f32.gmra.mrb[16].mxu1 %v15982_v37 }
 0x51c   :  { %13383 = vmatmul.mubr.f32.vlgmr.msra.gmra.mrb[18].mxu0 %v15714_v15  ;;  %13280 = vmatprep.mubr.f32.mxu1 %v15846_v6 }
 0x51d   :  { %14636 = vmatpush3.bf16.msra.mxu0 %v16259_v1  ;;  %13385 = vmatprep.mubr.f32.mxu0 %v15716_v16  ;;  %v17277_v1 = vld [vmem:[#allocation13_spill] sm:$0xff] }
 0x51e   :  { %14638 = vmatprep.subr.bf16.mxu0 %v14585_v14 }
 0x51f   :  { %13281 = vmatmul.mubr.f32.vlgmr.msra.gmra.mrb[12].mxu1 %v15900_v12 }
 0x520   :  { %14588 = vmatpush3.bf16.msra.mxu1 %v14585_v14  ;;  %13386 = vmatmul.mubr.f32.gmra.mrb[20].mxu0 %v15718_v17 }
 0x521   :  { %14640 = vmatpush3.bf16.msra.mxu0 %v14585_v14  ;;  %14590 = vmatprep.subr.bf16.mxu1 %v14589_v33  ;;  %v17281_v14 = vld [vmem:[#allocation18_spill] sm:$0xff] }
 0x522   :  { %13283 = vmatprep.mubr.f32.mxu1 %v15903_v18  ;;  %13388 = vmatprep.mubr.f32.mxu0 %v15737_v26 }
 0x523   :  { %13284 = vmatmul.mubr.f32.gmra.mrb[14].mxu1 %v15914_v28  ;;  %14642 = vmatprep.subr.bf16.mxu0 %v16251_v30 }
 0x524   :  { %14592 = vmatpush3.bf16.msra.mxu1 %v14589_v33  ;;  %13389 = vmatmul.mubr.f32.gmra.mrb[22].mxu0 %v15758_v38 }
 0x525   :  { %14594 = vmatprep.subr.bf16.mxu1 %v16285_v7  ;;  %13286 = vmatprep.mubr.f32.mxu1 %v15927_v52 }
 0x526   :  { %13399 = vmatprep.mubr.f32.mxu0 %v15724_v19 }
 0x527   :  { %13287 = vmatmul.mubr.f32.gmra.mrb[16].mxu1 %v15929_v57 }
 0x528   :  { %13400 = vmatmul.mubr.f32.vlgmr.msra.gmra.mrb[18].mxu0 %v15729_v23  ;;  %13297 = vmatprep.mubr.f32.mxu1 %v15851_v11 }
 0x529   :  { %14644 = vmatpush3.bf16.msra.mxu0 %v16251_v30  ;;  %13402 = vmatprep.mubr.f32.mxu0 %v15732_v24 }
 0x52a   :  { %14646 = vmatprep.subr.bf16.mxu0 %v16285_v7 }
 0x52b   :  { %13298 = vmatmul.mubr.f32.vlgmr.msra.gmra.mrb[12].mxu1 %v15912_v22 }
 0x52c   :  { %14596 = vmatpush3.bf16.msra.mxu1 %v16285_v7  ;;  %13403 = vmatmul.mubr.f32.gmra.mrb[20].mxu0 %v15735_v25 }
 0x52d   :  { %14648 = vmatpush3.bf16.msra.mxu0 %v16285_v7  ;;  %14598 = vmatprep.subr.bf16.mxu1 %v16300_v42 }
 0x52e   :  { %13300 = vmatprep.mubr.f32.mxu1 %v15918_v39  ;;  %13405 = vmatprep.mubr.f32.mxu0 %v15754_v34 }
 0x52f   :  { %13301 = vmatmul.mubr.f32.gmra.mrb[14].mxu1 %v15925_v49  ;;  %14650 = vmatprep.subr.bf16.mxu0 %v16261_v50 }
 0x530   :  { %14600 = vmatpush3.bf16.msra.mxu1 %v16300_v42  ;;  %13406 = vmatmul.mubr.f32.gmra.mrb[22].mxu0 %v15772_v46 }
 0x531   :  { %14602 = vmatprep.subr.bf16.mxu1 %v16304_v61  ;;  %13303 = vmatprep.mubr.f32.mxu1 %v15940_v2 }
 0x532   :  { %13416 = vmatprep.mubr.f32.mxu0 %v15741_v27 }
 0x533   :  { %13304 = vmatmul.mubr.f32.gmra.mrb[16].mxu1 %v15943_v4 }
 0x534   :  { %13417 = vmatmul.mubr.f32.vlgmr.msra.gmra.mrb[18].mxu0 %v17276_v58  ;;  %13314 = vmatprep.mubr.f32.mxu1 %v17277_v1 }
 0x535   :  { %14652 = vmatpush3.bf16.msra.mxu0 %v16261_v50  ;;  %13419 = vmatprep.mubr.f32.mxu0 %v17278_v3  ;;  %v17284_v50 = vld [vmem:[#allocation12_spill] sm:$0xff] }
 0x536   :  { %14654 = vmatprep.subr.bf16.mxu0 %v16304_v61 }
 0x537   :  { %13315 = vmatmul.mubr.f32.vlgmr.msra.gmra.mrb[12].mxu1 %v17279_v5 }
 0x538   :  { %14604 = vmatpush3.bf16.msra.mxu1 %v16304_v61  ;;  %13420 = vmatmul.mubr.f32.gmra.mrb[20].mxu0 %v17280_v29 }
 0x539   :  { %14656 = vmatpush3.bf16.msra.mxu0 %v16304_v61  ;;  %14606 = vmatprep.subr.bf16.mxu1 %v16311_v45  ;;  %v17286_v61 = vld [vmem:[#allocation22_spill] sm:$0xff] }
 0x53a   :  { %13317 = vmatprep.mubr.f32.mxu1 %v17281_v14  ;;  %13422 = vmatprep.mubr.f32.mxu0 %v17282_v20 }
 0x53b   :  { %13318 = vmatmul.mubr.f32.gmra.mrb[14].mxu1 %v17283_v43  ;;  %14658 = vmatprep.subr.bf16.mxu0 %v16251_v30 }
 0x53c   :  { %14608 = vmatpush3.bf16.msra.mxu1 %v16311_v45  ;;  %13423 = vmatmul.mubr.f32.gmra.mrb[22].mxu0 %v17284_v50 }
 0x53d   :  { %14610 = vmatprep.subr.bf16.mxu1 %v16285_v7  ;;  %13320 = vmatprep.mubr.f32.mxu1 %v17285_v8 }
 0x53e   :  { %13433 = vmatprep.mubr.f32.mxu0 %v15704_v9 }
 0x53f   :  { %13321 = vmatmul.mubr.f32.gmra.mrb[16].mxu1 %v17286_v61 }
 0x540   :  { %13434 = vmatmul.mubr.f32.vlgmr.msra.gmra.mrb[18].mxu0 %v15714_v15  ;;  %13331 = vmatprep.mubr.f32.mxu1 %v15846_v6 }
 0x541   :  { %14660 = vmatpush3.bf16.msra.mxu0 %v16251_v30  ;;  %13436 = vmatprep.mubr.f32.mxu0 %v15716_v16  ;;  %v17287_v30 = vld [vmem:[#allocation11_spill] sm:$0xff] }
 0x542   :  { %14662 = vmatprep.subr.bf16.mxu0 %v16285_v7 }
 0x543   :  { %13332 = vmatmul.mubr.f32.vlgmr.msra.gmra.mrb[12].mxu1 %v15900_v12 }
 0x544   :  { %14612 = vmatpush3.bf16.msra.mxu1 %v16285_v7  ;;  %13437 = vmatmul.mubr.f32.gmra.mrb[20].mxu0 %v15718_v17 }
 0x545   :  { %14664 = vmatpush3.bf16.msra.mxu0 %v16285_v7  ;;  %14614 = vmatprep.subr.bf16.mxu1 %v16300_v42  ;;  %v17288_v7 = vld [vmem:[#allocation14_spill] sm:$0xff] }
 0x546   :  { %13334 = vmatprep.mubr.f32.mxu1 %v15903_v18  ;;  %13439 = vmatprep.mubr.f32.mxu0 %v15737_v26 }
 0x547   :  { %13335 = vmatmul.mubr.f32.gmra.mrb[14].mxu1 %v15914_v28 }
 0x548   :  { %14616 = vmatpush3.bf16.msra.mxu1 %v16300_v42  ;;  %13440 = vmatmul.mubr.f32.gmra.mrb[22].mxu0 %v15758_v38 }
 0x549   :  { %13337 = vmatprep.mubr.f32.mxu1 %v15927_v52  ;;  %13450 = vmatprep.mubr.f32.mxu0 %v15704_v9 }
 0x54b   :  { %13338 = vmatmul.mubr.f32.gmra.mrb[16].mxu1 %v15929_v57 }
 0x54c   :  { %13451 = vmatmul.mubr.f32.vlgmr.msra.gmra.mrb[18].mxu0 %v15714_v15  ;;  %13348 = vmatprep.mubr.f32.mxu1 %v15846_v6 }
 0x54d   :  { %13453 = vmatprep.mubr.f32.mxu0 %v15716_v16 }
 0x54f   :  { %13349 = vmatmul.mubr.f32.vlgmr.msra.gmra.mrb[12].mxu1 %v15900_v12 }
 0x550   :  { %13454 = vmatmul.mubr.f32.gmra.mrb[20].mxu0 %v15718_v17  ;;  %13351 = vmatprep.mubr.f32.mxu1 %v15903_v18 }
 0x551   :  { %13456 = vmatprep.mubr.f32.mxu0 %v15737_v26 }
 0x553   :  { %13352 = vmatmul.mubr.f32.gmra.mrb[14].mxu1 %v15914_v28 }
 0x554   :  { %13457 = vmatmul.mubr.f32.gmra.mrb[22].mxu0 %v15758_v38  ;;  %13354 = vmatprep.mubr.f32.mxu1 %v15927_v52 }
 0x555   :  { %13569 = vmatprep.mubr.f32.mxu0 %v17287_v30 }
 0x557   :  { %13355 = vmatmul.mubr.f32.gmra.mrb[16].mxu1 %v15929_v57 }
 0x558   :  { %13467 = vmatprep.mubr.f32.mxu1 %v17288_v7 }
 0x61f   :  { %v13452_v42 = vpop.f32.mrb[18].mxu0 }
 0x620   :  { %5217 = vrot.lane.b32.xlu1 %v13452_v42, %s15660_s5  ;;  %v5181_v33 = vpop.f32.mrb[19].mxu0  ;;  %v11849_v42 = vld [vmem:[%s17197_s2 + $0x40] sm:$0xff] }
 0x621   :  { %5215 = vrot.lane.b32.xlu0 %v5181_v33, %s15660_s5  ;;  %v11850_v33 = vld [vmem:[%s17197_s2 + $0x48] sm:$0xff]  ;;  %v5981_v7 = vand.u32 4294901760, %v11849_v42 }
 0x622   :  { %v13350_v51 = vpop.f32.mrb[12].mxu1 }
 0x623   :  { %v13455_v41 = vpop.f32.mrb[20].mxu0  ;;  %v4444_v31 = vpop.f32.mrb[13].mxu1  ;;  %v6111_v50 = vsub.f32 %v11849_v42, %v5981_v7 }
 0x624   :  { %v5193_v45 = vpop.f32.mrb[21].mxu0  ;;  %4480 = vrot.lane.b32.xlu1 %v13350_v51, %s15660_s5  ;;  %v5984_v51 = vand.u32 4294901760, %v11850_v33 }
 0x625   :  { %4478 = vrot.lane.b32.xlu0 %v4444_v31, %s15660_s5 }
 0x626   :  { %v13353_v36 = vpop.f32.mrb[14].mxu1  ;;  %v16421_v8 = vpack.c.bf16 %v5984_v51, %v5981_v7  ;;  %v6118_v43 = vsub.f32 %v11850_v33, %v5984_v51 }
 0x627   :  { %v13458_v32 = vpop.f32.mrb[22].mxu0  ;;  %v4456_v13 = vpop.f32.mrb[15].mxu1 }
 0x628   :  { %v5205_v30 = vpop.f32.mrb[23].mxu0  ;;  %5223 = vrot.lane.b32.xlu1 %v13458_v32, %s15661_s6  ;;  %14714 = vmatprep.subr.bf16.mxu0 %v16421_v8  ;;  %v6112_v32 = vand.u32 4294901760, %v6111_v50  ;;  %v6119_v20 = vand.u32 4294901760, %v6118_v43  ;;  %v16429_v1 = vpack.c.bf16 %v6118_v43, %v6111_v50 }
 0x629   :  { %5221 = vrot.lane.b32.xlu0 %v5205_v30, %s15661_s6  ;;  %14716 = vmatpush3.bf16.msra.mxu0 %v16421_v8 }
 0x62a   :  { %v13356_v61 = vpop.f32.mrb[16].mxu1  ;;  %v6113_v14 = vsub.f32 %v6111_v50, %v6112_v32  ;;  %v6120_v30 = vsub.f32 %v6118_v43, %v6119_v20  ;;  %v16431_v7 = vpack.c.bf16 %v6119_v20, %v6112_v32 }
 0x62b   :  { %v4468_v31 = vpop.f32.mrb[17].mxu1 }
 0x62c   :  { %4486 = vrot.lane.b32.xlu1 %v13356_v61, %s15661_s6  ;;  %v6114_v29 = vand.u32 4294901760, %v6113_v14  ;;  %v6121_v5 = vand.u32 4294901760, %v6120_v30 }
 0x62d   :  { %4484 = vrot.lane.b32.xlu0 %v4468_v31, %s15661_s6 }
 0x62e   :  { %v16427_v3 = vpack.c.bf16 %v6121_v5, %v6114_v29 }
 0x692   :  { %v5218_v42 = vpop.permute.xlu1 %5217 }
 0x693   :  { %v5216_v61 = vpop.permute.xlu0 %5215  ;;  %v5220_v51 = vsel %vm15869_vm1, 0.0, %v5218_v42 }
 0x694   :  { %v5219_v58 = vsel %vm15869_vm1, 0.0, %v5216_v61  ;;  %v5228_v4 = vadd.f32 %v13455_v41, %v5220_v51 }
 0x695   :  { %v5227_v14 = vadd.f32 %v5219_v58, %v5193_v45 }
 0x696   :  { %v4481_v33 = vpop.permute.xlu1 %4480 }
 0x697   :  { %v4479_v31 = vpop.permute.xlu0 %4478  ;;  %v4483_v5 = vsel %vm15869_vm1, 0.0, %v4481_v33 }
 0x698   :  { %v4482_v43 = vsel %vm15869_vm1, 0.0, %v4479_v31  ;;  %v4491_v42 = vadd.f32 %v13353_v36, %v4483_v5 }
 0x699   :  { %v4490_v58 = vadd.f32 %v4482_v43, %v4456_v13 }
 0x69a   :  { %v5224_v27 = vpop.permute.xlu1 %5223 }
 0x69b   :  { %v5226_v29 = vsel %vm15875_vm2, 0.0, %v5224_v27  ;;  %v5222_v20 = vpop.permute.xlu0 %5221 }
 0x69c   :  { %v5230_v50 = vadd.f32 %v5228_v4, %v5226_v29  ;;  %v5225_v32 = vsel %vm15875_vm2, 0.0, %v5222_v20 }
 0x69d   :  { %v5229_v30 = vadd.f32 %v5227_v14, %v5225_v32 }
 0x69e   :  { %v5232_v41 = vadd.f32 %v5230_v50, %v17261_v21  ;;  %v4487_v61 = vpop.permute.xlu1 %4486 }
 0x69f   :  { %v5231_v45 = vadd.f32 %v5229_v30, %v17261_v21  ;;  %v4489_v33 = vsel %vm15875_vm2, 0.0, %v4487_v61  ;;  %v4485_v27 = vpop.permute.xlu0 %4484 }
 0x6a0   :  { %15601 = vtanh.f32 %v5232_v41  ;;  %v4493_v51 = vadd.f32 %v4491_v42, %v4489_v33  ;;  %v4488_v4 = vsel %vm15875_vm2, 0.0, %v4485_v27  ;;  %v17289_v41 = vmax.f32 %v16117_v0, %v16283_v63  ;;  %v17290_v33 = vld [vmem:[#allocation16_spill] sm:$0xff] }
 0x6a1   :  { %15603 = vtanh.f32 %v5231_v45  ;;  %v4492_v31 = vadd.f32 %v4490_v58, %v4488_v4  ;;  %v17291_v27 = vmax.f32 %v17290_v33, %v16287_v40 }
 0x6a2   :  { %v4495_v14 = vadd.f32 %v4493_v51, %v17275_v59 }
 0x6a3   :  { %v4494_v36 = vadd.f32 %v4492_v31, %v17275_v59 }
 0x6a4   :  { %15605 = vtanh.f32 %v4495_v14 }
 0x6a5   :  { %15607 = vtanh.f32 %v4494_v36 }
 0x6aa   :  { %v15602_v13 = vpop.eup %15601 }
 0x6ab   :  { %v15604_v5 = vpop.eup %15603  ;;  %v5247_v29 = vand.u32 4294901760, %v15602_v13 }
 0x6ac   :  { %v5244_v20 = vand.u32 4294901760, %v15604_v5 }
 0x6ad   :  { %v5381_v43 = vsub.f32 %v15602_v13, %v5247_v29 }
 0x6ae   :  { %v15606_v50 = vpop.eup %15605  ;;  %v16453_v32 = vpack.c.bf16 %v5247_v29, %v5244_v20  ;;  %v5374_v30 = vsub.f32 %v15604_v5, %v5244_v20 }
 0x6af   :  { %v15608_v42 = vpop.eup %15607  ;;  %v16458_v61 = vmax.f32 %v17289_v41, %v15606_v50  ;;  %v5253_v58 = vand.u32 4294901760, %v15606_v50  ;;  %v5382_v45 = vand.u32 4294901760, %v5381_v43 }
 0x6b0   :  { %v16463_v51 = vmax.f32 %v17291_v27, %v15608_v42  ;;  %14666 = vmatprep.subr.bf16.mxu1 %v16453_v32  ;;  %14718 = vmatprep.subr.bf16.mxu0 %v16453_v32  ;;  %v5250_v4 = vand.u32 4294901760, %v15608_v42  ;;  %v5375_v31 = vand.u32 4294901760, %v5374_v30  ;;  %v14681_v14 = vpack.c.bf16 %v5381_v43, %v5374_v30 }
 0x6b1   :  { %14668 = vmatpush3.bf16.msra.mxu1 %v16453_v32  ;;  %14720 = vmatpush3.bf16.msra.mxu0 %v16453_v32  ;;  %v5383_v0 = vsub.f32 %v5381_v43, %v5382_v45  ;;  %v5395_v63 = vsub.f32 %v15606_v50, %v5253_v58 }
 0x6b2   :  { %v16469_v36 = vpack.c.bf16 %v5253_v58, %v5250_v4  ;;  %14722 = vmatprep.subr.bf16.mxu0 %v16427_v3  ;;  %v5376_v40 = vsub.f32 %v5374_v30, %v5375_v31  ;;  %v5388_v13 = vsub.f32 %v15608_v42, %v5250_v4  ;;  %v16472_v5 = vpack.c.bf16 %v5382_v45, %v5375_v31  ;;  %v17294_v31 = vld [vmem:[#allocation7_spill] sm:$0xff] }
 0x6b3   :  { %v5384_v29 = vand.u32 4294901760, %v5383_v0  ;;  %v5396_v20 = vand.u32 4294901760, %v5395_v63  ;;  %v17296_v0 = vld [vmem:[#allocation8_spill] sm:$0xff] }
 0x6b4   :  { %14670 = vmatprep.subr.bf16.mxu1 %v16469_v36  ;;  %13570 = vmatmul.mubr.f32.vlgmr.msra.gmra.mrb[24].mxu0 %v15774_v47  ;;  %v5377_v41 = vand.u32 4294901760, %v5376_v40  ;;  %v5389_v33 = vand.u32 4294901760, %v5388_v13  ;;  %v14685_v27 = vpack.c.bf16 %v5395_v63, %v5388_v13  ;;  %v17298_v40 = vld [vmem:[#allocation9_spill] sm:$0xff] }
 0x6b5   :  { %14672 = vmatpush3.bf16.msra.mxu1 %v16469_v36  ;;  %14724 = vmatpush3.bf16.msra.mxu0 %v16427_v3  ;;  %v5397_v43 = vsub.f32 %v5395_v63, %v5396_v20  ;;  %v17293_v3 = vld [vmem:[#allocation20_spill] sm:$0xff]  ;;  %v17297_v63 = vld [vmem:[#allocation17_spill] sm:$0xff] }
 0x6b6   :  { %13572 = vmatprep.mubr.f32.mxu0 %v15776_v48  ;;  %v14673_v50 = vpack.c.bf16 %v5384_v29, %v5377_v41  ;;  %v5390_v30 = vsub.f32 %v5388_v13, %v5389_v33  ;;  %v16479_v42 = vpack.c.bf16 %v5396_v20, %v5389_v33  ;;  %v17299_v13 = vld [vmem:[#allocation18_spill] sm:$0xff]  ;;  %v17301_v20 = vld [vmem:[#allocation19_spill] sm:$0xff]  ;;  %v17303_v41 = vld [vmem:[#allocation21_spill] sm:$0xff] }
 0x6b7   :  { %v5398_v58 = vand.u32 4294901760, %v5397_v43  ;;  %v17300_v29 = vld [vmem:[#allocation10_spill] sm:$0xff] }
 0x6b8   :  { %13468 = vmatmul.mubr.f32.vlgmr.msra.gmra.mrb[18].mxu1 %v15949_v10  ;;  %14674 = vmatprep.subr.bf16.mxu1 %v14673_v50  ;;  %v5391_v45 = vand.u32 4294901760, %v5390_v30 }
 0x6b9   :  { %13573 = vmatmul.mubr.f32.gmra.mrb[26].mxu0 %v15785_v53  ;;  %14726 = vmatprep.subr.bf16.mxu0 %v14673_v50 }
 0x6ba   :  { %14676 = vmatpush3.bf16.msra.mxu1 %v14673_v50  ;;  %14728 = vmatpush3.bf16.msra.mxu0 %v14673_v50  ;;  %v14677_v4 = vpack.c.bf16 %v5398_v58, %v5391_v45 }
 0x6bb   :  { %13470 = vmatprep.mubr.f32.mxu1 %v15963_v55  ;;  %13575 = vmatprep.mubr.f32.mxu0 %v15788_v54 }
 0x6bc   :  { %13471 = vmatmul.mubr.f32.gmra.mrb[20].mxu1 %v15972_v62  ;;  %14678 = vmatprep.subr.bf16.mxu1 %v14677_v4 }
 0x6bd   :  { %13576 = vmatmul.mubr.f32.gmra.mrb[28].mxu0 %v15793_v56  ;;  %13473 = vmatprep.mubr.f32.mxu1 %v15979_v60 }
 0x6be   :  { %14680 = vmatpush3.bf16.msra.mxu1 %v14677_v4  ;;  %13586 = vmatprep.mubr.f32.mxu0 %v15704_v9 }
 0x6bf   :  { %14682 = vmatprep.subr.bf16.mxu1 %v14681_v14  ;;  %14730 = vmatprep.subr.bf16.mxu0 %v16429_v1 }
 0x6c0   :  { %13474 = vmatmul.mubr.f32.gmra.mrb[22].mxu1 %v15982_v37 }
 0x6c1   :  { %13587 = vmatmul.mubr.f32.vlgmr.msra.gmra.mrb[24].mxu0 %v15714_v15  ;;  %13484 = vmatprep.mubr.f32.mxu1 %v15846_v6 }
 0x6c2   :  { %14732 = vmatpush3.bf16.msra.mxu0 %v16429_v1  ;;  %13589 = vmatprep.mubr.f32.mxu0 %v15716_v16  ;;  %v17292_v1 = vld [vmem:[#allocation6_spill] sm:$0xff] }
 0x6c3   :  { %14734 = vmatprep.subr.bf16.mxu0 %v14681_v14 }
 0x6c4   :  { %13485 = vmatmul.mubr.f32.vlgmr.msra.gmra.mrb[18].mxu1 %v15900_v12 }
 0x6c5   :  { %14684 = vmatpush3.bf16.msra.mxu1 %v14681_v14  ;;  %13590 = vmatmul.mubr.f32.gmra.mrb[26].mxu0 %v15718_v17 }
 0x6c6   :  { %14736 = vmatpush3.bf16.msra.mxu0 %v14681_v14  ;;  %14686 = vmatprep.subr.bf16.mxu1 %v14685_v27  ;;  %v17295_v14 = vld [vmem:[#allocation13_spill] sm:$0xff] }
 0x6c7   :  { %13487 = vmatprep.mubr.f32.mxu1 %v15903_v18  ;;  %13592 = vmatprep.mubr.f32.mxu0 %v15737_v26 }
 0x6c8   :  { %13488 = vmatmul.mubr.f32.gmra.mrb[20].mxu1 %v15914_v28  ;;  %14738 = vmatprep.subr.bf16.mxu0 %v16421_v8 }
 0x6c9   :  { %14688 = vmatpush3.bf16.msra.mxu1 %v14685_v27  ;;  %13593 = vmatmul.mubr.f32.gmra.mrb[28].mxu0 %v15758_v38 }
 0x6ca   :  { %14690 = vmatprep.subr.bf16.mxu1 %v16453_v32  ;;  %13490 = vmatprep.mubr.f32.mxu1 %v15927_v52 }
 0x6cb   :  { %13603 = vmatprep.mubr.f32.mxu0 %v15724_v19 }
 0x6cc   :  { %13491 = vmatmul.mubr.f32.gmra.mrb[22].mxu1 %v15929_v57 }
 0x6cd   :  { %13604 = vmatmul.mubr.f32.vlgmr.msra.gmra.mrb[24].mxu0 %v15729_v23  ;;  %13501 = vmatprep.mubr.f32.mxu1 %v15851_v11 }
 0x6ce   :  { %14740 = vmatpush3.bf16.msra.mxu0 %v16421_v8  ;;  %13606 = vmatprep.mubr.f32.mxu0 %v15732_v24 }
 0x6cf   :  { %14742 = vmatprep.subr.bf16.mxu0 %v16453_v32 }
 0x6d0   :  { %13502 = vmatmul.mubr.f32.vlgmr.msra.gmra.mrb[18].mxu1 %v15912_v22 }
 0x6d1   :  { %14692 = vmatpush3.bf16.msra.mxu1 %v16453_v32  ;;  %13607 = vmatmul.mubr.f32.gmra.mrb[26].mxu0 %v15735_v25 }
 0x6d2   :  { %14744 = vmatpush3.bf16.msra.mxu0 %v16453_v32  ;;  %14694 = vmatprep.subr.bf16.mxu1 %v16469_v36 }
 0x6d3   :  { %13504 = vmatprep.mubr.f32.mxu1 %v15918_v39  ;;  %13609 = vmatprep.mubr.f32.mxu0 %v15754_v34 }
 0x6d4   :  { %13505 = vmatmul.mubr.f32.gmra.mrb[20].mxu1 %v15925_v49  ;;  %14746 = vmatprep.subr.bf16.mxu0 %v16431_v7 }
 0x6d5   :  { %14696 = vmatpush3.bf16.msra.mxu1 %v16469_v36  ;;  %13610 = vmatmul.mubr.f32.gmra.mrb[28].mxu0 %v15772_v46 }
 0x6d6   :  { %14698 = vmatprep.subr.bf16.mxu1 %v16472_v5  ;;  %13507 = vmatprep.mubr.f32.mxu1 %v15940_v2 }
 0x6d7   :  { %13620 = vmatprep.mubr.f32.mxu0 %v17292_v1 }
 0x6d8   :  { %13508 = vmatmul.mubr.f32.gmra.mrb[22].mxu1 %v17293_v3 }
 0x6d9   :  { %13621 = vmatmul.mubr.f32.vlgmr.msra.gmra.mrb[24].mxu0 %v17294_v31  ;;  %13518 = vmatprep.mubr.f32.mxu1 %v17295_v14 }
 0x6da   :  { %14748 = vmatpush3.bf16.msra.mxu0 %v16431_v7  ;;  %13623 = vmatprep.mubr.f32.mxu0 %v17296_v0  ;;  %v17302_v7 = vld [vmem:[#allocation12_spill] sm:$0xff] }
 0x6db   :  { %14750 = vmatprep.subr.bf16.mxu0 %v16472_v5 }
 0x6dc   :  { %13519 = vmatmul.mubr.f32.vlgmr.msra.gmra.mrb[18].mxu1 %v17297_v63 }
 0x6dd   :  { %14700 = vmatpush3.bf16.msra.mxu1 %v16472_v5  ;;  %13624 = vmatmul.mubr.f32.gmra.mrb[26].mxu0 %v17298_v40 }
 0x6de   :  { %14752 = vmatpush3.bf16.msra.mxu0 %v16472_v5  ;;  %14702 = vmatprep.subr.bf16.mxu1 %v16479_v42  ;;  %v17304_v5 = vld [vmem:[#allocation22_spill] sm:$0xff] }
 0x6df   :  { %13521 = vmatprep.mubr.f32.mxu1 %v17299_v13  ;;  %13626 = vmatprep.mubr.f32.mxu0 %v17300_v29 }
 0x6e0   :  { %13522 = vmatmul.mubr.f32.gmra.mrb[20].mxu1 %v17301_v20  ;;  %14754 = vmatprep.subr.bf16.mxu0 %v16421_v8 }
 0x6e1   :  { %14704 = vmatpush3.bf16.msra.mxu1 %v16479_v42  ;;  %13627 = vmatmul.mubr.f32.gmra.mrb[28].mxu0 %v17302_v7 }
 0x6e2   :  { %14706 = vmatprep.subr.bf16.mxu1 %v16453_v32  ;;  %13524 = vmatprep.mubr.f32.mxu1 %v17303_v41 }
 0x6e3   :  { %13637 = vmatprep.mubr.f32.mxu0 %v15704_v9 }
 0x6e4   :  { %13525 = vmatmul.mubr.f32.gmra.mrb[22].mxu1 %v17304_v5 }
 0x6e5   :  { %13638 = vmatmul.mubr.f32.vlgmr.msra.gmra.mrb[24].mxu0 %v15714_v15  ;;  %13535 = vmatprep.mubr.f32.mxu1 %v15846_v6 }
 0x6e6   :  { %14756 = vmatpush3.bf16.msra.mxu0 %v16421_v8  ;;  %13640 = vmatprep.mubr.f32.mxu0 %v15716_v16  ;;  %v17305_v8 = vld [vmem:[#allocation11_spill] sm:$0xff] }
 0x6e7   :  { %14758 = vmatprep.subr.bf16.mxu0 %v16453_v32 }
 0x6e8   :  { %13536 = vmatmul.mubr.f32.vlgmr.msra.gmra.mrb[18].mxu1 %v15900_v12 }
 0x6e9   :  { %14708 = vmatpush3.bf16.msra.mxu1 %v16453_v32  ;;  %13641 = vmatmul.mubr.f32.gmra.mrb[26].mxu0 %v15718_v17 }
 0x6ea   :  { %14760 = vmatpush3.bf16.msra.mxu0 %v16453_v32  ;;  %14710 = vmatprep.subr.bf16.mxu1 %v16469_v36  ;;  %v17306_v32 = vld [vmem:[#allocation14_spill] sm:$0xff] }
 0x6eb   :  { %13538 = vmatprep.mubr.f32.mxu1 %v15903_v18  ;;  %13643 = vmatprep.mubr.f32.mxu0 %v15737_v26 }
 0x6ec   :  { %13539 = vmatmul.mubr.f32.gmra.mrb[20].mxu1 %v15914_v28 }
 0x6ed   :  { %14712 = vmatpush3.bf16.msra.mxu1 %v16469_v36  ;;  %13644 = vmatmul.mubr.f32.gmra.mrb[28].mxu0 %v15758_v38 }
 0x6ee   :  { %13541 = vmatprep.mubr.f32.mxu1 %v15927_v52  ;;  %13654 = vmatprep.mubr.f32.mxu0 %v15704_v9 }
 0x6f0   :  { %13542 = vmatmul.mubr.f32.gmra.mrb[22].mxu1 %v15929_v57 }
 0x6f1   :  { %13655 = vmatmul.mubr.f32.vlgmr.msra.gmra.mrb[24].mxu0 %v15714_v15  ;;  %13552 = vmatprep.mubr.f32.mxu1 %v15846_v6 }
 0x6f2   :  { %13657 = vmatprep.mubr.f32.mxu0 %v15716_v16 }
 0x6f4   :  { %13553 = vmatmul.mubr.f32.vlgmr.msra.gmra.mrb[18].mxu1 %v15900_v12 }
 0x6f5   :  { %13658 = vmatmul.mubr.f32.gmra.mrb[26].mxu0 %v15718_v17  ;;  %13555 = vmatprep.mubr.f32.mxu1 %v15903_v18 }
 0x6f6   :  { %13660 = vmatprep.mubr.f32.mxu0 %v15737_v26 }
 0x6f8   :  { %13556 = vmatmul.mubr.f32.gmra.mrb[20].mxu1 %v15914_v28 }
 0x6f9   :  { %13661 = vmatmul.mubr.f32.gmra.mrb[28].mxu0 %v15758_v38  ;;  %13558 = vmatprep.mubr.f32.mxu1 %v15927_v52 }
 0x6fa   :  { %13773 = vmatprep.mubr.f32.mxu0 %v17305_v8 }
 0x6fc   :  { %13559 = vmatmul.mubr.f32.gmra.mrb[22].mxu1 %v15929_v57 }
 0x6fd   :  { %13671 = vmatprep.mubr.f32.mxu1 %v17306_v32 }
 0x7c4   :  { %v13656_v36 = vpop.f32.mrb[24].mxu0 }
 0x7c5   :  { %6682 = vrot.lane.b32.xlu1 %v13656_v36, %s15660_s5  ;;  %v6646_v33 = vpop.f32.mrb[25].mxu0  ;;  %v11851_v36 = vld [vmem:[%s17197_s2 + $0x50] sm:$0xff] }
 0x7c6   :  { %6680 = vrot.lane.b32.xlu0 %v6646_v33, %s15660_s5  ;;  %v11852_v33 = vld [vmem:[%s17197_s2 + $0x58] sm:$0xff]  ;;  %v7446_v32 = vand.u32 4294901760, %v11851_v36 }
 0x7c7   :  { %v13554_v27 = vpop.f32.mrb[18].mxu1 }
 0x7c8   :  { %v13659_v43 = vpop.f32.mrb[26].mxu0  ;;  %v5909_v50 = vpop.f32.mrb[19].mxu1  ;;  %v7576_v41 = vsub.f32 %v11851_v36, %v7446_v32 }
 0x7c9   :  { %v6658_v30 = vpop.f32.mrb[27].mxu0  ;;  %5945 = vrot.lane.b32.xlu1 %v13554_v27, %s15660_s5  ;;  %v7449_v27 = vand.u32 4294901760, %v11852_v33 }
 0x7ca   :  { %5943 = vrot.lane.b32.xlu0 %v5909_v50, %s15660_s5 }
 0x7cb   :  { %v13557_v42 = vpop.f32.mrb[20].mxu1  ;;  %v16589_v5 = vpack.c.bf16 %v7449_v27, %v7446_v32  ;;  %v7583_v7 = vsub.f32 %v11852_v33, %v7449_v27 }
 0x7cc   :  { %v13662_v58 = vpop.f32.mrb[28].mxu0  ;;  %v5921_v45 = vpop.f32.mrb[21].mxu1 }
 0x7cd   :  { %v6670_v4 = vpop.f32.mrb[29].mxu0  ;;  %6688 = vrot.lane.b32.xlu1 %v13662_v58, %s15661_s6  ;;  %14810 = vmatprep.subr.bf16.mxu0 %v16589_v5  ;;  %v7577_v58 = vand.u32 4294901760, %v7576_v41  ;;  %v7584_v20 = vand.u32 4294901760, %v7583_v7  ;;  %v16597_v0 = vpack.c.bf16 %v7583_v7, %v7576_v41 }
 0x7ce   :  { %6686 = vrot.lane.b32.xlu0 %v6670_v4, %s15661_s6  ;;  %14812 = vmatpush3.bf16.msra.mxu0 %v16589_v5 }
 0x7cf   :  { %v13560_v8 = vpop.f32.mrb[22].mxu1  ;;  %v7578_v29 = vsub.f32 %v7576_v41, %v7577_v58  ;;  %v7585_v4 = vsub.f32 %v7583_v7, %v7584_v20  ;;  %v16599_v32 = vpack.c.bf16 %v7584_v20, %v7577_v58 }
 0x7d0   :  { %v5933_v50 = vpop.f32.mrb[23].mxu1 }
 0x7d1   :  { %5951 = vrot.lane.b32.xlu1 %v13560_v8, %s15661_s6  ;;  %v7579_v13 = vand.u32 4294901760, %v7578_v29  ;;  %v7586_v40 = vand.u32 4294901760, %v7585_v4 }
 0x7d2   :  { %5949 = vrot.lane.b32.xlu0 %v5933_v50, %s15661_s6 }
 0x7d3   :  { %v16595_v63 = vpack.c.bf16 %v7586_v40, %v7579_v13 }
 0x837   :  { %v6683_v36 = vpop.permute.xlu1 %6682 }
 0x838   :  { %v6681_v8 = vpop.permute.xlu0 %6680  ;;  %v6685_v27 = vsel %vm15869_vm1, 0.0, %v6683_v36 }
 0x839   :  { %v6684_v14 = vsel %vm15869_vm1, 0.0, %v6681_v8  ;;  %v6693_v31 = vadd.f32 %v13659_v43, %v6685_v27 }
 0x83a   :  { %v6692_v29 = vadd.f32 %v6684_v14, %v6658_v30 }
 0x83b   :  { %v5946_v33 = vpop.permute.xlu1 %5945 }
 0x83c   :  { %v5944_v50 = vpop.permute.xlu0 %5943  ;;  %v5948_v40 = vsel %vm15869_vm1, 0.0, %v5946_v33 }
 0x83d   :  { %v5947_v7 = vsel %vm15869_vm1, 0.0, %v5944_v50  ;;  %v5956_v36 = vadd.f32 %v13557_v42, %v5948_v40 }
 0x83e   :  { %v5955_v14 = vadd.f32 %v5947_v7, %v5921_v45 }
 0x83f   :  { %v6689_v3 = vpop.permute.xlu1 %6688 }
 0x840   :  { %v6691_v13 = vsel %vm15875_vm2, 0.0, %v6689_v3  ;;  %v6687_v20 = vpop.permute.xlu0 %6686 }
 0x841   :  { %v6695_v41 = vadd.f32 %v6693_v31, %v6691_v13  ;;  %v6690_v58 = vsel %vm15875_vm2, 0.0, %v6687_v20 }
 0x842   :  { %v6694_v4 = vadd.f32 %v6692_v29, %v6690_v58 }
 0x843   :  { %v6697_v43 = vadd.f32 %v6695_v41, %v17261_v21  ;;  %v5952_v8 = vpop.permute.xlu1 %5951 }
 0x844   :  { %v6696_v30 = vadd.f32 %v6694_v4, %v17261_v21  ;;  %v5954_v33 = vsel %vm15875_vm2, 0.0, %v5952_v8  ;;  %v5950_v3 = vpop.permute.xlu0 %5949 }
 0x845   :  { %15609 = vtanh.f32 %v6697_v43  ;;  %v5958_v27 = vadd.f32 %v5956_v36, %v5954_v33  ;;  %v5953_v31 = vsel %vm15875_vm2, 0.0, %v5950_v3 }
 0x846   :  { %15611 = vtanh.f32 %v6696_v30  ;;  %v5957_v50 = vadd.f32 %v5955_v14, %v5953_v31 }
 0x847   :  { %v5960_v29 = vadd.f32 %v5958_v27, %v17275_v59 }
 0x848   :  { %v5959_v42 = vadd.f32 %v5957_v50, %v17275_v59 }
 0x849   :  { %15613 = vtanh.f32 %v5960_v29 }
 0x84a   :  { %15615 = vtanh.f32 %v5959_v42 }
 0x84f   :  { %v15610_v45 = vpop.eup %15609 }
 0x850   :  { %v15612_v40 = vpop.eup %15611  ;;  %v6712_v13 = vand.u32 4294901760, %v15610_v45 }
 0x851   :  { %v6709_v20 = vand.u32 4294901760, %v15612_v40 }
 0x852   :  { %v6846_v7 = vsub.f32 %v15610_v45, %v6712_v13 }
 0x853   :  { %v15614_v41 = vpop.eup %15613  ;;  %v16621_v58 = vpack.c.bf16 %v6712_v13, %v6709_v20  ;;  %v6839_v4 = vsub.f32 %v15612_v40, %v6709_v20 }
 0x854   :  { %v15616_v36 = vpop.eup %15615  ;;  %v5968_v43 = vmax.f32 %v16458_v61, %v15614_v41  ;;  %v6718_v8 = vand.u32 4294901760, %v15614_v41  ;;  %v6847_v14 = vand.u32 4294901760, %v6846_v7 }
 0x855   :  { %v5967_v30 = vmax.f32 %v16463_v51, %v15616_v36  ;;  %14762 = vmatprep.subr.bf16.mxu1 %v16621_v58  ;;  %14814 = vmatprep.subr.bf16.mxu0 %v16621_v58  ;;  %v6715_v33 = vand.u32 4294901760, %v15616_v36  ;;  %v6840_v3 = vand.u32 4294901760, %v6839_v4  ;;  %v14777_v27 = vpack.c.bf16 %v6846_v7, %v6839_v4 }
 0x856   :  { %5970 = vst [vmem:[%s17198_s3 + $0x8] sm:$0xff] %v5968_v43  ;;  %14764 = vmatpush3.bf16.msra.mxu1 %v16621_v58  ;;  %14816 = vmatpush3.bf16.msra.mxu0 %v16621_v58  ;;  %v6848_v61 = vsub.f32 %v6846_v7, %v6847_v14  ;;  %v6860_v31 = vsub.f32 %v15614_v41, %v6718_v8 }
 0x857   :  { %5969 = vst [vmem:[%s17198_s3] sm:$0xff] %v5967_v30  ;;  %v16635_v51 = vpack.c.bf16 %v6718_v8, %v6715_v33  ;;  %14818 = vmatprep.subr.bf16.mxu0 %v16595_v63  ;;  %v6841_v50 = vsub.f32 %v6839_v4, %v6840_v3  ;;  %v6853_v29 = vsub.f32 %v15616_v36, %v6715_v33  ;;  %v17309_v33 = vld [vmem:[#allocation13_spill] sm:$0xff] }
 0x858   :  { %v16638_v42 = vpack.c.bf16 %v6847_v14, %v6840_v3  ;;  %v6849_v45 = vand.u32 4294901760, %v6848_v61  ;;  %v6861_v40 = vand.u32 4294901760, %v6860_v31  ;;  %v17310_v3 = vld [vmem:[#allocation8_spill] sm:$0xff]  ;;  %v17312_v61 = vld [vmem:[#allocation9_spill] sm:$0xff] }
 0x859   :  { %14766 = vmatprep.subr.bf16.mxu1 %v16635_v51  ;;  %13774 = vmatmul.mubr.f32.vlgmr.msra.gmra.mrb[30].mxu0 %v15774_v47  ;;  %v6842_v13 = vand.u32 4294901760, %v6841_v50  ;;  %v6854_v20 = vand.u32 4294901760, %v6853_v29  ;;  %v14781_v7 = vpack.c.bf16 %v6860_v31, %v6853_v29  ;;  %v17314_v50 = vld [vmem:[#allocation10_spill] sm:$0xff] }
 0x85a   :  { %14768 = vmatpush3.bf16.msra.mxu1 %v16635_v51  ;;  %14820 = vmatpush3.bf16.msra.mxu0 %v16595_v63  ;;  %v6862_v41 = vsub.f32 %v6860_v31, %v6861_v40  ;;  %v17308_v63 = vld [vmem:[#allocation7_spill] sm:$0xff]  ;;  %v17313_v31 = vld [vmem:[#allocation18_spill] sm:$0xff] }
 0x85b   :  { %13776 = vmatprep.mubr.f32.mxu0 %v15776_v48  ;;  %v14769_v4 = vpack.c.bf16 %v6849_v45, %v6842_v13  ;;  %v6855_v36 = vsub.f32 %v6853_v29, %v6854_v20  ;;  %v16645_v43 = vpack.c.bf16 %v6861_v40, %v6854_v20  ;;  %v17315_v29 = vld [vmem:[#allocation19_spill] sm:$0xff]  ;;  %v17317_v45 = vld [vmem:[#allocation21_spill] sm:$0xff] }
 0x85c   :  { %v6863_v8 = vand.u32 4294901760, %v6862_v41 }
 0x85d   :  { %13672 = vmatmul.mubr.f32.vlgmr.msra.gmra.mrb[24].mxu1 %v15949_v10  ;;  %14770 = vmatprep.subr.bf16.mxu1 %v14769_v4  ;;  %v6856_v14 = vand.u32 4294901760, %v6855_v36 }
 0x85e   :  { %13777 = vmatmul.mubr.f32.gmra.mrb[32].mxu0 %v15785_v53  ;;  %14822 = vmatprep.subr.bf16.mxu0 %v14769_v4 }
 0x85f   :  { %14772 = vmatpush3.bf16.msra.mxu1 %v14769_v4  ;;  %14824 = vmatpush3.bf16.msra.mxu0 %v14769_v4  ;;  %v14773_v30 = vpack.c.bf16 %v6863_v8, %v6856_v14  ;;  %v11853_v14 = vld [vmem:[%s17197_s2 + $0x60] sm:$0xff] }
 0x860   :  { %13674 = vmatprep.mubr.f32.mxu1 %v15963_v55  ;;  %13779 = vmatprep.mubr.f32.mxu0 %v15788_v54 }
 0x861   :  { %13675 = vmatmul.mubr.f32.gmra.mrb[26].mxu1 %v15972_v62  ;;  %14774 = vmatprep.subr.bf16.mxu1 %v14773_v30 }
 0x862   :  { %13780 = vmatmul.mubr.f32.gmra.mrb[34].mxu0 %v15793_v56  ;;  %13677 = vmatprep.mubr.f32.mxu1 %v15979_v60 }
 0x863   :  { %14776 = vmatpush3.bf16.msra.mxu1 %v14773_v30  ;;  %13790 = vmatprep.mubr.f32.mxu0 %v15704_v9  ;;  %v11854_v30 = vld [vmem:[%s17197_s2 + $0x68] sm:$0xff] }
 0x864   :  { %14778 = vmatprep.subr.bf16.mxu1 %v14777_v27  ;;  %14826 = vmatprep.subr.bf16.mxu0 %v16597_v0 }
 0x865   :  { %13678 = vmatmul.mubr.f32.gmra.mrb[28].mxu1 %v15982_v37 }
 0x866   :  { %13791 = vmatmul.mubr.f32.vlgmr.msra.gmra.mrb[30].mxu0 %v15714_v15  ;;  %13688 = vmatprep.mubr.f32.mxu1 %v15846_v6 }
 0x867   :  { %14828 = vmatpush3.bf16.msra.mxu0 %v16597_v0  ;;  %13793 = vmatprep.mubr.f32.mxu0 %v15716_v16  ;;  %v17307_v0 = vld [vmem:[#allocation20_spill] sm:$0xff] }
 0x868   :  { %14830 = vmatprep.subr.bf16.mxu0 %v14777_v27 }
 0x869   :  { %13689 = vmatmul.mubr.f32.vlgmr.msra.gmra.mrb[24].mxu1 %v15900_v12 }
 0x86a   :  { %14780 = vmatpush3.bf16.msra.mxu1 %v14777_v27  ;;  %13794 = vmatmul.mubr.f32.gmra.mrb[32].mxu0 %v15718_v17 }
 0x86b   :  { %14832 = vmatpush3.bf16.msra.mxu0 %v14777_v27  ;;  %14782 = vmatprep.subr.bf16.mxu1 %v14781_v7  ;;  %v17311_v27 = vld [vmem:[#allocation17_spill] sm:$0xff] }
 0x86c   :  { %13691 = vmatprep.mubr.f32.mxu1 %v15903_v18  ;;  %13796 = vmatprep.mubr.f32.mxu0 %v15737_v26 }
 0x86d   :  { %13692 = vmatmul.mubr.f32.gmra.mrb[26].mxu1 %v15914_v28  ;;  %14834 = vmatprep.subr.bf16.mxu0 %v16589_v5 }
 0x86e   :  { %14784 = vmatpush3.bf16.msra.mxu1 %v14781_v7  ;;  %13797 = vmatmul.mubr.f32.gmra.mrb[34].mxu0 %v15758_v38 }
 0x86f   :  { %14786 = vmatprep.subr.bf16.mxu1 %v16621_v58  ;;  %13694 = vmatprep.mubr.f32.mxu1 %v15927_v52 }
 0x870   :  { %13807 = vmatprep.mubr.f32.mxu0 %v15724_v19 }
 0x871   :  { %13695 = vmatmul.mubr.f32.gmra.mrb[28].mxu1 %v15929_v57 }
 0x872   :  { %13808 = vmatmul.mubr.f32.vlgmr.msra.gmra.mrb[30].mxu0 %v15729_v23  ;;  %13705 = vmatprep.mubr.f32.mxu1 %v15851_v11 }
 0x873   :  { %14836 = vmatpush3.bf16.msra.mxu0 %v16589_v5  ;;  %13810 = vmatprep.mubr.f32.mxu0 %v15732_v24 }
 0x874   :  { %14838 = vmatprep.subr.bf16.mxu0 %v16621_v58 }
 0x875   :  { %13706 = vmatmul.mubr.f32.vlgmr.msra.gmra.mrb[24].mxu1 %v15912_v22 }
 0x876   :  { %14788 = vmatpush3.bf16.msra.mxu1 %v16621_v58  ;;  %13811 = vmatmul.mubr.f32.gmra.mrb[32].mxu0 %v15735_v25 }
 0x877   :  { %14840 = vmatpush3.bf16.msra.mxu0 %v16621_v58  ;;  %14790 = vmatprep.subr.bf16.mxu1 %v16635_v51 }
 0x878   :  { %13708 = vmatprep.mubr.f32.mxu1 %v15918_v39  ;;  %13813 = vmatprep.mubr.f32.mxu0 %v15754_v34 }
 0x879   :  { %13709 = vmatmul.mubr.f32.gmra.mrb[26].mxu1 %v15925_v49  ;;  %14842 = vmatprep.subr.bf16.mxu0 %v16599_v32 }
 0x87a   :  { %14792 = vmatpush3.bf16.msra.mxu1 %v16635_v51  ;;  %13814 = vmatmul.mubr.f32.gmra.mrb[34].mxu0 %v15772_v46 }
 0x87b   :  { %14794 = vmatprep.subr.bf16.mxu1 %v16638_v42  ;;  %13711 = vmatprep.mubr.f32.mxu1 %v15940_v2 }
 0x87c   :  { %13824 = vmatprep.mubr.f32.mxu0 %v17292_v1 }
 0x87d   :  { %13712 = vmatmul.mubr.f32.gmra.mrb[28].mxu1 %v17307_v0 }
 0x87e   :  { %13825 = vmatmul.mubr.f32.vlgmr.msra.gmra.mrb[30].mxu0 %v17308_v63  ;;  %13722 = vmatprep.mubr.f32.mxu1 %v17309_v33 }
 0x87f   :  { %14844 = vmatpush3.bf16.msra.mxu0 %v16599_v32  ;;  %13827 = vmatprep.mubr.f32.mxu0 %v17310_v3  ;;  %v17316_v32 = vld [vmem:[#allocation12_spill] sm:$0xff] }
 0x880   :  { %14846 = vmatprep.subr.bf16.mxu0 %v16638_v42 }
 0x881   :  { %13723 = vmatmul.mubr.f32.vlgmr.msra.gmra.mrb[24].mxu1 %v17311_v27 }
 0x882   :  { %14796 = vmatpush3.bf16.msra.mxu1 %v16638_v42  ;;  %13828 = vmatmul.mubr.f32.gmra.mrb[32].mxu0 %v17312_v61 }
 0x883   :  { %14848 = vmatpush3.bf16.msra.mxu0 %v16638_v42  ;;  %14798 = vmatprep.subr.bf16.mxu1 %v16645_v43  ;;  %v17318_v42 = vld [vmem:[#allocation22_spill] sm:$0xff] }
 0x884   :  { %13725 = vmatprep.mubr.f32.mxu1 %v17313_v31  ;;  %13830 = vmatprep.mubr.f32.mxu0 %v17314_v50 }
 0x885   :  { %13726 = vmatmul.mubr.f32.gmra.mrb[26].mxu1 %v17315_v29  ;;  %14850 = vmatprep.subr.bf16.mxu0 %v16589_v5 }
 0x886   :  { %14800 = vmatpush3.bf16.msra.mxu1 %v16645_v43  ;;  %13831 = vmatmul.mubr.f32.gmra.mrb[34].mxu0 %v17316_v32 }
 0x887   :  { %14802 = vmatprep.subr.bf16.mxu1 %v16621_v58  ;;  %13728 = vmatprep.mubr.f32.mxu1 %v17317_v45 }
 0x888   :  { %13841 = vmatprep.mubr.f32.mxu0 %v15704_v9 }
 0x889   :  { %13729 = vmatmul.mubr.f32.gmra.mrb[28].mxu1 %v17318_v42 }
 0x88a   :  { %13842 = vmatmul.mubr.f32.vlgmr.msra.gmra.mrb[30].mxu0 %v15714_v15  ;;  %13739 = vmatprep.mubr.f32.mxu1 %v15846_v6 }
 0x88b   :  { %14852 = vmatpush3.bf16.msra.mxu0 %v16589_v5  ;;  %13844 = vmatprep.mubr.f32.mxu0 %v15716_v16  ;;  %v17319_v5 = vld [vmem:[#allocation11_spill] sm:$0xff] }
 0x88c   :  { %14854 = vmatprep.subr.bf16.mxu0 %v16621_v58 }
 0x88d   :  { %13740 = vmatmul.mubr.f32.vlgmr.msra.gmra.mrb[24].mxu1 %v15900_v12 }
 0x88e   :  { %14804 = vmatpush3.bf16.msra.mxu1 %v16621_v58  ;;  %13845 = vmatmul.mubr.f32.gmra.mrb[32].mxu0 %v15718_v17 }
 0x88f   :  { %14856 = vmatpush3.bf16.msra.mxu0 %v16621_v58  ;;  %14806 = vmatprep.subr.bf16.mxu1 %v16635_v51  ;;  %v17320_v58 = vld [vmem:[#allocation14_spill] sm:$0xff] }
 0x890   :  { %13742 = vmatprep.mubr.f32.mxu1 %v15903_v18  ;;  %13847 = vmatprep.mubr.f32.mxu0 %v15737_v26 }
 0x891   :  { %13743 = vmatmul.mubr.f32.gmra.mrb[26].mxu1 %v15914_v28 }
 0x892   :  { %14808 = vmatpush3.bf16.msra.mxu1 %v16635_v51  ;;  %13848 = vmatmul.mubr.f32.gmra.mrb[34].mxu0 %v15758_v38 }
 0x893   :  { %13745 = vmatprep.mubr.f32.mxu1 %v15927_v52  ;;  %13858 = vmatprep.mubr.f32.mxu0 %v15704_v9 }
 0x895   :  { %13746 = vmatmul.mubr.f32.gmra.mrb[28].mxu1 %v15929_v57 }
 0x896   :  { %13859 = vmatmul.mubr.f32.vlgmr.msra.gmra.mrb[30].mxu0 %v15714_v15  ;;  %13756 = vmatprep.mubr.f32.mxu1 %v15846_v6 }
 0x897   :  { %13861 = vmatprep.mubr.f32.mxu0 %v15716_v16 }
 0x899   :  { %13757 = vmatmul.mubr.f32.vlgmr.msra.gmra.mrb[24].mxu1 %v15900_v12 }
 0x89a   :  { %13862 = vmatmul.mubr.f32.gmra.mrb[32].mxu0 %v15718_v17  ;;  %13759 = vmatprep.mubr.f32.mxu1 %v15903_v18 }
 0x89b   :  { %13864 = vmatprep.mubr.f32.mxu0 %v15737_v26 }
 0x89d   :  { %13760 = vmatmul.mubr.f32.gmra.mrb[26].mxu1 %v15914_v28 }
 0x89e   :  { %13865 = vmatmul.mubr.f32.gmra.mrb[34].mxu0 %v15758_v38  ;;  %13762 = vmatprep.mubr.f32.mxu1 %v15927_v52 }
 0x89f   :  { %13977 = vmatprep.mubr.f32.mxu0 %v17319_v5 }
 0x8a1   :  { %13763 = vmatmul.mubr.f32.gmra.mrb[28].mxu1 %v15929_v57 }
 0x8a2   :  { %13875 = vmatprep.mubr.f32.mxu1 %v17320_v58 }
 0x969   :  { %v13860_v51 = vpop.f32.mrb[30].mxu0 }
 0x96a   :  { %8147 = vrot.lane.b32.xlu1 %v13860_v51, %s15660_s5  ;;  %v8111_v40 = vpop.f32.mrb[31].mxu0  ;;  %v8911_v51 = vand.u32 4294901760, %v11853_v14 }
 0x96b   :  { %8145 = vrot.lane.b32.xlu0 %v8111_v40, %s15660_s5  ;;  %v8914_v40 = vand.u32 4294901760, %v11854_v30 }
 0x96c   :  { %v13758_v13 = vpop.f32.mrb[24].mxu1  ;;  %v9041_v5 = vsub.f32 %v11853_v14, %v8911_v51 }
 0x96d   :  { %v13863_v20 = vpop.f32.mrb[32].mxu0  ;;  %v7374_v7 = vpop.f32.mrb[25].mxu1  ;;  %v16755_v58 = vpack.c.bf16 %v8914_v40, %v8911_v51  ;;  %v9048_v42 = vsub.f32 %v11854_v30, %v8914_v40 }
 0x96e   :  { %v8123_v41 = vpop.f32.mrb[33].mxu0  ;;  %7410 = vrot.lane.b32.xlu1 %v13758_v13, %s15660_s5 }
 0x96f   :  { %7408 = vrot.lane.b32.xlu0 %v7374_v7, %s15660_s5  ;;  %14906 = vmatprep.subr.bf16.mxu0 %v16755_v58  ;;  %v9049_v45 = vand.u32 4294901760, %v9048_v42  ;;  %v16763_v61 = vpack.c.bf16 %v9048_v42, %v9041_v5 }
 0x970   :  { %v13761_v4 = vpop.f32.mrb[26].mxu1  ;;  %14908 = vmatpush3.bf16.msra.mxu0 %v16755_v58 }
 0x971   :  { %v13866_v36 = vpop.f32.mrb[34].mxu0  ;;  %v7386_v43 = vpop.f32.mrb[27].mxu1 }
 0x972   :  { %v8135_v8 = vpop.f32.mrb[35].mxu0  ;;  %8153 = vrot.lane.b32.xlu1 %v13866_v36, %s15661_s6  ;;  %v9042_v36 = vand.u32 4294901760, %v9041_v5 }
 0x973   :  { %8151 = vrot.lane.b32.xlu0 %v8135_v8, %s15661_s6  ;;  %v9050_v8 = vsub.f32 %v9048_v42, %v9049_v45 }
 0x974   :  { %v13764_v13 = vpop.f32.mrb[28].mxu1  ;;  %v9043_v32 = vsub.f32 %v9041_v5, %v9042_v36  ;;  %v16765_v14 = vpack.c.bf16 %v9049_v45, %v9042_v36 }
 0x975   :  { %v7398_v7 = vpop.f32.mrb[29].mxu1  ;;  %v9051_v50 = vand.u32 4294901760, %v9050_v8 }
 0x976   :  { %7416 = vrot.lane.b32.xlu1 %v13764_v13, %s15661_s6  ;;  %v9044_v29 = vand.u32 4294901760, %v9043_v32 }
 0x977   :  { %7414 = vrot.lane.b32.xlu0 %v7398_v7, %s15661_s6 }
 0x978   :  { %v16761_v31 = vpack.c.bf16 %v9051_v50, %v9044_v29 }
 0x9dc   :  { %v8148_v30 = vpop.permute.xlu1 %8147 }
 0x9dd   :  { %v8146_v51 = vpop.permute.xlu0 %8145  ;;  %v8150_v13 = vsel %vm15869_vm1, 0.0, %v8148_v30 }
 0x9de   :  { %v8149_v27 = vsel %vm15869_vm1, 0.0, %v8146_v51  ;;  %v8158_v3 = vadd.f32 %v13863_v20, %v8150_v13 }
 0x9df   :  { %v8157_v32 = vadd.f32 %v8149_v27, %v8123_v41 }
 0x9e0   :  { %v7411_v40 = vpop.permute.xlu1 %7410 }
 0x9e1   :  { %v7409_v7 = vpop.permute.xlu0 %7408  ;;  %v7413_v50 = vsel %vm15869_vm1, 0.0, %v7411_v40 }
 0x9e2   :  { %v7412_v42 = vsel %vm15869_vm1, 0.0, %v7409_v7  ;;  %v7421_v30 = vadd.f32 %v13761_v4, %v7413_v50 }
 0x9e3   :  { %v7420_v27 = vadd.f32 %v7412_v42, %v7386_v43 }
 0x9e4   :  { %v8154_v33 = vpop.permute.xlu1 %8153 }
 0x9e5   :  { %v8156_v29 = vsel %vm15875_vm2, 0.0, %v8154_v33  ;;  %v8152_v45 = vpop.permute.xlu0 %8151 }
 0x9e6   :  { %v8160_v5 = vadd.f32 %v8158_v3, %v8156_v29  ;;  %v8155_v36 = vsel %vm15875_vm2, 0.0, %v8152_v45 }
 0x9e7   :  { %v8159_v8 = vadd.f32 %v8157_v32, %v8155_v36 }
 0x9e8   :  { %v8162_v20 = vadd.f32 %v8160_v5, %v17261_v21  ;;  %v7417_v51 = vpop.permute.xlu1 %7416 }
 0x9e9   :  { %v8161_v41 = vadd.f32 %v8159_v8, %v17261_v21  ;;  %v7419_v40 = vsel %vm15875_vm2, 0.0, %v7417_v51  ;;  %v7415_v33 = vpop.permute.xlu0 %7414 }
 0x9ea   :  { %15617 = vtanh.f32 %v8162_v20  ;;  %v7423_v13 = vadd.f32 %v7421_v30, %v7419_v40  ;;  %v7418_v3 = vsel %vm15875_vm2, 0.0, %v7415_v33 }
 0x9eb   :  { %15619 = vtanh.f32 %v8161_v41  ;;  %v7422_v7 = vadd.f32 %v7420_v27, %v7418_v3 }
 0x9ec   :  { %v7425_v32 = vadd.f32 %v7423_v13, %v17275_v59 }
 0x9ed   :  { %v7424_v4 = vadd.f32 %v7422_v7, %v17275_v59 }
 0x9ee   :  { %15621 = vtanh.f32 %v7425_v32 }
 0x9ef   :  { %15623 = vtanh.f32 %v7424_v4 }
 0x9f4   :  { %v15618_v43 = vpop.eup %15617 }
 0x9f5   :  { %v15620_v50 = vpop.eup %15619  ;;  %v8177_v29 = vand.u32 4294901760, %v15618_v43 }
 0x9f6   :  { %v8174_v45 = vand.u32 4294901760, %v15620_v50 }
 0x9f7   :  { %v8311_v42 = vsub.f32 %v15618_v43, %v8177_v29 }
 0x9f8   :  { %v16787_v5 = vpop.eup %15621  ;;  %v16789_v36 = vpack.c.bf16 %v8177_v29, %v8174_v45  ;;  %v8304_v8 = vsub.f32 %v15620_v50, %v8174_v45 }
 0x9f9   :  { %v16791_v30 = vpop.eup %15623  ;;  %v8183_v20 = vand.u32 4294901760, %v16787_v5  ;;  %v8312_v51 = vand.u32 4294901760, %v8311_v42 }
 0x9fa   :  { %14858 = vmatprep.subr.bf16.mxu1 %v16789_v36  ;;  %14910 = vmatprep.subr.bf16.mxu0 %v16789_v36  ;;  %v8180_v27 = vand.u32 4294901760, %v16791_v30  ;;  %v8305_v41 = vand.u32 4294901760, %v8304_v8  ;;  %v14873_v40 = vpack.c.bf16 %v8311_v42, %v8304_v8 }
 0x9fb   :  { %14860 = vmatpush3.bf16.msra.mxu1 %v16789_v36  ;;  %14912 = vmatpush3.bf16.msra.mxu0 %v16789_v36  ;;  %v8313_v33 = vsub.f32 %v8311_v42, %v8312_v51  ;;  %v8325_v13 = vsub.f32 %v16787_v5, %v8183_v20 }
 0x9fc   :  { %v16800_v3 = vpack.c.bf16 %v8183_v20, %v8180_v27  ;;  %14914 = vmatprep.subr.bf16.mxu0 %v16761_v31  ;;  %v8306_v7 = vsub.f32 %v8304_v8, %v8305_v41  ;;  %v8318_v32 = vsub.f32 %v16791_v30, %v8180_v27  ;;  %v16804_v4 = vpack.c.bf16 %v8312_v51, %v8305_v41 }
 0x9fd   :  { %v8314_v43 = vand.u32 4294901760, %v8313_v33  ;;  %v8326_v50 = vand.u32 4294901760, %v8325_v13 }
 0x9fe   :  { %14862 = vmatprep.subr.bf16.mxu1 %v16800_v3  ;;  %13978 = vmatmul.mubr.f32.vlgmr.msra.gmra.mrb[36].mxu0 %v15774_v47  ;;  %v8307_v29 = vand.u32 4294901760, %v8306_v7  ;;  %v8319_v45 = vand.u32 4294901760, %v8318_v32  ;;  %v14877_v42 = vpack.c.bf16 %v8325_v13, %v8318_v32 }
 0x9ff   :  { %14864 = vmatpush3.bf16.msra.mxu1 %v16800_v3  ;;  %14916 = vmatpush3.bf16.msra.mxu0 %v16761_v31  ;;  %v8327_v20 = vsub.f32 %v8325_v13, %v8326_v50  ;;  %v17322_v31 = vld [vmem:[#allocation8_spill] sm:$0xff]  ;;  %v17324_v13 = vld [vmem:[#allocation9_spill] sm:$0xff] }
 0xa00   :  { %13980 = vmatprep.mubr.f32.mxu0 %v15776_v48  ;;  %v14865_v8 = vpack.c.bf16 %v8314_v43, %v8307_v29  ;;  %v8320_v27 = vsub.f32 %v8318_v32, %v8319_v45  ;;  %v16811_v51 = vpack.c.bf16 %v8326_v50, %v8319_v45  ;;  %v17325_v32 = vld [vmem:[#allocation18_spill] sm:$0xff]  ;;  %v17327_v50 = vld [vmem:[#allocation19_spill] sm:$0xff]  ;;  %v17329_v29 = vld [vmem:[#allocation21_spill] sm:$0xff] }
 0xa01   :  { %v8328_v41 = vand.u32 4294901760, %v8327_v20  ;;  %v17326_v43 = vld [vmem:[#allocation10_spill] sm:$0xff] }
 0xa02   :  { %13876 = vmatmul.mubr.f32.vlgmr.msra.gmra.mrb[30].mxu1 %v15949_v10  ;;  %14866 = vmatprep.subr.bf16.mxu1 %v14865_v8  ;;  %v8321_v33 = vand.u32 4294901760, %v8320_v27 }
 0xa03   :  { %13981 = vmatmul.mubr.f32.gmra.mrb[38].mxu0 %v15785_v53  ;;  %14918 = vmatprep.subr.bf16.mxu0 %v14865_v8 }
 0xa04   :  { %14868 = vmatpush3.bf16.msra.mxu1 %v14865_v8  ;;  %14920 = vmatpush3.bf16.msra.mxu0 %v14865_v8  ;;  %v14869_v7 = vpack.c.bf16 %v8328_v41, %v8321_v33 }
 0xa05   :  { %13878 = vmatprep.mubr.f32.mxu1 %v15963_v55  ;;  %13983 = vmatprep.mubr.f32.mxu0 %v15788_v54 }
 0xa06   :  { %13879 = vmatmul.mubr.f32.gmra.mrb[32].mxu1 %v15972_v62  ;;  %14870 = vmatprep.subr.bf16.mxu1 %v14869_v7 }
 0xa07   :  { %13984 = vmatmul.mubr.f32.gmra.mrb[40].mxu0 %v15793_v56  ;;  %13881 = vmatprep.mubr.f32.mxu1 %v15979_v60 }
 0xa08   :  { %14872 = vmatpush3.bf16.msra.mxu1 %v14869_v7  ;;  %13994 = vmatprep.mubr.f32.mxu0 %v15704_v9 }
 0xa09   :  { %14874 = vmatprep.subr.bf16.mxu1 %v14873_v40  ;;  %14922 = vmatprep.subr.bf16.mxu0 %v16763_v61 }
 0xa0a   :  { %13882 = vmatmul.mubr.f32.gmra.mrb[34].mxu1 %v15982_v37 }
 0xa0b   :  { %13995 = vmatmul.mubr.f32.vlgmr.msra.gmra.mrb[36].mxu0 %v15714_v15  ;;  %13892 = vmatprep.mubr.f32.mxu1 %v15846_v6 }
 0xa0c   :  { %14924 = vmatpush3.bf16.msra.mxu0 %v16763_v61  ;;  %13997 = vmatprep.mubr.f32.mxu0 %v15716_v16  ;;  %v17321_v61 = vld [vmem:[#allocation13_spill] sm:$0xff] }
 0xa0d   :  { %14926 = vmatprep.subr.bf16.mxu0 %v14873_v40 }
 0xa0e   :  { %13893 = vmatmul.mubr.f32.vlgmr.msra.gmra.mrb[30].mxu1 %v15900_v12 }
 0xa0f   :  { %14876 = vmatpush3.bf16.msra.mxu1 %v14873_v40  ;;  %13998 = vmatmul.mubr.f32.gmra.mrb[38].mxu0 %v15718_v17 }
 0xa10   :  { %14928 = vmatpush3.bf16.msra.mxu0 %v14873_v40  ;;  %14878 = vmatprep.subr.bf16.mxu1 %v14877_v42  ;;  %v17323_v40 = vld [vmem:[#allocation17_spill] sm:$0xff] }
 0xa11   :  { %13895 = vmatprep.mubr.f32.mxu1 %v15903_v18  ;;  %14000 = vmatprep.mubr.f32.mxu0 %v15737_v26 }
 0xa12   :  { %13896 = vmatmul.mubr.f32.gmra.mrb[32].mxu1 %v15914_v28  ;;  %14930 = vmatprep.subr.bf16.mxu0 %v16755_v58 }
 0xa13   :  { %14880 = vmatpush3.bf16.msra.mxu1 %v14877_v42  ;;  %14001 = vmatmul.mubr.f32.gmra.mrb[40].mxu0 %v15758_v38 }
 0xa14   :  { %14882 = vmatprep.subr.bf16.mxu1 %v16789_v36  ;;  %13898 = vmatprep.mubr.f32.mxu1 %v15927_v52 }
 0xa15   :  { %14011 = vmatprep.mubr.f32.mxu0 %v15724_v19 }
 0xa16   :  { %13899 = vmatmul.mubr.f32.gmra.mrb[34].mxu1 %v15929_v57 }
 0xa17   :  { %14012 = vmatmul.mubr.f32.vlgmr.msra.gmra.mrb[36].mxu0 %v15729_v23  ;;  %13909 = vmatprep.mubr.f32.mxu1 %v15851_v11 }
 0xa18   :  { %14932 = vmatpush3.bf16.msra.mxu0 %v16755_v58  ;;  %14014 = vmatprep.mubr.f32.mxu0 %v15732_v24 }
 0xa19   :  { %14934 = vmatprep.subr.bf16.mxu0 %v16789_v36 }
 0xa1a   :  { %13910 = vmatmul.mubr.f32.vlgmr.msra.gmra.mrb[30].mxu1 %v15912_v22 }
 0xa1b   :  { %14884 = vmatpush3.bf16.msra.mxu1 %v16789_v36  ;;  %14015 = vmatmul.mubr.f32.gmra.mrb[38].mxu0 %v15735_v25 }
 0xa1c   :  { %14936 = vmatpush3.bf16.msra.mxu0 %v16789_v36  ;;  %14886 = vmatprep.subr.bf16.mxu1 %v16800_v3 }
 0xa1d   :  { %13912 = vmatprep.mubr.f32.mxu1 %v15918_v39  ;;  %14017 = vmatprep.mubr.f32.mxu0 %v15754_v34 }
 0xa1e   :  { %13913 = vmatmul.mubr.f32.gmra.mrb[32].mxu1 %v15925_v49  ;;  %14938 = vmatprep.subr.bf16.mxu0 %v16765_v14 }
 0xa1f   :  { %14888 = vmatpush3.bf16.msra.mxu1 %v16800_v3  ;;  %14018 = vmatmul.mubr.f32.gmra.mrb[40].mxu0 %v15772_v46 }
 0xa20   :  { %14890 = vmatprep.subr.bf16.mxu1 %v16804_v4  ;;  %13915 = vmatprep.mubr.f32.mxu1 %v15940_v2 }
 0xa21   :  { %14028 = vmatprep.mubr.f32.mxu0 %v17292_v1 }
 0xa22   :  { %13916 = vmatmul.mubr.f32.gmra.mrb[34].mxu1 %v17307_v0 }
 0xa23   :  { %14029 = vmatmul.mubr.f32.vlgmr.msra.gmra.mrb[36].mxu0 %v17308_v63  ;;  %13926 = vmatprep.mubr.f32.mxu1 %v17321_v61 }
 0xa24   :  { %14940 = vmatpush3.bf16.msra.mxu0 %v16765_v14  ;;  %14031 = vmatprep.mubr.f32.mxu0 %v17322_v31  ;;  %v17328_v14 = vld [vmem:[#allocation12_spill] sm:$0xff] }
 0xa25   :  { %14942 = vmatprep.subr.bf16.mxu0 %v16804_v4 }
 0xa26   :  { %13927 = vmatmul.mubr.f32.vlgmr.msra.gmra.mrb[30].mxu1 %v17323_v40 }
 0xa27   :  { %14892 = vmatpush3.bf16.msra.mxu1 %v16804_v4  ;;  %14032 = vmatmul.mubr.f32.gmra.mrb[38].mxu0 %v17324_v13 }
 0xa28   :  { %14944 = vmatpush3.bf16.msra.mxu0 %v16804_v4  ;;  %14894 = vmatprep.subr.bf16.mxu1 %v16811_v51  ;;  %v17330_v4 = vld [vmem:[#allocation22_spill] sm:$0xff] }
 0xa29   :  { %13929 = vmatprep.mubr.f32.mxu1 %v17325_v32  ;;  %14034 = vmatprep.mubr.f32.mxu0 %v17326_v43 }
 0xa2a   :  { %13930 = vmatmul.mubr.f32.gmra.mrb[32].mxu1 %v17327_v50  ;;  %14946 = vmatprep.subr.bf16.mxu0 %v16755_v58 }
 0xa2b   :  { %14896 = vmatpush3.bf16.msra.mxu1 %v16811_v51  ;;  %14035 = vmatmul.mubr.f32.gmra.mrb[40].mxu0 %v17328_v14 }
 0xa2c   :  { %14898 = vmatprep.subr.bf16.mxu1 %v16789_v36  ;;  %13932 = vmatprep.mubr.f32.mxu1 %v17329_v29 }
 0xa2d   :  { %14045 = vmatprep.mubr.f32.mxu0 %v15704_v9 }
 0xa2e   :  { %13933 = vmatmul.mubr.f32.gmra.mrb[34].mxu1 %v17330_v4 }
 0xa2f   :  { %14046 = vmatmul.mubr.f32.vlgmr.msra.gmra.mrb[36].mxu0 %v15714_v15  ;;  %13943 = vmatprep.mubr.f32.mxu1 %v15846_v6 }
 0xa30   :  { %14948 = vmatpush3.bf16.msra.mxu0 %v16755_v58  ;;  %14048 = vmatprep.mubr.f32.mxu0 %v15716_v16  ;;  %v17331_v58 = vld [vmem:[#allocation11_spill] sm:$0xff] }
 0xa31   :  { %14950 = vmatprep.subr.bf16.mxu0 %v16789_v36 }
 0xa32   :  { %13944 = vmatmul.mubr.f32.vlgmr.msra.gmra.mrb[30].mxu1 %v15900_v12 }
 0xa33   :  { %14900 = vmatpush3.bf16.msra.mxu1 %v16789_v36  ;;  %14049 = vmatmul.mubr.f32.gmra.mrb[38].mxu0 %v15718_v17 }
 0xa34   :  { %14952 = vmatpush3.bf16.msra.mxu0 %v16789_v36  ;;  %14902 = vmatprep.subr.bf16.mxu1 %v16800_v3  ;;  %v17332_v36 = vld [vmem:[#allocation14_spill] sm:$0xff] }
 0xa35   :  { %13946 = vmatprep.mubr.f32.mxu1 %v15903_v18  ;;  %14051 = vmatprep.mubr.f32.mxu0 %v15737_v26 }
 0xa36   :  { %13947 = vmatmul.mubr.f32.gmra.mrb[32].mxu1 %v15914_v28 }
 0xa37   :  { %14904 = vmatpush3.bf16.msra.mxu1 %v16800_v3  ;;  %14052 = vmatmul.mubr.f32.gmra.mrb[40].mxu0 %v15758_v38 }
 0xa38   :  { %13949 = vmatprep.mubr.f32.mxu1 %v15927_v52  ;;  %14062 = vmatprep.mubr.f32.mxu0 %v15704_v9 }
 0xa3a   :  { %13950 = vmatmul.mubr.f32.gmra.mrb[34].mxu1 %v15929_v57 }
 0xa3b   :  { %14063 = vmatmul.mubr.f32.vlgmr.msra.gmra.mrb[36].mxu0 %v15714_v15  ;;  %13960 = vmatprep.mubr.f32.mxu1 %v15846_v6 }
 0xa3c   :  { %14065 = vmatprep.mubr.f32.mxu0 %v15716_v16 }
 0xa3e   :  { %13961 = vmatmul.mubr.f32.vlgmr.msra.gmra.mrb[30].mxu1 %v15900_v12 }
 0xa3f   :  { %14066 = vmatmul.mubr.f32.gmra.mrb[38].mxu0 %v15718_v17  ;;  %13963 = vmatprep.mubr.f32.mxu1 %v15903_v18 }
 0xa40   :  { %14068 = vmatprep.mubr.f32.mxu0 %v15737_v26 }
 0xa42   :  { %13964 = vmatmul.mubr.f32.gmra.mrb[32].mxu1 %v15914_v28 }
 0xa43   :  { %14069 = vmatmul.mubr.f32.gmra.mrb[40].mxu0 %v15758_v38  ;;  %13966 = vmatprep.mubr.f32.mxu1 %v15927_v52 }
 0xa44   :  { %14181 = vmatprep.mubr.f32.mxu0 %v17331_v58  ;;  %v11855_v58 = vld [vmem:[%s17197_s2 + $0x70] sm:$0xff] }
 0xa46   :  { %13967 = vmatmul.mubr.f32.gmra.mrb[34].mxu1 %v15929_v57 }
 0xa47   :  { %14079 = vmatprep.mubr.f32.mxu1 %v17332_v36 }
 0xb0e   :  { %v14064_v3 = vpop.f32.mrb[36].mxu0 }
 0xb0f   :  { %9612 = vrot.lane.b32.xlu1 %v14064_v3, %s15660_s5  ;;  %v9576_v45 = vpop.f32.mrb[37].mxu0  ;;  %v11856_v3 = vld [vmem:[%s17197_s2 + $0x78] sm:$0xff] }
 0xb10   :  { %9610 = vrot.lane.b32.xlu0 %v9576_v45, %s15660_s5  ;;  %v10376_v45 = vand.u32 4294901760, %v11855_v58 }
 0xb11   :  { %v13962_v42 = vpop.f32.mrb[30].mxu1 }
 0xb12   :  { %v14067_v20 = vpop.f32.mrb[38].mxu0  ;;  %v8839_v8 = vpop.f32.mrb[31].mxu1  ;;  %v10506_v29 = vsub.f32 %v11855_v58, %v10376_v45 }
 0xb13   :  { %v9588_v27 = vpop.f32.mrb[39].mxu0  ;;  %8875 = vrot.lane.b32.xlu1 %v13962_v42, %s15660_s5  ;;  %v10379_v42 = vand.u32 4294901760, %v11856_v3 }
 0xb14   :  { %8873 = vrot.lane.b32.xlu0 %v8839_v8, %s15660_s5 }
 0xb15   :  { %v13965_v51 = vpop.f32.mrb[32].mxu1  ;;  %v16921_v4 = vpack.c.bf16 %v10379_v42, %v10376_v45  ;;  %v10513_v14 = vsub.f32 %v11856_v3, %v10379_v42 }
 0xb16   :  { %v14070_v41 = vpop.f32.mrb[40].mxu0  ;;  %v8851_v33 = vpop.f32.mrb[33].mxu1 }
 0xb17   :  { %v9600_v7 = vpop.f32.mrb[41].mxu0  ;;  %9618 = vrot.lane.b32.xlu1 %v14070_v41, %s15661_s6  ;;  %15002 = vmatprep.subr.bf16.mxu0 %v16921_v4  ;;  %v10507_v41 = vand.u32 4294901760, %v10506_v29  ;;  %v10514_v50 = vand.u32 4294901760, %v10513_v14  ;;  %v16929_v31 = vpack.c.bf16 %v10513_v14, %v10506_v29 }
 0xb18   :  { %9616 = vrot.lane.b32.xlu0 %v9600_v7, %s15661_s6  ;;  %15004 = vmatpush3.bf16.msra.mxu0 %v16921_v4 }
 0xb19   :  { %v13968_v36 = vpop.f32.mrb[34].mxu1  ;;  %v10508_v43 = vsub.f32 %v10506_v29, %v10507_v41  ;;  %v10515_v7 = vsub.f32 %v10513_v14, %v10514_v50  ;;  %v16931_v58 = vpack.c.bf16 %v10514_v50, %v10507_v41 }
 0xb1a   :  { %v8863_v8 = vpop.f32.mrb[35].mxu1 }
 0xb1b   :  { %8881 = vrot.lane.b32.xlu1 %v13968_v36, %s15661_s6  ;;  %v10509_v32 = vand.u32 4294901760, %v10508_v43  ;;  %v10516_v13 = vand.u32 4294901760, %v10515_v7 }
 0xb1c   :  { %8879 = vrot.lane.b32.xlu0 %v8863_v8, %s15661_s6 }
 0xb1d   :  { %v16927_v40 = vpack.c.bf16 %v10516_v13, %v10509_v32 }
 0xb81   :  { %v9613_v3 = vpop.permute.xlu1 %9612 }
 0xb82   :  { %v9611_v36 = vpop.permute.xlu0 %9610  ;;  %v9615_v42 = vsel %vm15869_vm1, 0.0, %v9613_v3 }
 0xb83   :  { %v9614_v61 = vsel %vm15869_vm1, 0.0, %v9611_v36  ;;  %v9623_v63 = vadd.f32 %v14067_v20, %v9615_v42 }
 0xb84   :  { %v9622_v43 = vadd.f32 %v9614_v61, %v9588_v27 }
 0xb85   :  { %v8876_v45 = vpop.permute.xlu1 %8875 }
 0xb86   :  { %v8874_v8 = vpop.permute.xlu0 %8873  ;;  %v8878_v13 = vsel %vm15869_vm1, 0.0, %v8876_v45 }
 0xb87   :  { %v8877_v14 = vsel %vm15869_vm1, 0.0, %v8874_v8  ;;  %v8886_v3 = vadd.f32 %v13965_v51, %v8878_v13 }
 0xb88   :  { %v8885_v61 = vadd.f32 %v8877_v14, %v8851_v33  ;;  %v7431_v14 = vld [vmem:[%s17198_s3 + $0x8] sm:$0xff] }
 0xb89   :  { %v9619_v0 = vpop.permute.xlu1 %9618 }
 0xb8a   :  { %v9621_v32 = vsel %vm15875_vm2, 0.0, %v9619_v0  ;;  %v9617_v50 = vpop.permute.xlu0 %9616 }
 0xb8b   :  { %v9625_v29 = vadd.f32 %v9623_v63, %v9621_v32  ;;  %v9620_v41 = vsel %vm15875_vm2, 0.0, %v9617_v50 }
 0xb8c   :  { %v9624_v7 = vadd.f32 %v9622_v43, %v9620_v41  ;;  %v7433_v41 = vmax.f32 %v7431_v14, %v16787_v5 }
 0xb8d   :  { %v9627_v20 = vadd.f32 %v9625_v29, %v17261_v21  ;;  %v8882_v36 = vpop.permute.xlu1 %8881 }
 0xb8e   :  { %v9626_v27 = vadd.f32 %v9624_v7, %v17261_v21  ;;  %v8884_v45 = vsel %vm15875_vm2, 0.0, %v8882_v36  ;;  %v8880_v0 = vpop.permute.xlu0 %8879  ;;  %v7430_v7 = vld [vmem:[%s17198_s3] sm:$0xff] }
 0xb8f   :  { %15625 = vtanh.f32 %v9627_v20  ;;  %v8888_v42 = vadd.f32 %v8886_v3, %v8884_v45  ;;  %v8883_v63 = vsel %vm15875_vm2, 0.0, %v8880_v0 }
 0xb90   :  { %15627 = vtanh.f32 %v9626_v27  ;;  %v8887_v8 = vadd.f32 %v8885_v61, %v8883_v63  ;;  %v7432_v61 = vmax.f32 %v7430_v7, %v16791_v30 }
 0xb91   :  { %v8890_v43 = vadd.f32 %v8888_v42, %v17275_v59 }
 0xb92   :  { %v8889_v51 = vadd.f32 %v8887_v8, %v17275_v59 }
 0xb93   :  { %15629 = vtanh.f32 %v8890_v43 }
 0xb94   :  { %15631 = vtanh.f32 %v8889_v51 }
 0xb99   :  { %v15626_v33 = vpop.eup %15625 }
 0xb9a   :  { %v15628_v13 = vpop.eup %15627  ;;  %v9642_v32 = vand.u32 4294901760, %v15626_v33 }
 0xb9b   :  { %v9639_v50 = vand.u32 4294901760, %v15628_v13 }
 0xb9c   :  { %v9776_v29 = vsub.f32 %v15626_v33, %v9642_v32 }
 0xb9d   :  { %v15630_v3 = vpop.eup %15629  ;;  %v16960_v20 = vpack.c.bf16 %v9642_v32, %v9639_v50  ;;  %v9769_v36 = vsub.f32 %v15628_v13, %v9639_v50 }
 0xb9e   :  { %v15632_v27 = vpop.eup %15631  ;;  %v9648_v45 = vand.u32 4294901760, %v15630_v3  ;;  %v9777_v0 = vand.u32 4294901760, %v9776_v29  ;;  %v16963_v42 = vmax.f32 %v7433_v41, %v15630_v3 }
 0xb9f   :  { %14954 = vmatprep.subr.bf16.mxu1 %v16960_v20  ;;  %15006 = vmatprep.subr.bf16.mxu0 %v16960_v20  ;;  %v9645_v5 = vand.u32 4294901760, %v15632_v27  ;;  %v9770_v63 = vand.u32 4294901760, %v9769_v36  ;;  %v14969_v8 = vpack.c.bf16 %v9776_v29, %v9769_v36  ;;  %v16967_v43 = vmax.f32 %v7432_v61, %v15632_v27 }
 0xba0   :  { %14956 = vmatpush3.bf16.msra.mxu1 %v16960_v20  ;;  %15008 = vmatpush3.bf16.msra.mxu0 %v16960_v20  ;;  %v9778_v51 = vsub.f32 %v9776_v29, %v9777_v0  ;;  %v9790_v30 = vsub.f32 %v15630_v3, %v9648_v45 }
 0xba1   :  { %17333 = vst [vmem:[#allocation15_spill] sm:$0xff] %v16967_v43  ;;  %v16971_v33 = vpack.c.bf16 %v9648_v45, %v9645_v5  ;;  %15010 = vmatprep.subr.bf16.mxu0 %v16927_v40  ;;  %v9771_v13 = vsub.f32 %v9769_v36, %v9770_v63  ;;  %v9783_v32 = vsub.f32 %v15632_v27, %v9645_v5 }
 0xba2   :  { %v16974_v50 = vpack.c.bf16 %v9777_v0, %v9770_v63  ;;  %v9779_v14 = vand.u32 4294901760, %v9778_v51  ;;  %v9791_v41 = vand.u32 4294901760, %v9790_v30 }
 0xba3   :  { %14958 = vmatprep.subr.bf16.mxu1 %v16971_v33  ;;  %14182 = vmatmul.mubr.f32.vlgmr.msra.gmra.mrb[42].mxu0 %v15774_v47  ;;  %v9772_v7 = vand.u32 4294901760, %v9771_v13  ;;  %v9784_v61 = vand.u32 4294901760, %v9783_v32  ;;  %v14973_v43 = vpack.c.bf16 %v9790_v30, %v9783_v32 }
 0xba4   :  { %14960 = vmatpush3.bf16.msra.mxu1 %v16971_v33  ;;  %15012 = vmatpush3.bf16.msra.mxu0 %v16927_v40  ;;  %v9792_v29 = vsub.f32 %v9790_v30, %v9791_v41 }
 0xba5   :  { %14184 = vmatprep.mubr.f32.mxu0 %v15776_v48  ;;  %v14961_v3 = vpack.c.bf16 %v9779_v14, %v9772_v7  ;;  %v9785_v36 = vsub.f32 %v9783_v32, %v9784_v61  ;;  %v16981_v27 = vpack.c.bf16 %v9791_v41, %v9784_v61  ;;  %v17340_v48 = vld [vmem:[#allocation18_spill] sm:$0xff] }
 0xba6   :  { %v9793_v45 = vand.u32 4294901760, %v9792_v29 }
 0xba7   :  { %14080 = vmatmul.mubr.f32.vlgmr.msra.gmra.mrb[36].mxu1 %v15949_v10  ;;  %14962 = vmatprep.subr.bf16.mxu1 %v14961_v3  ;;  %v9786_v0 = vand.u32 4294901760, %v9785_v36 }
 0xba8   :  { %14185 = vmatmul.mubr.f32.gmra.mrb[44].mxu0 %v15785_v53  ;;  %15014 = vmatprep.subr.bf16.mxu0 %v14961_v3  ;;  %v17341_v53 = vld [vmem:[#allocation10_spill] sm:$0xff] }
 0xba9   :  { %14964 = vmatpush3.bf16.msra.mxu1 %v14961_v3  ;;  %15016 = vmatpush3.bf16.msra.mxu0 %v14961_v3  ;;  %v14965_v47 = vpack.c.bf16 %v9793_v45, %v9786_v0 }
 0xbaa   :  { %14082 = vmatprep.mubr.f32.mxu1 %v15963_v55  ;;  %14187 = vmatprep.mubr.f32.mxu0 %v15788_v54  ;;  %v17342_v54 = vld [vmem:[#allocation19_spill] sm:$0xff] }
 0xbab   :  { %14083 = vmatmul.mubr.f32.gmra.mrb[38].mxu1 %v15972_v62  ;;  %14966 = vmatprep.subr.bf16.mxu1 %v14965_v47 }
 0xbac   :  { %14188 = vmatmul.mubr.f32.gmra.mrb[46].mxu0 %v15793_v56  ;;  %14085 = vmatprep.mubr.f32.mxu1 %v15979_v60  ;;  %v17343_v56 = vld [vmem:[#allocation12_spill] sm:$0xff] }
 0xbad   :  { %14968 = vmatpush3.bf16.msra.mxu1 %v14965_v47  ;;  %14198 = vmatprep.mubr.f32.mxu0 %v15704_v9 }
 0xbae   :  { %14970 = vmatprep.subr.bf16.mxu1 %v14969_v8  ;;  %15018 = vmatprep.subr.bf16.mxu0 %v16929_v31 }
 0xbaf   :  { %14086 = vmatmul.mubr.f32.gmra.mrb[40].mxu1 %v15982_v37 }
 0xbb0   :  { %14199 = vmatmul.mubr.f32.vlgmr.msra.gmra.mrb[42].mxu0 %v15714_v15  ;;  %14096 = vmatprep.mubr.f32.mxu1 %v15846_v6 }
 0xbb1   :  { %15020 = vmatpush3.bf16.msra.mxu0 %v16929_v31  ;;  %14201 = vmatprep.mubr.f32.mxu0 %v15716_v16  ;;  %v17345_v31 = vld [vmem:[#allocation22_spill] sm:$0xff] }
 0xbb2   :  { %15022 = vmatprep.subr.bf16.mxu0 %v14969_v8 }
 0xbb3   :  { %14097 = vmatmul.mubr.f32.vlgmr.msra.gmra.mrb[36].mxu1 %v15900_v12 }
 0xbb4   :  { %14972 = vmatpush3.bf16.msra.mxu1 %v14969_v8  ;;  %14202 = vmatmul.mubr.f32.gmra.mrb[44].mxu0 %v15718_v17 }
 0xbb5   :  { %15024 = vmatpush3.bf16.msra.mxu0 %v14969_v8  ;;  %14974 = vmatprep.subr.bf16.mxu1 %v14973_v43 }
 0xbb6   :  { %14099 = vmatprep.mubr.f32.mxu1 %v15903_v18  ;;  %14204 = vmatprep.mubr.f32.mxu0 %v15737_v26 }
 0xbb7   :  { %14100 = vmatmul.mubr.f32.gmra.mrb[38].mxu1 %v15914_v28  ;;  %15026 = vmatprep.subr.bf16.mxu0 %v16921_v4 }
 0xbb8   :  { %14976 = vmatpush3.bf16.msra.mxu1 %v14973_v43  ;;  %14205 = vmatmul.mubr.f32.gmra.mrb[46].mxu0 %v15758_v38 }
 0xbb9   :  { %14978 = vmatprep.subr.bf16.mxu1 %v16960_v20  ;;  %14102 = vmatprep.mubr.f32.mxu1 %v15927_v52 }
 0xbba   :  { %14215 = vmatprep.mubr.f32.mxu0 %v15724_v19  ;;  %v17334_v19 = vld [vmem:[#allocation20_spill] sm:$0xff] }
 0xbbb   :  { %14103 = vmatmul.mubr.f32.gmra.mrb[40].mxu1 %v15929_v57 }
 0xbbc   :  { %14216 = vmatmul.mubr.f32.vlgmr.msra.gmra.mrb[42].mxu0 %v15729_v23  ;;  %14113 = vmatprep.mubr.f32.mxu1 %v15851_v11  ;;  %v17335_v23 = vld [vmem:[#allocation7_spill] sm:$0xff] }
 0xbbd   :  { %15028 = vmatpush3.bf16.msra.mxu0 %v16921_v4  ;;  %14218 = vmatprep.mubr.f32.mxu0 %v15732_v24  ;;  %v17336_v24 = vld [vmem:[#allocation13_spill] sm:$0xff] }
 0xbbe   :  { %15030 = vmatprep.subr.bf16.mxu0 %v16960_v20 }
 0xbbf   :  { %14114 = vmatmul.mubr.f32.vlgmr.msra.gmra.mrb[36].mxu1 %v15912_v22 }
 0xbc0   :  { %14980 = vmatpush3.bf16.msra.mxu1 %v16960_v20  ;;  %14219 = vmatmul.mubr.f32.gmra.mrb[44].mxu0 %v15735_v25  ;;  %v17337_v25 = vld [vmem:[#allocation8_spill] sm:$0xff] }
 0xbc1   :  { %15032 = vmatpush3.bf16.msra.mxu0 %v16960_v20  ;;  %14982 = vmatprep.subr.bf16.mxu1 %v16971_v33 }
 0xbc2   :  { %14116 = vmatprep.mubr.f32.mxu1 %v15918_v39  ;;  %14221 = vmatprep.mubr.f32.mxu0 %v15754_v34  ;;  %v17338_v34 = vld [vmem:[#allocation17_spill] sm:$0xff] }
 0xbc3   :  { %14117 = vmatmul.mubr.f32.gmra.mrb[38].mxu1 %v15925_v49  ;;  %15034 = vmatprep.subr.bf16.mxu0 %v16931_v58 }
 0xbc4   :  { %14984 = vmatpush3.bf16.msra.mxu1 %v16971_v33  ;;  %14222 = vmatmul.mubr.f32.gmra.mrb[46].mxu0 %v15772_v46  ;;  %v17339_v46 = vld [vmem:[#allocation9_spill] sm:$0xff] }
 0xbc5   :  { %14986 = vmatprep.subr.bf16.mxu1 %v16974_v50  ;;  %14119 = vmatprep.mubr.f32.mxu1 %v15940_v2 }
 0xbc6   :  { %14232 = vmatprep.mubr.f32.mxu0 %v17292_v1  ;;  %v17344_v1 = vld [vmem:[#allocation21_spill] sm:$0xff] }
 0xbc7   :  { %14120 = vmatmul.mubr.f32.gmra.mrb[40].mxu1 %v17334_v19 }
 0xbc8   :  { %14233 = vmatmul.mubr.f32.vlgmr.msra.gmra.mrb[42].mxu0 %v17335_v23  ;;  %14130 = vmatprep.mubr.f32.mxu1 %v17336_v24 }
 0xbc9   :  { %15036 = vmatpush3.bf16.msra.mxu0 %v16931_v58  ;;  %14235 = vmatprep.mubr.f32.mxu0 %v17337_v25 }
 0xbca   :  { %15038 = vmatprep.subr.bf16.mxu0 %v16974_v50 }
 0xbcb   :  { %14131 = vmatmul.mubr.f32.vlgmr.msra.gmra.mrb[36].mxu1 %v17338_v34 }
 0xbcc   :  { %14988 = vmatpush3.bf16.msra.mxu1 %v16974_v50  ;;  %14236 = vmatmul.mubr.f32.gmra.mrb[44].mxu0 %v17339_v46 }
 0xbcd   :  { %15040 = vmatpush3.bf16.msra.mxu0 %v16974_v50  ;;  %14990 = vmatprep.subr.bf16.mxu1 %v16981_v27 }
 0xbce   :  { %14133 = vmatprep.mubr.f32.mxu1 %v17340_v48  ;;  %14238 = vmatprep.mubr.f32.mxu0 %v17341_v53 }
 0xbcf   :  { %14134 = vmatmul.mubr.f32.gmra.mrb[38].mxu1 %v17342_v54  ;;  %15042 = vmatprep.subr.bf16.mxu0 %v16921_v4 }
 0xbd0   :  { %14992 = vmatpush3.bf16.msra.mxu1 %v16981_v27  ;;  %14239 = vmatmul.mubr.f32.gmra.mrb[46].mxu0 %v17343_v56 }
 0xbd1   :  { %14994 = vmatprep.subr.bf16.mxu1 %v16960_v20  ;;  %14136 = vmatprep.mubr.f32.mxu1 %v17344_v1 }
 0xbd2   :  { %14249 = vmatprep.mubr.f32.mxu0 %v15704_v9 }
 0xbd3   :  { %14137 = vmatmul.mubr.f32.gmra.mrb[40].mxu1 %v17345_v31 }
 0xbd4   :  { %14250 = vmatmul.mubr.f32.vlgmr.msra.gmra.mrb[42].mxu0 %v15714_v15  ;;  %14147 = vmatprep.mubr.f32.mxu1 %v15846_v6 }
 0xbd5   :  { %15044 = vmatpush3.bf16.msra.mxu0 %v16921_v4  ;;  %14252 = vmatprep.mubr.f32.mxu0 %v15716_v16 }
 0xbd6   :  { %15046 = vmatprep.subr.bf16.mxu0 %v16960_v20 }
 0xbd7   :  { %14148 = vmatmul.mubr.f32.vlgmr.msra.gmra.mrb[36].mxu1 %v15900_v12 }
 0xbd8   :  { %14996 = vmatpush3.bf16.msra.mxu1 %v16960_v20  ;;  %14253 = vmatmul.mubr.f32.gmra.mrb[44].mxu0 %v15718_v17 }
 0xbd9   :  { %15048 = vmatpush3.bf16.msra.mxu0 %v16960_v20  ;;  %14998 = vmatprep.subr.bf16.mxu1 %v16971_v33 }
 0xbda   :  { %14150 = vmatprep.mubr.f32.mxu1 %v15903_v18  ;;  %14255 = vmatprep.mubr.f32.mxu0 %v15737_v26 }
 0xbdb   :  { %14151 = vmatmul.mubr.f32.gmra.mrb[38].mxu1 %v15914_v28 }
 0xbdc   :  { %15000 = vmatpush3.bf16.msra.mxu1 %v16971_v33  ;;  %14256 = vmatmul.mubr.f32.gmra.mrb[46].mxu0 %v15758_v38 }
 0xbdd   :  { %14153 = vmatprep.mubr.f32.mxu1 %v15927_v52  ;;  %14266 = vmatprep.mubr.f32.mxu0 %v15704_v9  ;;  %v17346_v9 = vld [vmem:[#allocation14_spill] sm:$0xff] }
 0xbdf   :  { %14154 = vmatmul.mubr.f32.gmra.mrb[40].mxu1 %v15929_v57 }
 0xbe0   :  { %14267 = vmatmul.mubr.f32.vlgmr.msra.gmra.mrb[42].mxu0 %v15714_v15  ;;  %14164 = vmatprep.mubr.f32.mxu1 %v15846_v6 }
 0xbe1   :  { %14269 = vmatprep.mubr.f32.mxu0 %v15716_v16 }
 0xbe3   :  { %14165 = vmatmul.mubr.f32.vlgmr.msra.gmra.mrb[36].mxu1 %v15900_v12 }
 0xbe4   :  { %14270 = vmatmul.mubr.f32.gmra.mrb[44].mxu0 %v15718_v17  ;;  %14167 = vmatprep.mubr.f32.mxu1 %v15903_v18 }
 0xbe5   :  { %14272 = vmatprep.mubr.f32.mxu0 %v15737_v26 }
 0xbe7   :  { %14168 = vmatmul.mubr.f32.gmra.mrb[38].mxu1 %v15914_v28 }
 0xbe8   :  { %14273 = vmatmul.mubr.f32.gmra.mrb[46].mxu0 %v15758_v38  ;;  %14170 = vmatprep.mubr.f32.mxu1 %v15927_v52 }
 0xbeb   :  { %14171 = vmatmul.mubr.f32.gmra.mrb[40].mxu1 %v15929_v57 }
 0xbec   :  { %14283 = vmatprep.mubr.f32.mxu1 %v17346_v9 }
 0xcb3   :  { %v14268_v15 = vpop.f32.mrb[42].mxu0 }
 0xcb4   :  { %11077 = vrot.lane.b32.xlu1 %v14268_v15, %s15660_s5  ;;  %v11041_v16 = vpop.f32.mrb[43].mxu0 }
 0xcb5   :  { %11075 = vrot.lane.b32.xlu0 %v11041_v16, %s15660_s5 }
 0xcb6   :  { %v14166_v17 = vpop.f32.mrb[36].mxu1 }
 0xcb7   :  { %v14271_v40 = vpop.f32.mrb[44].mxu0  ;;  %v10304_v4 = vpop.f32.mrb[37].mxu1 }
 0xcb8   :  { %v11053_v26 = vpop.f32.mrb[45].mxu0  ;;  %10340 = vrot.lane.b32.xlu1 %v14166_v17, %s15660_s5 }
 0xcb9   :  { %10338 = vrot.lane.b32.xlu0 %v10304_v4, %s15660_s5 }
 0xcba   :  { %v14169_v38 = vpop.f32.mrb[38].mxu1 }
 0xcbb   :  { %v14274_v58 = vpop.f32.mrb[46].mxu0  ;;  %v10316_v20 = vpop.f32.mrb[39].mxu1 }
 0xcbc   :  { %v11065_v5 = vpop.f32.mrb[47].mxu0  ;;  %11083 = vrot.lane.b32.xlu1 %v14274_v58, %s15661_s6 }
 0xcbd   :  { %11081 = vrot.lane.b32.xlu0 %v11065_v5, %s15661_s6 }
 0xcbe   :  { %v14172_v63 = vpop.f32.mrb[40].mxu1 }
 0xcbf   :  { %v10328_v8 = vpop.f32.mrb[41].mxu1 }
 0xcc0   :  { %10346 = vrot.lane.b32.xlu1 %v14172_v63, %s15661_s6 }
 0xcc1   :  { %10344 = vrot.lane.b32.xlu0 %v10328_v8, %s15661_s6 }
 0xd26   :  { %v11078_v43 = vpop.permute.xlu1 %11077 }
 0xd27   :  { %v11076_v51 = vpop.permute.xlu0 %11075  ;;  %v11080_v33 = vsel %vm15869_vm1, 0.0, %v11078_v43 }
 0xd28   :  { %v11079_v32 = vsel %vm15869_vm1, 0.0, %v11076_v51  ;;  %v11088_v50 = vadd.f32 %v14271_v40, %v11080_v33 }
 0xd29   :  { %v11087_v41 = vadd.f32 %v11079_v32, %v11053_v26 }
 0xd2a   :  { %v10341_v30 = vpop.permute.xlu1 %10340 }
 0xd2b   :  { %v10339_v13 = vpop.permute.xlu0 %10338  ;;  %v10343_v7 = vsel %vm15869_vm1, 0.0, %v10341_v30 }
 0xd2c   :  { %v10342_v3 = vsel %vm15869_vm1, 0.0, %v10339_v13  ;;  %v10351_v0 = vadd.f32 %v14169_v38, %v10343_v7 }
 0xd2d   :  { %v10350_v25 = vadd.f32 %v10342_v3, %v10316_v20 }
 0xd2e   :  { %v11084_v14 = vpop.permute.xlu1 %11083 }
 0xd2f   :  { %v11086_v61 = vsel %vm15875_vm2, 0.0, %v11084_v14  ;;  %v11082_v29 = vpop.permute.xlu0 %11081 }
 0xd30   :  { %v11090_v36 = vadd.f32 %v11088_v50, %v11086_v61  ;;  %v11085_v27 = vsel %vm15875_vm2, 0.0, %v11082_v29  ;;  %v17347_v50 = vld [vmem:[#allocation15_spill] sm:$0xff] }
 0xd31   :  { %v11089_v45 = vadd.f32 %v11087_v41, %v11085_v27 }
 0xd32   :  { %v11092_v47 = vadd.f32 %v11090_v36, %v17261_v21  ;;  %v10347_v23 = vpop.permute.xlu1 %10346 }
 0xd33   :  { %v11091_v46 = vadd.f32 %v11089_v45, %v17261_v21  ;;  %v10349_v53 = vsel %vm15875_vm2, 0.0, %v10347_v23  ;;  %v10345_v56 = vpop.permute.xlu0 %10344 }
 0xd34   :  { %15633 = vtanh.f32 %v11092_v47  ;;  %v10353_v9 = vadd.f32 %v10351_v0, %v10349_v53  ;;  %v10348_v15 = vsel %vm15875_vm2, 0.0, %v10345_v56 }
 0xd35   :  { %15635 = vtanh.f32 %v11091_v46  ;;  %v10352_v16 = vadd.f32 %v10350_v25, %v10348_v15 }
 0xd36   :  { %v10355_v17 = vadd.f32 %v10353_v9, %v17275_v59 }
 0xd37   :  { %v10354_v40 = vadd.f32 %v10352_v16, %v17275_v59 }
 0xd38   :  { %15637 = vtanh.f32 %v10355_v17 }
 0xd39   :  { %15639 = vtanh.f32 %v10354_v40 }
 0xd3e   :  { %v15634_v4 = vpop.eup %15633 }
 0xd3f   :  { %v15636_v26 = vpop.eup %15635  ;;  %v11107_v21 = vand.u32 4294901760, %v15634_v4 }
 0xd40   :  { %v11104_v38 = vand.u32 4294901760, %v15636_v26 }
 0xd41   :  { %v11241_v58 = vsub.f32 %v15634_v4, %v11107_v21 }
 0xd42   :  { %v17106_v20 = vpop.eup %15637  ;;  %v17108_v5 = vpack.c.bf16 %v11107_v21, %v11104_v38  ;;  %v11234_v63 = vsub.f32 %v15636_v26, %v11104_v38 }
 0xd43   :  { %v17110_v8 = vpop.eup %15639  ;;  %v11113_v43 = vand.u32 4294901760, %v17106_v20  ;;  %v11242_v51 = vand.u32 4294901760, %v11241_v58  ;;  %v10363_v30 = vmax.f32 %v16963_v42, %v17106_v20 }
 0xd44   :  { %15050 = vmatprep.subr.bf16.mxu1 %v17108_v5  ;;  %v11110_v33 = vand.u32 4294901760, %v17110_v8  ;;  %v11235_v13 = vand.u32 4294901760, %v11234_v63  ;;  %v15065_v32 = vpack.c.bf16 %v11241_v58, %v11234_v63  ;;  %v10362_v14 = vmax.f32 %v17347_v50, %v17110_v8 }
 0xd45   :  { %15052 = vmatpush3.bf16.msra.mxu1 %v17108_v5  ;;  %v11243_v41 = vsub.f32 %v11241_v58, %v11242_v51  ;;  %v11255_v7 = vsub.f32 %v17106_v20, %v11113_v43 }
 0xd46   :  { %v17121_v61 = vpack.c.bf16 %v11113_v43, %v11110_v33  ;;  %v11236_v29 = vsub.f32 %v11234_v63, %v11235_v13  ;;  %v11248_v3 = vsub.f32 %v17110_v8, %v11110_v33  ;;  %v15081_v36 = vpack.c.bf16 %v11242_v51, %v11235_v13 }
 0xd47   :  { %v11244_v27 = vand.u32 4294901760, %v11243_v41  ;;  %v11256_v45 = vand.u32 4294901760, %v11255_v7 }
 0xd48   :  { %15054 = vmatprep.subr.bf16.mxu1 %v17121_v61  ;;  %v11237_v0 = vand.u32 4294901760, %v11236_v29  ;;  %v11249_v47 = vand.u32 4294901760, %v11248_v3  ;;  %v15069_v23 = vpack.c.bf16 %v11255_v7, %v11248_v3 }
 0xd49   :  { %15056 = vmatpush3.bf16.msra.mxu1 %v17121_v61  ;;  %v11257_v25 = vsub.f32 %v11255_v7, %v11256_v45 }
 0xd4a   :  { %v15057_v46 = vpack.c.bf16 %v11244_v27, %v11237_v0  ;;  %v11250_v53 = vsub.f32 %v11248_v3, %v11249_v47  ;;  %v15085_v56 = vpack.c.bf16 %v11256_v45, %v11249_v47 }
 0xd4b   :  { %v11258_v9 = vand.u32 4294901760, %v11257_v25 }
 0xd4c   :  { %14284 = vmatmul.mubr.f32.vlgmr.msra.gmra.mrb[42].mxu1 %v15949_v10  ;;  %15058 = vmatprep.subr.bf16.mxu1 %v15057_v46  ;;  %v11251_v15 = vand.u32 4294901760, %v11250_v53 }
 0xd4d   :  { %15060 = vmatpush3.bf16.msra.mxu1 %v15057_v46  ;;  %14286 = vmatprep.mubr.f32.mxu1 %v15963_v55 }
 0xd4e   :  { %v15061_v16 = vpack.c.bf16 %v11258_v9, %v11251_v15 }
 0xd50   :  { %14287 = vmatmul.mubr.f32.gmra.mrb[44].mxu1 %v15972_v62  ;;  %15062 = vmatprep.subr.bf16.mxu1 %v15061_v16 }
 0xd51   :  { %15064 = vmatpush3.bf16.msra.mxu1 %v15061_v16  ;;  %14289 = vmatprep.mubr.f32.mxu1 %v15979_v60 }
 0xd52   :  { %15066 = vmatprep.subr.bf16.mxu1 %v15065_v32 }
 0xd54   :  { %14290 = vmatmul.mubr.f32.gmra.mrb[46].mxu1 %v15982_v37 }
 0xd55   :  { %14300 = vmatprep.mubr.f32.mxu1 %v15846_v6 }
 0xd58   :  { %14301 = vmatmul.mubr.f32.vlgmr.msra.gmra.mrb[42].mxu1 %v15900_v12 }
 0xd59   :  { %15068 = vmatpush3.bf16.msra.mxu1 %v15065_v32  ;;  %14303 = vmatprep.mubr.f32.mxu1 %v15903_v18 }
 0xd5a   :  { %15070 = vmatprep.subr.bf16.mxu1 %v15069_v23 }
 0xd5c   :  { %14304 = vmatmul.mubr.f32.gmra.mrb[44].mxu1 %v15914_v28 }
 0xd5d   :  { %15072 = vmatpush3.bf16.msra.mxu1 %v15069_v23  ;;  %14306 = vmatprep.mubr.f32.mxu1 %v15927_v52 }
 0xd5e   :  { %15074 = vmatprep.subr.bf16.mxu1 %v17108_v5 }
 0xd60   :  { %14307 = vmatmul.mubr.f32.gmra.mrb[46].mxu1 %v15929_v57 }
 0xd61   :  { %14317 = vmatprep.mubr.f32.mxu1 %v15851_v11 }
 0xd64   :  { %14318 = vmatmul.mubr.f32.vlgmr.msra.gmra.mrb[42].mxu1 %v15912_v22 }
 0xd65   :  { %15076 = vmatpush3.bf16.msra.mxu1 %v17108_v5  ;;  %14320 = vmatprep.mubr.f32.mxu1 %v15918_v39 }
 0xd66   :  { %15078 = vmatprep.subr.bf16.mxu1 %v17121_v61 }
 0xd68   :  { %14321 = vmatmul.mubr.f32.gmra.mrb[44].mxu1 %v15925_v49 }
 0xd69   :  { %15080 = vmatpush3.bf16.msra.mxu1 %v17121_v61  ;;  %14323 = vmatprep.mubr.f32.mxu1 %v15940_v2 }
 0xd6a   :  { %15082 = vmatprep.subr.bf16.mxu1 %v15081_v36 }
 0xd6c   :  { %14324 = vmatmul.mubr.f32.gmra.mrb[46].mxu1 %v17334_v19 }
 0xd6d   :  { %14334 = vmatprep.mubr.f32.mxu1 %v17336_v24 }
 0xd70   :  { %14335 = vmatmul.mubr.f32.vlgmr.msra.gmra.mrb[42].mxu1 %v17338_v34 }
 0xd71   :  { %15084 = vmatpush3.bf16.msra.mxu1 %v15081_v36  ;;  %14337 = vmatprep.mubr.f32.mxu1 %v17340_v48 }
 0xd72   :  { %15086 = vmatprep.subr.bf16.mxu1 %v15085_v56 }
 0xd74   :  { %14338 = vmatmul.mubr.f32.gmra.mrb[44].mxu1 %v17342_v54 }
 0xd75   :  { %15088 = vmatpush3.bf16.msra.mxu1 %v15085_v56  ;;  %14340 = vmatprep.mubr.f32.mxu1 %v17344_v1 }
 0xd76   :  { %15090 = vmatprep.subr.bf16.mxu1 %v17108_v5 }
 0xd78   :  { %14341 = vmatmul.mubr.f32.gmra.mrb[46].mxu1 %v17345_v31 }
 0xd79   :  { %14351 = vmatprep.mubr.f32.mxu1 %v15846_v6 }
 0xd7c   :  { %14352 = vmatmul.mubr.f32.vlgmr.msra.gmra.mrb[42].mxu1 %v15900_v12 }
 0xd7d   :  { %15092 = vmatpush3.bf16.msra.mxu1 %v17108_v5  ;;  %14354 = vmatprep.mubr.f32.mxu1 %v15903_v18 }
 0xd7e   :  { %15094 = vmatprep.subr.bf16.mxu1 %v17121_v61 }
 0xd80   :  { %14355 = vmatmul.mubr.f32.gmra.mrb[44].mxu1 %v15914_v28 }
 0xd81   :  { %15096 = vmatpush3.bf16.msra.mxu1 %v17121_v61  ;;  %14357 = vmatprep.mubr.f32.mxu1 %v15927_v52 }
 0xd84   :  { %14358 = vmatmul.mubr.f32.gmra.mrb[46].mxu1 %v15929_v57 }
 0xd85   :  { %14368 = vmatprep.mubr.f32.mxu1 %v15846_v6 }
 0xd88   :  { %14369 = vmatmul.mubr.f32.vlgmr.msra.gmra.mrb[42].mxu1 %v15900_v12 }
 0xd89   :  { %14371 = vmatprep.mubr.f32.mxu1 %v15903_v18 }
 0xd8c   :  { %14372 = vmatmul.mubr.f32.gmra.mrb[44].mxu1 %v15914_v28 }
 0xd8d   :  { %14374 = vmatprep.mubr.f32.mxu1 %v15927_v52 }
 0xd90   :  { %14375 = vmatmul.mubr.f32.gmra.mrb[46].mxu1 %v15929_v57 }
 0xe5b   :  { %v14370_v11 = vpop.f32.mrb[42].mxu1 }
 0xe5c   :  { %11805 = vrot.lane.b32.xlu1 %v14370_v11, %s15660_s5  ;;  %v11769_v22 = vpop.f32.mrb[43].mxu1 }
 0xe5d   :  { %11803 = vrot.lane.b32.xlu0 %v11769_v22, %s15660_s5 }
 0xe5f   :  { %v14373_v39 = vpop.f32.mrb[44].mxu1 }
 0xe60   :  { %v11781_v49 = vpop.f32.mrb[45].mxu1 }
 0xe63   :  { %v14376_v2 = vpop.f32.mrb[46].mxu1 }
 0xe64   :  { %11811 = vrot.lane.b32.xlu1 %v14376_v2, %s15661_s6  ;;  %v11793_v6 = vpop.f32.mrb[47].mxu1 }
 0xe65   :  { %11809 = vrot.lane.b32.xlu0 %v11793_v6, %s15661_s6 }
 0xece   :  { %v11806_v12 = vpop.permute.xlu1 %11805 }
 0xecf   :  { %v11804_v18 = vpop.permute.xlu0 %11803  ;;  %v11808_v28 = vsel %vm15869_vm1, 0.0, %v11806_v12 }
 0xed0   :  { %v11807_v52 = vsel %vm15869_vm1, 0.0, %v11804_v18  ;;  %v11816_v57 = vadd.f32 %v14373_v39, %v11808_v28 }
 0xed1   :  { %v11815_v55 = vadd.f32 %v11807_v52, %v11781_v49 }
 0xed6   :  { %v11812_v10 = vpop.permute.xlu1 %11811 }
 0xed7   :  { %v11814_v62 = vsel %vm15875_vm2, 0.0, %v11812_v10  ;;  %v11810_v60 = vpop.permute.xlu0 %11809 }
 0xed8   :  { %v11818_v37 = vadd.f32 %v11816_v57, %v11814_v62  ;;  %v11813_v19 = vsel %vm15875_vm2, 0.0, %v11810_v60 }
 0xed9   :  { %v11817_v24 = vadd.f32 %v11815_v55, %v11813_v19 }
 0xeda   :  { %v11820_v34 = vadd.f32 %v11818_v37, %v17275_v59 }
 0xedb   :  { %v11819_v48 = vadd.f32 %v11817_v24, %v17275_v59 }
 0xedc   :  { %15641 = vtanh.f32 %v11820_v34 }
 0xedd   :  { %15643 = vtanh.f32 %v11819_v48 }
 0xee6   :  { %v15642_v44 = vpop.eup %15641 }
 0xee7   :  { %v15644_v54 = vpop.eup %15643  ;;  %v11828_v1 = vmax.f32 %v10363_v30, %v15642_v44 }
 0xee8   :  { %v11827_v31 = vmax.f32 %v10362_v14, %v15644_v54 }
 0xee9   :  { %11830 = vst [vmem:[%s17198_s3 + $0x8] sm:$0xff] %v11828_v1 }
 0xeea   :  { %11829 = vst [vmem:[%s17198_s3] sm:$0xff] %v11827_v31 }
 0xeeb   :  { %11835 = vsyncpa [#allocation4], 1 }

</bundles_post_ra>
